<compile_context>
chip_gen: v5e
topology: v5e:2x2
jax: 0.10.0
libtpu: 0.0.40
codegen_flags: <defaults>
</compile_context>

<pallas_src>
import functools
import math

import jax
import jax.numpy as jnp
from jax.experimental import pallas as pl
from jax.experimental.pallas import tpu as pltpu

LN_EPS = 1e-5
_VMEM_LIMIT = 32 * 1024 * 1024          # safe on v5e/v6e (128 MiB) and v7x (64 MiB)
_COMPUTE_DTYPE = jnp.bfloat16           # MXU operand dtype; accumulation is always f32


# ----------------------------- fused kernel ---------------------------------

def disaoformer_fused_kernel(
        txt_ref, qry_ref, patch_ref,
        tlg_ref, tlb_ref, tw_ref, tb_ref,
        sa_wqkv_ref, sa_bqkv_ref, sa_wo_ref, sa_bo_ref,
        n1g_ref, n1b_ref,
        ca_wq_ref, ca_wkv_ref, ca_wo_ref, ca_bo_ref,
        cng_ref, cnb_ref,
        w1_ref, b1_ref, w2_ref, b2_ref,
        fng_ref, fnb_ref,
        o_ref, *, nhead, t_txt, eps):
    """One (stream, batch) element of the full DisAOFormer forward."""
    f32 = jnp.float32
    N, C = qry_ref.shape            # tokens (txt + query), d_model (lane-dense 128)
    hd = C // nhead

    def mm(x, w_ref):
        # bf16 (or weight-dtype) operands, f32 MXU accumulation.
        return jnp.dot(x.astype(w_ref.dtype), w_ref[...], preferred_element_type=f32)

    def ln(x, g_ref, b_ref):
        mu = jnp.mean(x, axis=-1, keepdims=True)
        xc = x - mu
        var = jnp.mean(xc * xc, axis=-1, keepdims=True)
        return xc * jax.lax.rsqrt(var + eps) * g_ref[...].astype(f32) + b_ref[...].astype(f32)

    def mha(q, k, v, wo_ref, extra):
        # Per-head attention with heads kept PACKED on the 128-lane axis.
        # Head selection is done with lane masks, so every matmul keeps a
        # 128-wide operand and the context stays a lane-dense (N, C) tile
        # (no narrow (N, hd) tiles, no head split/merge relayouts).
        # `q` already has the softmax scale folded into its projection.
        # Returns ctx @ Wo + extra   (extra = residual + out-proj bias, fused).
        lane = jax.lax.broadcasted_iota(jnp.int32, (1, C), 1)
        qc = q.astype(wo_ref.dtype)
        ctx = jnp.zeros(q.shape, f32)
        for h in range(nhead):                                   # unrolled (nhead=8)
            m = ((lane >= h * hd) & (lane < (h + 1) * hd)).astype(f32)   # (1, C)
            kh = (k * m).astype(wo_ref.dtype)                    # only head-h lanes survive
            vh = (v * m).astype(wo_ref.dtype)
            s = jnp.einsum('nd,md->nm', qc, kh, preferred_element_type=f32)  # (N, M)
            s = s - jnp.max(s, axis=-1, keepdims=True)
            p = jnp.exp(s)
            p = p * pl.reciprocal(jnp.sum(p, axis=-1, keepdims=True), approx=True)
            ctx = ctx + jnp.dot(p.astype(wo_ref.dtype), vh, preferred_element_type=f32)
        return mm(ctx, wo_ref) + extra

    # ---- text projection: LN(768) + Linear(768, C); rows >= t_txt are padding ----
    tp = mm(ln(txt_ref[...].astype(f32), tlg_ref, tlb_ref), tw_ref) + tb_ref[...].astype(f32)
    rows = jax.lax.broadcasted_iota(jnp.int32, (N, C), 0)
    # q0 = cat(text_projection, query) along the token axis, built with a row mask
    # (qry_ref already carries the query tokens in rows [t_txt:N]).
    q0 = jnp.where(rows < t_txt, tp, qry_ref[...].astype(f32))                    # (N, C)

    # ---- self-attention (sa_a) + residual + LayerNorm1 ----
    qkv = mm(q0, sa_wqkv_ref) + sa_bqkv_ref[...].astype(f32)                      # (N, 3C)
    q1 = ln(mha(qkv[:, :C], qkv[:, C:2 * C], qkv[:, 2 * C:],
                sa_wo_ref, q0 + sa_bo_ref[...].astype(f32)),
            n1g_ref, n1b_ref)

    # ---- cross-attention over batch_patch + residual ----
    patch = patch_ref[...].astype(f32)                                            # (M, C)
    kv = mm(patch, ca_wkv_ref)                                                    # (M, 2C)
    q2 = mha(mm(q1, ca_wq_ref), kv[:, :C], kv[:, C:],
             ca_wo_ref, q1 + ca_bo_ref[...].astype(f32))

    # ---- MLP: LN -> FC1 -> QuickGELU -> FC2 -> +residual ----
    # (N is tiny here, so the (N, 4C) hidden easily stays in registers/VMEM.)
    h = mm(ln(q2, cng_ref, cnb_ref), w1_ref) + b1_ref[...].astype(f32)            # (N, 4C)
    h = h * (1.0 / (1.0 + jnp.exp(-1.702 * h)))                                   # QuickGELU
    q3 = q2 + mm(h, w2_ref) + b2_ref[...].astype(f32)

    # ---- final LayerNorm ----
    o_ref[...] = ln(q3, fng_ref, fnb_ref).astype(o_ref.dtype)


# ----------------------------- parameter preparation ------------------------

def prepare_params(params, nhead, compute_dtype=_COMPUTE_DTYPE):
    """One-time (outside jit) weight transform: stack the att/obj streams on a
    leading axis of 2, fuse QKV / KV weights, fold the softmax scale into the
    Q projections, and cast matmul weights to the MXU compute dtype."""
    d = params['sa_a']['wq'].shape[0]
    hd = d // nhead
    scale = hd ** -0.5
    cd = compute_dtype

    def stack2(a, b):
        return jnp.stack([a, b], axis=0)

    sa = params['sa_a']
    aca, oca = params['att_ca'], params['obj_ca']
    return {
        # text projection (LN768 + Linear) -- stream-dependent
        'txt_ln_g': stack2(params['att_proj']['ln']['g'], params['obj_proj']['ln']['g']),
        'txt_ln_b': stack2(params['att_proj']['ln']['b'], params['obj_proj']['ln']['b']),
        'txt_w': stack2(params['att_proj']['fc']['w'], params['obj_proj']['fc']['w']).astype(cd),
        'txt_b': stack2(params['att_proj']['fc']['b'], params['obj_proj']['fc']['b']),
        # sa_a (shared by both streams); fused QKV, scale folded into the Q part
        'sa_wqkv': jnp.concatenate([sa['wq'] * scale, sa['wk'], sa['wv']], axis=1).astype(cd),
        'sa_bqkv': jnp.concatenate([sa['bq'] * scale, sa['bk'], sa['bv']], axis=1),
        'sa_wo': sa['wo'].astype(cd),
        'sa_bo': sa['bo'],
        'n1_g': stack2(params['norm_att1']['g'], params['norm_obj1']['g']),
        'n1_b': stack2(params['norm_att1']['b'], params['norm_obj1']['b']),
        # cross attention (qkv_bias=False in the module -> q/k/v biases are zero & omitted)
        'ca_wq': stack2(aca['attn']['wq'] * scale, oca['attn']['wq'] * scale).astype(cd),
        'ca_wkv': stack2(jnp.concatenate([aca['attn']['wk'], aca['attn']['wv']], axis=1),
                         jnp.concatenate([oca['attn']['wk'], oca['attn']['wv']], axis=1)).astype(cd),
        'ca_wo': stack2(aca['attn']['wo'], oca['attn']['wo']).astype(cd),
        'ca_bo': stack2(aca['attn']['bo'], oca['attn']['bo']),
        'cn_g': stack2(aca['norm']['g'], oca['norm']['g']),
        'cn_b': stack2(aca['norm']['b'], oca['norm']['b']),
        'w1': stack2(aca['mlp']['w1'], oca['mlp']['w1']).astype(cd),
        'b1': stack2(aca['mlp']['b1'], oca['mlp']['b1']),
        'w2': stack2(aca['mlp']['w2'], oca['mlp']['w2']).astype(cd),
        'b2': stack2(aca['mlp']['b2'], oca['mlp']['b2']),
        'fn_g': stack2(params['norm_att']['g'], params['norm_obj']['g']),
        'fn_b': stack2(params['norm_att']['b'], params['norm_obj']['b']),
    }


# ----------------------------- forward wrapper -------------------------------

def disaoformer_forward(prep, batch_patch, att_query, obj_query,
                        att_txt, obj_txt, com_txt, *, nhead):
    del com_txt  # unused by the original forward
    B, M, C = batch_patch.shape
    D_txt = att_txt.shape[-1]
    T = att_txt.shape[1]
    Nq = att_query.shape[1]
    N = T + Nq

    # Stack the two independent streams on a leading axis of 2 (the grid axis).
    txt = jnp.stack([att_txt, obj_txt], axis=0)                       # (2, B, T, 768)
    txt = jnp.pad(txt, ((0, 0), (0, 0), (0, N - T), (0, 0)))          # (2, B, N, 768)
    qry = jnp.stack([att_query, obj_query], axis=0)                   # (2, Bq, Nq, C)
    qry = jnp.pad(qry, ((0, 0), (0, 0), (T, 0), (0, 0)))              # (2, Bq, N, C)
    Bq = qry.shape[1]

    per_sb = lambda s, b: (s, b, 0, 0)
    qry_map = per_sb if Bq == B else (lambda s, b: (s, 0, 0, 0))      # broadcast query if Bq==1
    stream3 = lambda s, b: (s, 0, 0)                                  # stream-resident weights
    shared2 = lambda s, b: (0, 0)                                     # fully resident weights

    in_specs = [
        pl.BlockSpec((None, None, N, D_txt), per_sb),                 # txt
        pl.BlockSpec((None, None, N, C), qry_map),                    # query (padded)
        pl.BlockSpec((None, M, C), lambda s, b: (b, 0, 0)),           # batch_patch
        pl.BlockSpec((None, 1, D_txt), stream3),                      # txt LN gamma
        pl.BlockSpec((None, 1, D_txt), stream3),                      # txt LN beta
        pl.BlockSpec((None, D_txt, C), stream3),                      # txt proj W
        pl.BlockSpec((None, 1, C), stream3),                          # txt proj b
        pl.BlockSpec((C, 3 * C), shared2),                            # sa fused QKV W
        pl.BlockSpec((1, 3 * C), shared2),                            # sa fused QKV b
        pl.BlockSpec((C, C), shared2),                                # sa out W
        pl.BlockSpec((1, C), shared2),                                # sa out b
        pl.BlockSpec((None, 1, C), stream3),                          # norm1 gamma
        pl.BlockSpec((None, 1, C), stream3),                          # norm1 beta
        pl.BlockSpec((None, C, C), stream3),                          # ca Q W (scale folded)
        pl.BlockSpec((None, C, 2 * C), stream3),                      # ca fused KV W
        pl.BlockSpec((None, C, C), stream3),                          # ca out W
        pl.BlockSpec((None, 1, C), stream3),                          # ca out b
        pl.BlockSpec((None, 1, C), stream3),                          # ca norm gamma
        pl.BlockSpec((None, 1, C), stream3),                          # ca norm beta
        pl.BlockSpec((None, C, 4 * C), stream3),                      # mlp W1
        pl.BlockSpec((None, 1, 4 * C), stream3),                      # mlp b1
        pl.BlockSpec((None, 4 * C, C), stream3),                      # mlp W2
        pl.BlockSpec((None, 1, C), stream3),                          # mlp b2
        pl.BlockSpec((None, 1, C), stream3),                          # final LN gamma
        pl.BlockSpec((None, 1, C), stream3),                          # final LN beta
    ]

    out = pl.pallas_call(
        functools.partial(disaoformer_fused_kernel, nhead=nhead, t_txt=T, eps=LN_EPS),
        out_shape=jax.ShapeDtypeStruct((2, B, N, C), batch_patch.dtype),
        grid_spec=pltpu.PrefetchScalarGridSpec(
            num_scalar_prefetch=0,
            grid=(2, B),                       # stream axis slow -> weights fetched once/stream
            in_specs=in_specs,
            out_specs=pl.BlockSpec((None, None, N, C), per_sb),
        ),
        compiler_params=pltpu.CompilerParams(
            dimension_semantics=("parallel", "parallel"),   # >=2 parallel steps (v7x megacore)
            vmem_limit_bytes=_VMEM_LIMIT,
        ),
    )(txt, qry, batch_patch,
      prep['txt_ln_g'], prep['txt_ln_b'], prep['txt_w'], prep['txt_b'],
      prep['sa_wqkv'], prep['sa_bqkv'], prep['sa_wo'], prep['sa_bo'],
      prep['n1_g'], prep['n1_b'],
      prep['ca_wq'], prep['ca_wkv'], prep['ca_wo'], prep['ca_bo'],
      prep['cn_g'], prep['cn_b'],
      prep['w1'], prep['b1'], prep['w2'], prep['b2'],
      prep['fn_g'], prep['fn_b'])

    return out[0], out[1]


# ----------------------------- parameters & reference -----------------------

def init_params(key, d_model, txt_dim=768):
    """Weights stored as (in_features, out_features), i.e. PyTorch weight transposed."""
    keys = iter(jax.random.split(key, 64))

    def lin(fan_in, fan_out, use_bias=True):
        bound = 1.0 / math.sqrt(fan_in)
        w = jax.random.uniform(next(keys), (fan_in, fan_out), jnp.float32, -bound, bound)
        if use_bias:
            b = jax.random.uniform(next(keys), (1, fan_out), jnp.float32, -bound, bound)
        else:
            b = jnp.zeros((1, fan_out), jnp.float32)
        return {'w': w, 'b': b}

    def ln(dim):
        return {'g': 1.0 + 0.1 * jax.random.normal(next(keys), (1, dim), jnp.float32),
                'b': 0.05 * jax.random.normal(next(keys), (1, dim), jnp.float32)}

    def mha(qkv_bias):
        p = {}
        for nm in ('q', 'k', 'v'):
            l = lin(d_model, d_model, qkv_bias)
            p['w' + nm], p['b' + nm] = l['w'], l['b']
        lo = lin(d_model, d_model, True)
        p['wo'], p['bo'] = lo['w'], lo['b']
        return p

    def ca():
        f1 = lin(d_model, 4 * d_model)
        f2 = lin(4 * d_model, d_model)
        return {'attn': mha(False), 'norm': ln(d_model),
                'mlp': {'w1': f1['w'], 'b1': f1['b'], 'w2': f2['w'], 'b2': f2['b']}}

    return {
        'att_proj': {'ln': ln(txt_dim), 'fc': lin(txt_dim, d_model)},
        'obj_proj': {'ln': ln(txt_dim), 'fc': lin(txt_dim, d_model)},
        # sa_a: MulitHeadAttention(d_model, nhead, dropout) -> qkv_bias is truthy.
        # sa_o exists in the module but is never used in forward -> omitted.
        'sa_a': mha(True),
        'norm_att1': ln(d_model), 'norm_obj1': ln(d_model),
        'att_ca': ca(), 'obj_ca': ca(),
        'norm_att': ln(d_model), 'norm_obj': ln(d_model),
    }


def reference_forward(params, batch_patch, att_query, obj_query,
                      att_txt, obj_txt, com_txt, nhead):
    del com_txt
    hi = jax.lax.Precision.HIGHEST

    def lin(x, p):
        return jnp.dot(x, p['w'], precision=hi) + p['b']

    def ln(x, p):
        mu = jnp.mean(x, -1, keepdims=True)
        var = jnp.mean((x - mu) ** 2, -1, keepdims=True)
        return (x - mu) / jnp.sqrt(var + LN_EPS) * p['g'] + p['b']

    def mha(q, k, v, p):
        B, N, C = q.shape
        M = k.shape[1]
        hd = C // nhead
        scale = hd ** -0.5
        Q = (jnp.dot(q, p['wq'], precision=hi) + p['bq']).reshape(B, N, nhead, hd).transpose(0, 2, 1, 3)
        K = (jnp.dot(k, p['wk'], precision=hi) + p['bk']).reshape(B, M, nhead, hd).transpose(0, 2, 1, 3)
        V = (jnp.dot(v, p['wv'], precision=hi) + p['bv']).reshape(B, M, nhead, hd).transpose(0, 2, 1, 3)
        a = jnp.einsum('bhnd,bhmd->bhnm', Q, K, precision=hi) * scale
        a = jax.nn.softmax(a, axis=-1)
        o = jnp.einsum('bhnm,bhmd->bhnd', a, V, precision=hi).transpose(0, 2, 1, 3).reshape(B, N, C)
        return jnp.dot(o, p['wo'], precision=hi) + p['bo']

    def cross_layer(q, kv, p):
        q = q + mha(q, kv, kv, p['attn'])
        h = ln(q, p['norm'])
        h = jnp.dot(h, p['mlp']['w1'], precision=hi) + p['mlp']['b1']
        h = h / (1.0 + jnp.exp(-1.702 * h))
        h = jnp.dot(h, p['mlp']['w2'], precision=hi) + p['mlp']['b2']
        return q + h

    b = batch_patch.shape[0]
    if att_query.shape[0] == 1:
        att_query = jnp.broadcast_to(att_query, (b,) + att_query.shape[1:])
        obj_query = jnp.broadcast_to(obj_query, (b,) + obj_query.shape[1:])

    att_q = jnp.concatenate(
        [lin(ln(att_txt, params['att_proj']['ln']), params['att_proj']['fc']), att_query], axis=1)
    obj_q = jnp.concatenate(
        [lin(ln(obj_txt, params['obj_proj']['ln']), params['obj_proj']['fc']), obj_query], axis=1)

    att_q = ln(att_q + mha(att_q, att_q, att_q, params['sa_a']), params['norm_att1'])
    obj_q = ln(obj_q + mha(obj_q, obj_q, obj_q, params['sa_a']), params['norm_obj1'])

    att_feat = ln(cross_layer(att_q, batch_patch, params['att_ca']), params['norm_att'])
    obj_feat = ln(cross_layer(obj_q, batch_patch, params['obj_ca']), params['norm_obj'])
    return att_feat, obj_feat


# ----------------------------- test -----------------------------------------

if __name__ == "__main__":
    d_model, nhead, txt_dim = 128, 8, 768          # d_model multiple of 128 (lane-dense)
    B, T_txt, N_query, N_patch = 2, 4, 4, 16

    key = jax.random.PRNGKey(0)
    k_params, k_in = jax.random.split(key)
    params = init_params(k_params, d_model, txt_dim)
    # One-time weight transform (stacking / QKV fusion / scale folding / bf16 cast),
    # kept OUTSIDE the jitted forward so it is not re-executed per call.
    prep = prepare_params(params, nhead)

    ks = jax.random.split(k_in, 6)
    batch_patch = 0.5 * jax.random.normal(ks[0], (B, N_patch, d_model), jnp.float32)
    att_query = 0.5 * jax.random.normal(ks[1], (1, N_query, d_model), jnp.float32)
    obj_query = 0.5 * jax.random.normal(ks[2], (1, N_query, d_model), jnp.float32)
    att_txt = 0.5 * jax.random.normal(ks[3], (B, T_txt, txt_dim), jnp.float32)
    obj_txt = 0.5 * jax.random.normal(ks[4], (B, T_txt, txt_dim), jnp.float32)
    com_txt = 0.5 * jax.random.normal(ks[5], (B, T_txt, txt_dim), jnp.float32)  # unused, matches module

    fwd = jax.jit(functools.partial(disaoformer_forward, nhead=nhead))
    att_feat, obj_feat = fwd(prep, batch_patch, att_query, obj_query,
                             att_txt, obj_txt, com_txt)
    att_feat, obj_feat = jax.block_until_ready((att_feat, obj_feat))

    att_ref, obj_ref = reference_forward(params, batch_patch, att_query, obj_query,
                                         att_txt, obj_txt, com_txt, nhead)

    assert att_feat.shape == (B, T_txt + N_query, d_model)
    assert obj_feat.shape == (B, T_txt + N_query, d_model)
    assert bool(jnp.all(jnp.isfinite(att_feat))) and bool(jnp.all(jnp.isfinite(obj_feat)))
    # Tolerance accounts for bf16 MXU operands (f32 accumulation) vs the
    # Precision.HIGHEST f32 reference; structural bugs give O(1) mismatches.
    assert jnp.allclose(att_feat, att_ref, rtol=5e-2, atol=1e-1), "att_feat mismatch vs reference"
    assert jnp.allclose(obj_feat, obj_ref, rtol=5e-2, atol=1e-1), "obj_feat mismatch vs reference"

    print("KERNEL_OK")
</pallas_src>

<mosaic_0001>
module attributes {stable_mosaic.version = 11 : i64} {
  func.func @disaoformer_fused_kernel(%arg0: i32, %arg1: i32, %arg2: memref<1x1x8x768xf32, #tpu.memory_space<vmem>>, %arg3: memref<1x1x8x128xf32, #tpu.memory_space<vmem>>, %arg4: memref<1x16x128xf32, #tpu.memory_space<vmem>>, %arg5: memref<1x1x768xf32, #tpu.memory_space<vmem>>, %arg6: memref<1x1x768xf32, #tpu.memory_space<vmem>>, %arg7: memref<1x768x128xbf16, #tpu.memory_space<vmem>>, %arg8: memref<1x1x128xf32, #tpu.memory_space<vmem>>, %arg9: memref<128x384xbf16, #tpu.memory_space<vmem>>, %arg10: memref<1x384xf32, #tpu.memory_space<vmem>>, %arg11: memref<128x128xbf16, #tpu.memory_space<vmem>>, %arg12: memref<1x128xf32, #tpu.memory_space<vmem>>, %arg13: memref<1x1x128xf32, #tpu.memory_space<vmem>>, %arg14: memref<1x1x128xf32, #tpu.memory_space<vmem>>, %arg15: memref<1x128x128xbf16, #tpu.memory_space<vmem>>, %arg16: memref<1x128x256xbf16, #tpu.memory_space<vmem>>, %arg17: memref<1x128x128xbf16, #tpu.memory_space<vmem>>, %arg18: memref<1x1x128xf32, #tpu.memory_space<vmem>>, %arg19: memref<1x1x128xf32, #tpu.memory_space<vmem>>, %arg20: memref<1x1x128xf32, #tpu.memory_space<vmem>>, %arg21: memref<1x128x512xbf16, #tpu.memory_space<vmem>>, %arg22: memref<1x1x512xf32, #tpu.memory_space<vmem>>, %arg23: memref<1x512x128xbf16, #tpu.memory_space<vmem>>, %arg24: memref<1x1x128xf32, #tpu.memory_space<vmem>>, %arg25: memref<1x1x128xf32, #tpu.memory_space<vmem>>, %arg26: memref<1x1x128xf32, #tpu.memory_space<vmem>>, %arg27: memref<1x1x8x128xf32, #tpu.memory_space<vmem>>) attributes {dimension_semantics = [#tpu.dimension_semantics<parallel>, #tpu.dimension_semantics<parallel>], iteration_bounds = array<i64: 2, 2>, scalar_prefetch = 0 : i64, scratch_operands = 0 : i64, tpu.core_type = #tpu.core_type<tc>, window_params = [{transform_indices = @transform_0, window_bounds = array<i64: 1, 1, 8, 768>}, {transform_indices = @transform_1, window_bounds = array<i64: 1, 1, 8, 128>}, {transform_indices = @transform_2, window_bounds = array<i64: 1, 16, 128>}, {transform_indices = @transform_3, window_bounds = array<i64: 1, 1, 768>}, {transform_indices = @transform_4, window_bounds = array<i64: 1, 1, 768>}, {transform_indices = @transform_5, window_bounds = array<i64: 1, 768, 128>}, {transform_indices = @transform_6, window_bounds = array<i64: 1, 1, 128>}, {pipeline_mode = #tpu.pipeline_mode<synchronous>, transform_indices = @transform_7, window_bounds = array<i64: 128, 384>}, {pipeline_mode = #tpu.pipeline_mode<synchronous>, transform_indices = @transform_8, window_bounds = array<i64: 1, 384>}, {pipeline_mode = #tpu.pipeline_mode<synchronous>, transform_indices = @transform_9, window_bounds = array<i64: 128, 128>}, {pipeline_mode = #tpu.pipeline_mode<synchronous>, transform_indices = @transform_10, window_bounds = array<i64: 1, 128>}, {transform_indices = @transform_11, window_bounds = array<i64: 1, 1, 128>}, {transform_indices = @transform_12, window_bounds = array<i64: 1, 1, 128>}, {transform_indices = @transform_13, window_bounds = array<i64: 1, 128, 128>}, {transform_indices = @transform_14, window_bounds = array<i64: 1, 128, 256>}, {transform_indices = @transform_15, window_bounds = array<i64: 1, 128, 128>}, {transform_indices = @transform_16, window_bounds = array<i64: 1, 1, 128>}, {transform_indices = @transform_17, window_bounds = array<i64: 1, 1, 128>}, {transform_indices = @transform_18, window_bounds = array<i64: 1, 1, 128>}, {transform_indices = @transform_19, window_bounds = array<i64: 1, 128, 512>}, {transform_indices = @transform_20, window_bounds = array<i64: 1, 1, 512>}, {transform_indices = @transform_21, window_bounds = array<i64: 1, 512, 128>}, {transform_indices = @transform_22, window_bounds = array<i64: 1, 1, 128>}, {transform_indices = @transform_23, window_bounds = array<i64: 1, 1, 128>}, {transform_indices = @transform_24, window_bounds = array<i64: 1, 1, 128>}, {transform_indices = @transform_25, window_bounds = array<i64: 1, 1, 8, 128>}]} {
    %c0 = arith.constant 0 : index
    %c0_0 = arith.constant 0 : index
    %c0_1 = arith.constant 0 : index
    %c0_2 = arith.constant 0 : index
    %0 = vector.load %arg2[%c0, %c0_0, %c0_1, %c0_2] : memref<1x1x8x768xf32, #tpu.memory_space<vmem>>, vector<1x1x8x768xf32>
    %1 = vector.shape_cast %0 : vector<1x1x8x768xf32> to vector<8x768xf32>
    %cst = arith.constant dense<0.000000e+00> : vector<8xf32>
    %2 = vector.multi_reduction <add>, %1, %cst [1] : vector<8x768xf32> to vector<8xf32>
    %3 = vector.shape_cast %2 : vector<8xf32> to vector<8x1xf32>
    %cst_3 = arith.constant 7.680000e+02 : f32
    %4 = vector.broadcast %cst_3 : f32 to vector<8x1xf32>
    %5 = arith.divf %3, %4 : vector<8x1xf32>
    %6 = vector.broadcast %5 : vector<8x1xf32> to vector<8x768xf32>
    %7 = arith.subf %1, %6 : vector<8x768xf32>
    %8 = arith.mulf %7, %7 : vector<8x768xf32>
    %cst_4 = arith.constant dense<0.000000e+00> : vector<8xf32>
    %9 = vector.multi_reduction <add>, %8, %cst_4 [1] : vector<8x768xf32> to vector<8xf32>
    %10 = vector.shape_cast %9 : vector<8xf32> to vector<8x1xf32>
    %cst_5 = arith.constant 7.680000e+02 : f32
    %11 = vector.broadcast %cst_5 : f32 to vector<8x1xf32>
    %12 = arith.divf %10, %11 : vector<8x1xf32>
    %cst_6 = arith.constant 9.99999974E-6 : f32
    %13 = vector.broadcast %cst_6 : f32 to vector<8x1xf32>
    %14 = arith.addf %12, %13 : vector<8x1xf32>
    %15 = math.rsqrt %14 : vector<8x1xf32>
    %16 = vector.broadcast %15 : vector<8x1xf32> to vector<8x768xf32>
    %17 = arith.mulf %7, %16 : vector<8x768xf32>
    %c0_7 = arith.constant 0 : index
    %c0_8 = arith.constant 0 : index
    %c0_9 = arith.constant 0 : index
    %18 = vector.load %arg5[%c0_7, %c0_8, %c0_9] : memref<1x1x768xf32, #tpu.memory_space<vmem>>, vector<1x1x768xf32>
    %19 = vector.shape_cast %18 : vector<1x1x768xf32> to vector<1x768xf32>
    %20 = vector.broadcast %19 : vector<1x768xf32> to vector<8x768xf32>
    %21 = arith.mulf %17, %20 : vector<8x768xf32>
    %c0_10 = arith.constant 0 : index
    %c0_11 = arith.constant 0 : index
    %c0_12 = arith.constant 0 : index
    %22 = vector.load %arg6[%c0_10, %c0_11, %c0_12] : memref<1x1x768xf32, #tpu.memory_space<vmem>>, vector<1x1x768xf32>
    %23 = vector.shape_cast %22 : vector<1x1x768xf32> to vector<1x768xf32>
    %24 = vector.broadcast %23 : vector<1x768xf32> to vector<8x768xf32>
    %25 = arith.addf %21, %24 : vector<8x768xf32>
    %26 = arith.truncf %25 : vector<8x768xf32> to vector<8x768xbf16>
    %c0_13 = arith.constant 0 : index
    %c0_14 = arith.constant 0 : index
    %c0_15 = arith.constant 0 : index
    %27 = vector.load %arg7[%c0_13, %c0_14, %c0_15] : memref<1x768x128xbf16, #tpu.memory_space<vmem>>, vector<1x768x128xbf16>
    %28 = vector.shape_cast %27 : vector<1x768x128xbf16> to vector<768x128xbf16>
    %cst_16 = arith.constant dense<0.000000e+00> : vector<8x128xf32>
    %29 = tpu.matmul %26, %28, %cst_16 {dimension_numbers = #tpu.dot_dimension_numbers<[1], [0], [0], [1], [0, 0, 1, 1], [], []>} : vector<8x768xbf16>, vector<768x128xbf16>, vector<8x128xf32> -> vector<8x128xf32>
    %c0_17 = arith.constant 0 : index
    %c0_18 = arith.constant 0 : index
    %c0_19 = arith.constant 0 : index
    %30 = vector.load %arg8[%c0_17, %c0_18, %c0_19] : memref<1x1x128xf32, #tpu.memory_space<vmem>>, vector<1x1x128xf32>
    %31 = vector.shape_cast %30 : vector<1x1x128xf32> to vector<1x128xf32>
    %32 = vector.broadcast %31 : vector<1x128xf32> to vector<8x128xf32>
    %33 = arith.addf %29, %32 : vector<8x128xf32>
    %34 = tpu.iota {dimensions = array<i32: 0>} : vector<8x128xi32>
    %c4_i32 = arith.constant 4 : i32
    %35 = vector.broadcast %c4_i32 : i32 to vector<8x128xi32>
    %36 = arith.cmpi slt, %34, %35 : vector<8x128xi32>
    %c0_20 = arith.constant 0 : index
    %c0_21 = arith.constant 0 : index
    %c0_22 = arith.constant 0 : index
    %c0_23 = arith.constant 0 : index
    %37 = vector.load %arg3[%c0_20, %c0_21, %c0_22, %c0_23] : memref<1x1x8x128xf32, #tpu.memory_space<vmem>>, vector<1x1x8x128xf32>
    %38 = vector.shape_cast %37 : vector<1x1x8x128xf32> to vector<8x128xf32>
    %39 = arith.select %36, %33, %38 : vector<8x128xi1>, vector<8x128xf32>
    %40 = arith.truncf %39 : vector<8x128xf32> to vector<8x128xbf16>
    %c0_24 = arith.constant 0 : index
    %c0_25 = arith.constant 0 : index
    %41 = vector.load %arg9[%c0_24, %c0_25] : memref<128x384xbf16, #tpu.memory_space<vmem>>, vector<128x384xbf16>
    %cst_26 = arith.constant dense<0.000000e+00> : vector<8x384xf32>
    %42 = tpu.matmul %40, %41, %cst_26 {dimension_numbers = #tpu.dot_dimension_numbers<[1], [0], [0], [1], [0, 0, 1, 1], [], []>} : vector<8x128xbf16>, vector<128x384xbf16>, vector<8x384xf32> -> vector<8x384xf32>
    %c0_27 = arith.constant 0 : index
    %c0_28 = arith.constant 0 : index
    %43 = vector.load %arg10[%c0_27, %c0_28] : memref<1x384xf32, #tpu.memory_space<vmem>>, vector<1x384xf32>
    %44 = vector.broadcast %43 : vector<1x384xf32> to vector<8x384xf32>
    %45 = arith.addf %42, %44 : vector<8x384xf32>
    %46 = vector.extract_strided_slice %45 {offsets = [0, 0], sizes = [8, 128], strides = [1, 1]} : vector<8x384xf32> to vector<8x128xf32>
    %47 = vector.extract_strided_slice %45 {offsets = [0, 128], sizes = [8, 128], strides = [1, 1]} : vector<8x384xf32> to vector<8x128xf32>
    %48 = vector.extract_strided_slice %45 {offsets = [0, 256], sizes = [8, 128], strides = [1, 1]} : vector<8x384xf32> to vector<8x128xf32>
    %c0_29 = arith.constant 0 : index
    %c0_30 = arith.constant 0 : index
    %49 = vector.load %arg12[%c0_29, %c0_30] : memref<1x128xf32, #tpu.memory_space<vmem>>, vector<1x128xf32>
    %50 = vector.broadcast %49 : vector<1x128xf32> to vector<8x128xf32>
    %51 = arith.addf %39, %50 : vector<8x128xf32>
    %52 = tpu.iota {dimensions = array<i32: 1>} : vector<1x128xi32>
    %53 = arith.truncf %46 : vector<8x128xf32> to vector<8x128xbf16>
    %cst_31 = arith.constant 0.000000e+00 : f32
    %54 = vector.broadcast %cst_31 : f32 to vector<8x128xf32>
    %c0_i32 = arith.constant 0 : i32
    %55 = vector.broadcast %c0_i32 : i32 to vector<1x128xi32>
    %56 = arith.cmpi sge, %52, %55 : vector<1x128xi32>
    %c16_i32 = arith.constant 16 : i32
    %57 = vector.broadcast %c16_i32 : i32 to vector<1x128xi32>
    %58 = arith.cmpi slt, %52, %57 : vector<1x128xi32>
    %59 = arith.andi %56, %58 : vector<1x128xi1>
    %60 = arith.extui %59 : vector<1x128xi1> to vector<1x128xi32>
    %61 = arith.sitofp %60 : vector<1x128xi32> to vector<1x128xf32>
    %62 = vector.broadcast %61 : vector<1x128xf32> to vector<8x128xf32>
    %63 = arith.mulf %47, %62 : vector<8x128xf32>
    %64 = arith.truncf %63 : vector<8x128xf32> to vector<8x128xbf16>
    %65 = vector.broadcast %61 : vector<1x128xf32> to vector<8x128xf32>
    %66 = arith.mulf %48, %65 : vector<8x128xf32>
    %67 = arith.truncf %66 : vector<8x128xf32> to vector<8x128xbf16>
    "tpu.trace_start"() <{level = 10 : i32, message = "nd,md->nm"}> : () -> ()
    %cst_32 = arith.constant dense<0.000000e+00> : vector<8x8xf32>
    %68 = tpu.matmul %53, %64, %cst_32 {dimension_numbers = #tpu.dot_dimension_numbers<[1], [1], [0], [0], [0, 0, 1, 0], [], []>} : vector<8x128xbf16>, vector<8x128xbf16>, vector<8x8xf32> -> vector<8x8xf32>
    "tpu.trace_stop"() : () -> ()
    %cst_33 = arith.constant dense<0xFF800000> : vector<8xf32>
    %69 = vector.multi_reduction <maximumf>, %68, %cst_33 [1] : vector<8x8xf32> to vector<8xf32>
    %70 = vector.shape_cast %69 : vector<8xf32> to vector<8x1xf32>
    %71 = vector.broadcast %70 : vector<8x1xf32> to vector<8x8xf32>
    %72 = arith.subf %68, %71 : vector<8x8xf32>
    %73 = math.exp %72 : vector<8x8xf32>
    %cst_34 = arith.constant dense<0.000000e+00> : vector<8xf32>
    %74 = vector.multi_reduction <add>, %73, %cst_34 [1] : vector<8x8xf32> to vector<8xf32>
    %75 = vector.shape_cast %74 : vector<8xf32> to vector<8x1xf32>
    %76 = tpu.reciprocal %75 {approx = true} : vector<8x1xf32> -> vector<8x1xf32>
    %77 = vector.broadcast %76 : vector<8x1xf32> to vector<8x8xf32>
    %78 = arith.mulf %73, %77 : vector<8x8xf32>
    %79 = arith.truncf %78 : vector<8x8xf32> to vector<8x8xbf16>
    %cst_35 = arith.constant dense<0.000000e+00> : vector<8x128xf32>
    %80 = tpu.matmul %79, %67, %cst_35 {dimension_numbers = #tpu.dot_dimension_numbers<[1], [0], [0], [1], [0, 0, 1, 1], [], []>} : vector<8x8xbf16>, vector<8x128xbf16>, vector<8x128xf32> -> vector<8x128xf32>
    %81 = arith.addf %54, %80 : vector<8x128xf32>
    %c16_i32_36 = arith.constant 16 : i32
    %82 = vector.broadcast %c16_i32_36 : i32 to vector<1x128xi32>
    %83 = arith.cmpi sge, %52, %82 : vector<1x128xi32>
    %c32_i32 = arith.constant 32 : i32
    %84 = vector.broadcast %c32_i32 : i32 to vector<1x128xi32>
    %85 = arith.cmpi slt, %52, %84 : vector<1x128xi32>
    %86 = arith.andi %83, %85 : vector<1x128xi1>
    %87 = arith.extui %86 : vector<1x128xi1> to vector<1x128xi32>
    %88 = arith.sitofp %87 : vector<1x128xi32> to vector<1x128xf32>
    %89 = vector.broadcast %88 : vector<1x128xf32> to vector<8x128xf32>
    %90 = arith.mulf %47, %89 : vector<8x128xf32>
    %91 = arith.truncf %90 : vector<8x128xf32> to vector<8x128xbf16>
    %92 = vector.broadcast %88 : vector<1x128xf32> to vector<8x128xf32>
    %93 = arith.mulf %48, %92 : vector<8x128xf32>
    %94 = arith.truncf %93 : vector<8x128xf32> to vector<8x128xbf16>
    "tpu.trace_start"() <{level = 10 : i32, message = "nd,md->nm"}> : () -> ()
    %cst_37 = arith.constant dense<0.000000e+00> : vector<8x8xf32>
    %95 = tpu.matmul %53, %91, %cst_37 {dimension_numbers = #tpu.dot_dimension_numbers<[1], [1], [0], [0], [0, 0, 1, 0], [], []>} : vector<8x128xbf16>, vector<8x128xbf16>, vector<8x8xf32> -> vector<8x8xf32>
    "tpu.trace_stop"() : () -> ()
    %cst_38 = arith.constant dense<0xFF800000> : vector<8xf32>
    %96 = vector.multi_reduction <maximumf>, %95, %cst_38 [1] : vector<8x8xf32> to vector<8xf32>
    %97 = vector.shape_cast %96 : vector<8xf32> to vector<8x1xf32>
    %98 = vector.broadcast %97 : vector<8x1xf32> to vector<8x8xf32>
    %99 = arith.subf %95, %98 : vector<8x8xf32>
    %100 = math.exp %99 : vector<8x8xf32>
    %cst_39 = arith.constant dense<0.000000e+00> : vector<8xf32>
    %101 = vector.multi_reduction <add>, %100, %cst_39 [1] : vector<8x8xf32> to vector<8xf32>
    %102 = vector.shape_cast %101 : vector<8xf32> to vector<8x1xf32>
    %103 = tpu.reciprocal %102 {approx = true} : vector<8x1xf32> -> vector<8x1xf32>
    %104 = vector.broadcast %103 : vector<8x1xf32> to vector<8x8xf32>
    %105 = arith.mulf %100, %104 : vector<8x8xf32>
    %106 = arith.truncf %105 : vector<8x8xf32> to vector<8x8xbf16>
    %cst_40 = arith.constant dense<0.000000e+00> : vector<8x128xf32>
    %107 = tpu.matmul %106, %94, %cst_40 {dimension_numbers = #tpu.dot_dimension_numbers<[1], [0], [0], [1], [0, 0, 1, 1], [], []>} : vector<8x8xbf16>, vector<8x128xbf16>, vector<8x128xf32> -> vector<8x128xf32>
    %108 = arith.addf %81, %107 : vector<8x128xf32>
    %c32_i32_41 = arith.constant 32 : i32
    %109 = vector.broadcast %c32_i32_41 : i32 to vector<1x128xi32>
    %110 = arith.cmpi sge, %52, %109 : vector<1x128xi32>
    %c48_i32 = arith.constant 48 : i32
    %111 = vector.broadcast %c48_i32 : i32 to vector<1x128xi32>
    %112 = arith.cmpi slt, %52, %111 : vector<1x128xi32>
    %113 = arith.andi %110, %112 : vector<1x128xi1>
    %114 = arith.extui %113 : vector<1x128xi1> to vector<1x128xi32>
    %115 = arith.sitofp %114 : vector<1x128xi32> to vector<1x128xf32>
    %116 = vector.broadcast %115 : vector<1x128xf32> to vector<8x128xf32>
    %117 = arith.mulf %47, %116 : vector<8x128xf32>
    %118 = arith.truncf %117 : vector<8x128xf32> to vector<8x128xbf16>
    %119 = vector.broadcast %115 : vector<1x128xf32> to vector<8x128xf32>
    %120 = arith.mulf %48, %119 : vector<8x128xf32>
    %121 = arith.truncf %120 : vector<8x128xf32> to vector<8x128xbf16>
    "tpu.trace_start"() <{level = 10 : i32, message = "nd,md->nm"}> : () -> ()
    %cst_42 = arith.constant dense<0.000000e+00> : vector<8x8xf32>
    %122 = tpu.matmul %53, %118, %cst_42 {dimension_numbers = #tpu.dot_dimension_numbers<[1], [1], [0], [0], [0, 0, 1, 0], [], []>} : vector<8x128xbf16>, vector<8x128xbf16>, vector<8x8xf32> -> vector<8x8xf32>
    "tpu.trace_stop"() : () -> ()
    %cst_43 = arith.constant dense<0xFF800000> : vector<8xf32>
    %123 = vector.multi_reduction <maximumf>, %122, %cst_43 [1] : vector<8x8xf32> to vector<8xf32>
    %124 = vector.shape_cast %123 : vector<8xf32> to vector<8x1xf32>
    %125 = vector.broadcast %124 : vector<8x1xf32> to vector<8x8xf32>
    %126 = arith.subf %122, %125 : vector<8x8xf32>
    %127 = math.exp %126 : vector<8x8xf32>
    %cst_44 = arith.constant dense<0.000000e+00> : vector<8xf32>
    %128 = vector.multi_reduction <add>, %127, %cst_44 [1] : vector<8x8xf32> to vector<8xf32>
    %129 = vector.shape_cast %128 : vector<8xf32> to vector<8x1xf32>
    %130 = tpu.reciprocal %129 {approx = true} : vector<8x1xf32> -> vector<8x1xf32>
    %131 = vector.broadcast %130 : vector<8x1xf32> to vector<8x8xf32>
    %132 = arith.mulf %127, %131 : vector<8x8xf32>
    %133 = arith.truncf %132 : vector<8x8xf32> to vector<8x8xbf16>
    %cst_45 = arith.constant dense<0.000000e+00> : vector<8x128xf32>
    %134 = tpu.matmul %133, %121, %cst_45 {dimension_numbers = #tpu.dot_dimension_numbers<[1], [0], [0], [1], [0, 0, 1, 1], [], []>} : vector<8x8xbf16>, vector<8x128xbf16>, vector<8x128xf32> -> vector<8x128xf32>
    %135 = arith.addf %108, %134 : vector<8x128xf32>
    %c48_i32_46 = arith.constant 48 : i32
    %136 = vector.broadcast %c48_i32_46 : i32 to vector<1x128xi32>
    %137 = arith.cmpi sge, %52, %136 : vector<1x128xi32>
    %c64_i32 = arith.constant 64 : i32
    %138 = vector.broadcast %c64_i32 : i32 to vector<1x128xi32>
    %139 = arith.cmpi slt, %52, %138 : vector<1x128xi32>
    %140 = arith.andi %137, %139 : vector<1x128xi1>
    %141 = arith.extui %140 : vector<1x128xi1> to vector<1x128xi32>
    %142 = arith.sitofp %141 : vector<1x128xi32> to vector<1x128xf32>
    %143 = vector.broadcast %142 : vector<1x128xf32> to vector<8x128xf32>
    %144 = arith.mulf %47, %143 : vector<8x128xf32>
    %145 = arith.truncf %144 : vector<8x128xf32> to vector<8x128xbf16>
    %146 = vector.broadcast %142 : vector<1x128xf32> to vector<8x128xf32>
    %147 = arith.mulf %48, %146 : vector<8x128xf32>
    %148 = arith.truncf %147 : vector<8x128xf32> to vector<8x128xbf16>
    "tpu.trace_start"() <{level = 10 : i32, message = "nd,md->nm"}> : () -> ()
    %cst_47 = arith.constant dense<0.000000e+00> : vector<8x8xf32>
    %149 = tpu.matmul %53, %145, %cst_47 {dimension_numbers = #tpu.dot_dimension_numbers<[1], [1], [0], [0], [0, 0, 1, 0], [], []>} : vector<8x128xbf16>, vector<8x128xbf16>, vector<8x8xf32> -> vector<8x8xf32>
    "tpu.trace_stop"() : () -> ()
    %cst_48 = arith.constant dense<0xFF800000> : vector<8xf32>
    %150 = vector.multi_reduction <maximumf>, %149, %cst_48 [1] : vector<8x8xf32> to vector<8xf32>
    %151 = vector.shape_cast %150 : vector<8xf32> to vector<8x1xf32>
    %152 = vector.broadcast %151 : vector<8x1xf32> to vector<8x8xf32>
    %153 = arith.subf %149, %152 : vector<8x8xf32>
    %154 = math.exp %153 : vector<8x8xf32>
    %cst_49 = arith.constant dense<0.000000e+00> : vector<8xf32>
    %155 = vector.multi_reduction <add>, %154, %cst_49 [1] : vector<8x8xf32> to vector<8xf32>
    %156 = vector.shape_cast %155 : vector<8xf32> to vector<8x1xf32>
    %157 = tpu.reciprocal %156 {approx = true} : vector<8x1xf32> -> vector<8x1xf32>
    %158 = vector.broadcast %157 : vector<8x1xf32> to vector<8x8xf32>
    %159 = arith.mulf %154, %158 : vector<8x8xf32>
    %160 = arith.truncf %159 : vector<8x8xf32> to vector<8x8xbf16>
    %cst_50 = arith.constant dense<0.000000e+00> : vector<8x128xf32>
    %161 = tpu.matmul %160, %148, %cst_50 {dimension_numbers = #tpu.dot_dimension_numbers<[1], [0], [0], [1], [0, 0, 1, 1], [], []>} : vector<8x8xbf16>, vector<8x128xbf16>, vector<8x128xf32> -> vector<8x128xf32>
    %162 = arith.addf %135, %161 : vector<8x128xf32>
    %c64_i32_51 = arith.constant 64 : i32
    %163 = vector.broadcast %c64_i32_51 : i32 to vector<1x128xi32>
    %164 = arith.cmpi sge, %52, %163 : vector<1x128xi32>
    %c80_i32 = arith.constant 80 : i32
    %165 = vector.broadcast %c80_i32 : i32 to vector<1x128xi32>
    %166 = arith.cmpi slt, %52, %165 : vector<1x128xi32>
    %167 = arith.andi %164, %166 : vector<1x128xi1>
    %168 = arith.extui %167 : vector<1x128xi1> to vector<1x128xi32>
    %169 = arith.sitofp %168 : vector<1x128xi32> to vector<1x128xf32>
    %170 = vector.broadcast %169 : vector<1x128xf32> to vector<8x128xf32>
    %171 = arith.mulf %47, %170 : vector<8x128xf32>
    %172 = arith.truncf %171 : vector<8x128xf32> to vector<8x128xbf16>
    %173 = vector.broadcast %169 : vector<1x128xf32> to vector<8x128xf32>
    %174 = arith.mulf %48, %173 : vector<8x128xf32>
    %175 = arith.truncf %174 : vector<8x128xf32> to vector<8x128xbf16>
    "tpu.trace_start"() <{level = 10 : i32, message = "nd,md->nm"}> : () -> ()
    %cst_52 = arith.constant dense<0.000000e+00> : vector<8x8xf32>
    %176 = tpu.matmul %53, %172, %cst_52 {dimension_numbers = #tpu.dot_dimension_numbers<[1], [1], [0], [0], [0, 0, 1, 0], [], []>} : vector<8x128xbf16>, vector<8x128xbf16>, vector<8x8xf32> -> vector<8x8xf32>
    "tpu.trace_stop"() : () -> ()
    %cst_53 = arith.constant dense<0xFF800000> : vector<8xf32>
    %177 = vector.multi_reduction <maximumf>, %176, %cst_53 [1] : vector<8x8xf32> to vector<8xf32>
    %178 = vector.shape_cast %177 : vector<8xf32> to vector<8x1xf32>
    %179 = vector.broadcast %178 : vector<8x1xf32> to vector<8x8xf32>
    %180 = arith.subf %176, %179 : vector<8x8xf32>
    %181 = math.exp %180 : vector<8x8xf32>
    %cst_54 = arith.constant dense<0.000000e+00> : vector<8xf32>
    %182 = vector.multi_reduction <add>, %181, %cst_54 [1] : vector<8x8xf32> to vector<8xf32>
    %183 = vector.shape_cast %182 : vector<8xf32> to vector<8x1xf32>
    %184 = tpu.reciprocal %183 {approx = true} : vector<8x1xf32> -> vector<8x1xf32>
    %185 = vector.broadcast %184 : vector<8x1xf32> to vector<8x8xf32>
    %186 = arith.mulf %181, %185 : vector<8x8xf32>
    %187 = arith.truncf %186 : vector<8x8xf32> to vector<8x8xbf16>
    %cst_55 = arith.constant dense<0.000000e+00> : vector<8x128xf32>
    %188 = tpu.matmul %187, %175, %cst_55 {dimension_numbers = #tpu.dot_dimension_numbers<[1], [0], [0], [1], [0, 0, 1, 1], [], []>} : vector<8x8xbf16>, vector<8x128xbf16>, vector<8x128xf32> -> vector<8x128xf32>
    %189 = arith.addf %162, %188 : vector<8x128xf32>
    %c80_i32_56 = arith.constant 80 : i32
    %190 = vector.broadcast %c80_i32_56 : i32 to vector<1x128xi32>
    %191 = arith.cmpi sge, %52, %190 : vector<1x128xi32>
    %c96_i32 = arith.constant 96 : i32
    %192 = vector.broadcast %c96_i32 : i32 to vector<1x128xi32>
    %193 = arith.cmpi slt, %52, %192 : vector<1x128xi32>
    %194 = arith.andi %191, %193 : vector<1x128xi1>
    %195 = arith.extui %194 : vector<1x128xi1> to vector<1x128xi32>
    %196 = arith.sitofp %195 : vector<1x128xi32> to vector<1x128xf32>
    %197 = vector.broadcast %196 : vector<1x128xf32> to vector<8x128xf32>
    %198 = arith.mulf %47, %197 : vector<8x128xf32>
    %199 = arith.truncf %198 : vector<8x128xf32> to vector<8x128xbf16>
    %200 = vector.broadcast %196 : vector<1x128xf32> to vector<8x128xf32>
    %201 = arith.mulf %48, %200 : vector<8x128xf32>
    %202 = arith.truncf %201 : vector<8x128xf32> to vector<8x128xbf16>
    "tpu.trace_start"() <{level = 10 : i32, message = "nd,md->nm"}> : () -> ()
    %cst_57 = arith.constant dense<0.000000e+00> : vector<8x8xf32>
    %203 = tpu.matmul %53, %199, %cst_57 {dimension_numbers = #tpu.dot_dimension_numbers<[1], [1], [0], [0], [0, 0, 1, 0], [], []>} : vector<8x128xbf16>, vector<8x128xbf16>, vector<8x8xf32> -> vector<8x8xf32>
    "tpu.trace_stop"() : () -> ()
    %cst_58 = arith.constant dense<0xFF800000> : vector<8xf32>
    %204 = vector.multi_reduction <maximumf>, %203, %cst_58 [1] : vector<8x8xf32> to vector<8xf32>
    %205 = vector.shape_cast %204 : vector<8xf32> to vector<8x1xf32>
    %206 = vector.broadcast %205 : vector<8x1xf32> to vector<8x8xf32>
    %207 = arith.subf %203, %206 : vector<8x8xf32>
    %208 = math.exp %207 : vector<8x8xf32>
    %cst_59 = arith.constant dense<0.000000e+00> : vector<8xf32>
    %209 = vector.multi_reduction <add>, %208, %cst_59 [1] : vector<8x8xf32> to vector<8xf32>
    %210 = vector.shape_cast %209 : vector<8xf32> to vector<8x1xf32>
    %211 = tpu.reciprocal %210 {approx = true} : vector<8x1xf32> -> vector<8x1xf32>
    %212 = vector.broadcast %211 : vector<8x1xf32> to vector<8x8xf32>
    %213 = arith.mulf %208, %212 : vector<8x8xf32>
    %214 = arith.truncf %213 : vector<8x8xf32> to vector<8x8xbf16>
    %cst_60 = arith.constant dense<0.000000e+00> : vector<8x128xf32>
    %215 = tpu.matmul %214, %202, %cst_60 {dimension_numbers = #tpu.dot_dimension_numbers<[1], [0], [0], [1], [0, 0, 1, 1], [], []>} : vector<8x8xbf16>, vector<8x128xbf16>, vector<8x128xf32> -> vector<8x128xf32>
    %216 = arith.addf %189, %215 : vector<8x128xf32>
    %c96_i32_61 = arith.constant 96 : i32
    %217 = vector.broadcast %c96_i32_61 : i32 to vector<1x128xi32>
    %218 = arith.cmpi sge, %52, %217 : vector<1x128xi32>
    %c112_i32 = arith.constant 112 : i32
    %219 = vector.broadcast %c112_i32 : i32 to vector<1x128xi32>
    %220 = arith.cmpi slt, %52, %219 : vector<1x128xi32>
    %221 = arith.andi %218, %220 : vector<1x128xi1>
    %222 = arith.extui %221 : vector<1x128xi1> to vector<1x128xi32>
    %223 = arith.sitofp %222 : vector<1x128xi32> to vector<1x128xf32>
    %224 = vector.broadcast %223 : vector<1x128xf32> to vector<8x128xf32>
    %225 = arith.mulf %47, %224 : vector<8x128xf32>
    %226 = arith.truncf %225 : vector<8x128xf32> to vector<8x128xbf16>
    %227 = vector.broadcast %223 : vector<1x128xf32> to vector<8x128xf32>
    %228 = arith.mulf %48, %227 : vector<8x128xf32>
    %229 = arith.truncf %228 : vector<8x128xf32> to vector<8x128xbf16>
    "tpu.trace_start"() <{level = 10 : i32, message = "nd,md->nm"}> : () -> ()
    %cst_62 = arith.constant dense<0.000000e+00> : vector<8x8xf32>
    %230 = tpu.matmul %53, %226, %cst_62 {dimension_numbers = #tpu.dot_dimension_numbers<[1], [1], [0], [0], [0, 0, 1, 0], [], []>} : vector<8x128xbf16>, vector<8x128xbf16>, vector<8x8xf32> -> vector<8x8xf32>
    "tpu.trace_stop"() : () -> ()
    %cst_63 = arith.constant dense<0xFF800000> : vector<8xf32>
    %231 = vector.multi_reduction <maximumf>, %230, %cst_63 [1] : vector<8x8xf32> to vector<8xf32>
    %232 = vector.shape_cast %231 : vector<8xf32> to vector<8x1xf32>
    %233 = vector.broadcast %232 : vector<8x1xf32> to vector<8x8xf32>
    %234 = arith.subf %230, %233 : vector<8x8xf32>
    %235 = math.exp %234 : vector<8x8xf32>
    %cst_64 = arith.constant dense<0.000000e+00> : vector<8xf32>
    %236 = vector.multi_reduction <add>, %235, %cst_64 [1] : vector<8x8xf32> to vector<8xf32>
    %237 = vector.shape_cast %236 : vector<8xf32> to vector<8x1xf32>
    %238 = tpu.reciprocal %237 {approx = true} : vector<8x1xf32> -> vector<8x1xf32>
    %239 = vector.broadcast %238 : vector<8x1xf32> to vector<8x8xf32>
    %240 = arith.mulf %235, %239 : vector<8x8xf32>
    %241 = arith.truncf %240 : vector<8x8xf32> to vector<8x8xbf16>
    %cst_65 = arith.constant dense<0.000000e+00> : vector<8x128xf32>
    %242 = tpu.matmul %241, %229, %cst_65 {dimension_numbers = #tpu.dot_dimension_numbers<[1], [0], [0], [1], [0, 0, 1, 1], [], []>} : vector<8x8xbf16>, vector<8x128xbf16>, vector<8x128xf32> -> vector<8x128xf32>
    %243 = arith.addf %216, %242 : vector<8x128xf32>
    %c112_i32_66 = arith.constant 112 : i32
    %244 = vector.broadcast %c112_i32_66 : i32 to vector<1x128xi32>
    %245 = arith.cmpi sge, %52, %244 : vector<1x128xi32>
    %c128_i32 = arith.constant 128 : i32
    %246 = vector.broadcast %c128_i32 : i32 to vector<1x128xi32>
    %247 = arith.cmpi slt, %52, %246 : vector<1x128xi32>
    %248 = arith.andi %245, %247 : vector<1x128xi1>
    %249 = arith.extui %248 : vector<1x128xi1> to vector<1x128xi32>
    %250 = arith.sitofp %249 : vector<1x128xi32> to vector<1x128xf32>
    %251 = vector.broadcast %250 : vector<1x128xf32> to vector<8x128xf32>
    %252 = arith.mulf %47, %251 : vector<8x128xf32>
    %253 = arith.truncf %252 : vector<8x128xf32> to vector<8x128xbf16>
    %254 = vector.broadcast %250 : vector<1x128xf32> to vector<8x128xf32>
    %255 = arith.mulf %48, %254 : vector<8x128xf32>
    %256 = arith.truncf %255 : vector<8x128xf32> to vector<8x128xbf16>
    "tpu.trace_start"() <{level = 10 : i32, message = "nd,md->nm"}> : () -> ()
    %cst_67 = arith.constant dense<0.000000e+00> : vector<8x8xf32>
    %257 = tpu.matmul %53, %253, %cst_67 {dimension_numbers = #tpu.dot_dimension_numbers<[1], [1], [0], [0], [0, 0, 1, 0], [], []>} : vector<8x128xbf16>, vector<8x128xbf16>, vector<8x8xf32> -> vector<8x8xf32>
    "tpu.trace_stop"() : () -> ()
    %cst_68 = arith.constant dense<0xFF800000> : vector<8xf32>
    %258 = vector.multi_reduction <maximumf>, %257, %cst_68 [1] : vector<8x8xf32> to vector<8xf32>
    %259 = vector.shape_cast %258 : vector<8xf32> to vector<8x1xf32>
    %260 = vector.broadcast %259 : vector<8x1xf32> to vector<8x8xf32>
    %261 = arith.subf %257, %260 : vector<8x8xf32>
    %262 = math.exp %261 : vector<8x8xf32>
    %cst_69 = arith.constant dense<0.000000e+00> : vector<8xf32>
    %263 = vector.multi_reduction <add>, %262, %cst_69 [1] : vector<8x8xf32> to vector<8xf32>
    %264 = vector.shape_cast %263 : vector<8xf32> to vector<8x1xf32>
    %265 = tpu.reciprocal %264 {approx = true} : vector<8x1xf32> -> vector<8x1xf32>
    %266 = vector.broadcast %265 : vector<8x1xf32> to vector<8x8xf32>
    %267 = arith.mulf %262, %266 : vector<8x8xf32>
    %268 = arith.truncf %267 : vector<8x8xf32> to vector<8x8xbf16>
    %cst_70 = arith.constant dense<0.000000e+00> : vector<8x128xf32>
    %269 = tpu.matmul %268, %256, %cst_70 {dimension_numbers = #tpu.dot_dimension_numbers<[1], [0], [0], [1], [0, 0, 1, 1], [], []>} : vector<8x8xbf16>, vector<8x128xbf16>, vector<8x128xf32> -> vector<8x128xf32>
    %270 = arith.addf %243, %269 : vector<8x128xf32>
    %271 = arith.truncf %270 : vector<8x128xf32> to vector<8x128xbf16>
    %c0_71 = arith.constant 0 : index
    %c0_72 = arith.constant 0 : index
    %272 = vector.load %arg11[%c0_71, %c0_72] : memref<128x128xbf16, #tpu.memory_space<vmem>>, vector<128x128xbf16>
    %cst_73 = arith.constant dense<0.000000e+00> : vector<8x128xf32>
    %273 = tpu.matmul %271, %272, %cst_73 {dimension_numbers = #tpu.dot_dimension_numbers<[1], [0], [0], [1], [0, 0, 1, 1], [], []>} : vector<8x128xbf16>, vector<128x128xbf16>, vector<8x128xf32> -> vector<8x128xf32>
    %274 = arith.addf %273, %51 : vector<8x128xf32>
    %cst_74 = arith.constant dense<0.000000e+00> : vector<8xf32>
    %275 = vector.multi_reduction <add>, %274, %cst_74 [1] : vector<8x128xf32> to vector<8xf32>
    %276 = vector.shape_cast %275 : vector<8xf32> to vector<8x1xf32>
    %cst_75 = arith.constant 1.280000e+02 : f32
    %277 = vector.broadcast %cst_75 : f32 to vector<8x1xf32>
    %278 = arith.divf %276, %277 : vector<8x1xf32>
    %279 = vector.broadcast %278 : vector<8x1xf32> to vector<8x128xf32>
    %280 = arith.subf %274, %279 : vector<8x128xf32>
    %281 = arith.mulf %280, %280 : vector<8x128xf32>
    %cst_76 = arith.constant dense<0.000000e+00> : vector<8xf32>
    %282 = vector.multi_reduction <add>, %281, %cst_76 [1] : vector<8x128xf32> to vector<8xf32>
    %283 = vector.shape_cast %282 : vector<8xf32> to vector<8x1xf32>
    %cst_77 = arith.constant 1.280000e+02 : f32
    %284 = vector.broadcast %cst_77 : f32 to vector<8x1xf32>
    %285 = arith.divf %283, %284 : vector<8x1xf32>
    %cst_78 = arith.constant 9.99999974E-6 : f32
    %286 = vector.broadcast %cst_78 : f32 to vector<8x1xf32>
    %287 = arith.addf %285, %286 : vector<8x1xf32>
    %288 = math.rsqrt %287 : vector<8x1xf32>
    %289 = vector.broadcast %288 : vector<8x1xf32> to vector<8x128xf32>
    %290 = arith.mulf %280, %289 : vector<8x128xf32>
    %c0_79 = arith.constant 0 : index
    %c0_80 = arith.constant 0 : index
    %c0_81 = arith.constant 0 : index
    %291 = vector.load %arg13[%c0_79, %c0_80, %c0_81] : memref<1x1x128xf32, #tpu.memory_space<vmem>>, vector<1x1x128xf32>
    %292 = vector.shape_cast %291 : vector<1x1x128xf32> to vector<1x128xf32>
    %293 = vector.broadcast %292 : vector<1x128xf32> to vector<8x128xf32>
    %294 = arith.mulf %290, %293 : vector<8x128xf32>
    %c0_82 = arith.constant 0 : index
    %c0_83 = arith.constant 0 : index
    %c0_84 = arith.constant 0 : index
    %295 = vector.load %arg14[%c0_82, %c0_83, %c0_84] : memref<1x1x128xf32, #tpu.memory_space<vmem>>, vector<1x1x128xf32>
    %296 = vector.shape_cast %295 : vector<1x1x128xf32> to vector<1x128xf32>
    %297 = vector.broadcast %296 : vector<1x128xf32> to vector<8x128xf32>
    %298 = arith.addf %294, %297 : vector<8x128xf32>
    %c0_85 = arith.constant 0 : index
    %c0_86 = arith.constant 0 : index
    %c0_87 = arith.constant 0 : index
    %299 = vector.load %arg4[%c0_85, %c0_86, %c0_87] : memref<1x16x128xf32, #tpu.memory_space<vmem>>, vector<1x16x128xf32>
    %300 = vector.shape_cast %299 : vector<1x16x128xf32> to vector<16x128xf32>
    %301 = arith.truncf %300 : vector<16x128xf32> to vector<16x128xbf16>
    %c0_88 = arith.constant 0 : index
    %c0_89 = arith.constant 0 : index
    %c0_90 = arith.constant 0 : index
    %302 = vector.load %arg16[%c0_88, %c0_89, %c0_90] : memref<1x128x256xbf16, #tpu.memory_space<vmem>>, vector<1x128x256xbf16>
    %303 = vector.shape_cast %302 : vector<1x128x256xbf16> to vector<128x256xbf16>
    %cst_91 = arith.constant dense<0.000000e+00> : vector<16x256xf32>
    %304 = tpu.matmul %301, %303, %cst_91 {dimension_numbers = #tpu.dot_dimension_numbers<[1], [0], [0], [1], [0, 0, 1, 1], [], []>} : vector<16x128xbf16>, vector<128x256xbf16>, vector<16x256xf32> -> vector<16x256xf32>
    %305 = arith.truncf %298 : vector<8x128xf32> to vector<8x128xbf16>
    %c0_92 = arith.constant 0 : index
    %c0_93 = arith.constant 0 : index
    %c0_94 = arith.constant 0 : index
    %306 = vector.load %arg15[%c0_92, %c0_93, %c0_94] : memref<1x128x128xbf16, #tpu.memory_space<vmem>>, vector<1x128x128xbf16>
    %307 = vector.shape_cast %306 : vector<1x128x128xbf16> to vector<128x128xbf16>
    %cst_95 = arith.constant dense<0.000000e+00> : vector<8x128xf32>
    %308 = tpu.matmul %305, %307, %cst_95 {dimension_numbers = #tpu.dot_dimension_numbers<[1], [0], [0], [1], [0, 0, 1, 1], [], []>} : vector<8x128xbf16>, vector<128x128xbf16>, vector<8x128xf32> -> vector<8x128xf32>
    %309 = vector.extract_strided_slice %304 {offsets = [0, 0], sizes = [16, 128], strides = [1, 1]} : vector<16x256xf32> to vector<16x128xf32>
    %310 = vector.extract_strided_slice %304 {offsets = [0, 128], sizes = [16, 128], strides = [1, 1]} : vector<16x256xf32> to vector<16x128xf32>
    %c0_96 = arith.constant 0 : index
    %c0_97 = arith.constant 0 : index
    %c0_98 = arith.constant 0 : index
    %311 = vector.load %arg18[%c0_96, %c0_97, %c0_98] : memref<1x1x128xf32, #tpu.memory_space<vmem>>, vector<1x1x128xf32>
    %312 = vector.shape_cast %311 : vector<1x1x128xf32> to vector<1x128xf32>
    %313 = vector.broadcast %312 : vector<1x128xf32> to vector<8x128xf32>
    %314 = arith.addf %298, %313 : vector<8x128xf32>
    %315 = tpu.iota {dimensions = array<i32: 1>} : vector<1x128xi32>
    %316 = arith.truncf %308 : vector<8x128xf32> to vector<8x128xbf16>
    %cst_99 = arith.constant 0.000000e+00 : f32
    %317 = vector.broadcast %cst_99 : f32 to vector<8x128xf32>
    %c0_i32_100 = arith.constant 0 : i32
    %318 = vector.broadcast %c0_i32_100 : i32 to vector<1x128xi32>
    %319 = arith.cmpi sge, %315, %318 : vector<1x128xi32>
    %c16_i32_101 = arith.constant 16 : i32
    %320 = vector.broadcast %c16_i32_101 : i32 to vector<1x128xi32>
    %321 = arith.cmpi slt, %315, %320 : vector<1x128xi32>
    %322 = arith.andi %319, %321 : vector<1x128xi1>
    %323 = arith.extui %322 : vector<1x128xi1> to vector<1x128xi32>
    %324 = arith.sitofp %323 : vector<1x128xi32> to vector<1x128xf32>
    %325 = vector.broadcast %324 : vector<1x128xf32> to vector<16x128xf32>
    %326 = arith.mulf %309, %325 : vector<16x128xf32>
    %327 = arith.truncf %326 : vector<16x128xf32> to vector<16x128xbf16>
    %328 = vector.broadcast %324 : vector<1x128xf32> to vector<16x128xf32>
    %329 = arith.mulf %310, %328 : vector<16x128xf32>
    %330 = arith.truncf %329 : vector<16x128xf32> to vector<16x128xbf16>
    "tpu.trace_start"() <{level = 10 : i32, message = "nd,md->nm"}> : () -> ()
    %cst_102 = arith.constant dense<0.000000e+00> : vector<8x16xf32>
    %331 = tpu.matmul %316, %327, %cst_102 {dimension_numbers = #tpu.dot_dimension_numbers<[1], [1], [0], [0], [0, 0, 1, 0], [], []>} : vector<8x128xbf16>, vector<16x128xbf16>, vector<8x16xf32> -> vector<8x16xf32>
    "tpu.trace_stop"() : () -> ()
    %cst_103 = arith.constant dense<0xFF800000> : vector<8xf32>
    %332 = vector.multi_reduction <maximumf>, %331, %cst_103 [1] : vector<8x16xf32> to vector<8xf32>
    %333 = vector.shape_cast %332 : vector<8xf32> to vector<8x1xf32>
    %334 = vector.broadcast %333 : vector<8x1xf32> to vector<8x16xf32>
    %335 = arith.subf %331, %334 : vector<8x16xf32>
    %336 = math.exp %335 : vector<8x16xf32>
    %cst_104 = arith.constant dense<0.000000e+00> : vector<8xf32>
    %337 = vector.multi_reduction <add>, %336, %cst_104 [1] : vector<8x16xf32> to vector<8xf32>
    %338 = vector.shape_cast %337 : vector<8xf32> to vector<8x1xf32>
    %339 = tpu.reciprocal %338 {approx = true} : vector<8x1xf32> -> vector<8x1xf32>
    %340 = vector.broadcast %339 : vector<8x1xf32> to vector<8x16xf32>
    %341 = arith.mulf %336, %340 : vector<8x16xf32>
    %342 = arith.truncf %341 : vector<8x16xf32> to vector<8x16xbf16>
    %cst_105 = arith.constant dense<0.000000e+00> : vector<8x128xf32>
    %343 = tpu.matmul %342, %330, %cst_105 {dimension_numbers = #tpu.dot_dimension_numbers<[1], [0], [0], [1], [0, 0, 1, 1], [], []>} : vector<8x16xbf16>, vector<16x128xbf16>, vector<8x128xf32> -> vector<8x128xf32>
    %344 = arith.addf %317, %343 : vector<8x128xf32>
    %c16_i32_106 = arith.constant 16 : i32
    %345 = vector.broadcast %c16_i32_106 : i32 to vector<1x128xi32>
    %346 = arith.cmpi sge, %315, %345 : vector<1x128xi32>
    %c32_i32_107 = arith.constant 32 : i32
    %347 = vector.broadcast %c32_i32_107 : i32 to vector<1x128xi32>
    %348 = arith.cmpi slt, %315, %347 : vector<1x128xi32>
    %349 = arith.andi %346, %348 : vector<1x128xi1>
    %350 = arith.extui %349 : vector<1x128xi1> to vector<1x128xi32>
    %351 = arith.sitofp %350 : vector<1x128xi32> to vector<1x128xf32>
    %352 = vector.broadcast %351 : vector<1x128xf32> to vector<16x128xf32>
    %353 = arith.mulf %309, %352 : vector<16x128xf32>
    %354 = arith.truncf %353 : vector<16x128xf32> to vector<16x128xbf16>
    %355 = vector.broadcast %351 : vector<1x128xf32> to vector<16x128xf32>
    %356 = arith.mulf %310, %355 : vector<16x128xf32>
    %357 = arith.truncf %356 : vector<16x128xf32> to vector<16x128xbf16>
    "tpu.trace_start"() <{level = 10 : i32, message = "nd,md->nm"}> : () -> ()
    %cst_108 = arith.constant dense<0.000000e+00> : vector<8x16xf32>
    %358 = tpu.matmul %316, %354, %cst_108 {dimension_numbers = #tpu.dot_dimension_numbers<[1], [1], [0], [0], [0, 0, 1, 0], [], []>} : vector<8x128xbf16>, vector<16x128xbf16>, vector<8x16xf32> -> vector<8x16xf32>
    "tpu.trace_stop"() : () -> ()
    %cst_109 = arith.constant dense<0xFF800000> : vector<8xf32>
    %359 = vector.multi_reduction <maximumf>, %358, %cst_109 [1] : vector<8x16xf32> to vector<8xf32>
    %360 = vector.shape_cast %359 : vector<8xf32> to vector<8x1xf32>
    %361 = vector.broadcast %360 : vector<8x1xf32> to vector<8x16xf32>
    %362 = arith.subf %358, %361 : vector<8x16xf32>
    %363 = math.exp %362 : vector<8x16xf32>
    %cst_110 = arith.constant dense<0.000000e+00> : vector<8xf32>
    %364 = vector.multi_reduction <add>, %363, %cst_110 [1] : vector<8x16xf32> to vector<8xf32>
    %365 = vector.shape_cast %364 : vector<8xf32> to vector<8x1xf32>
    %366 = tpu.reciprocal %365 {approx = true} : vector<8x1xf32> -> vector<8x1xf32>
    %367 = vector.broadcast %366 : vector<8x1xf32> to vector<8x16xf32>
    %368 = arith.mulf %363, %367 : vector<8x16xf32>
    %369 = arith.truncf %368 : vector<8x16xf32> to vector<8x16xbf16>
    %cst_111 = arith.constant dense<0.000000e+00> : vector<8x128xf32>
    %370 = tpu.matmul %369, %357, %cst_111 {dimension_numbers = #tpu.dot_dimension_numbers<[1], [0], [0], [1], [0, 0, 1, 1], [], []>} : vector<8x16xbf16>, vector<16x128xbf16>, vector<8x128xf32> -> vector<8x128xf32>
    %371 = arith.addf %344, %370 : vector<8x128xf32>
    %c32_i32_112 = arith.constant 32 : i32
    %372 = vector.broadcast %c32_i32_112 : i32 to vector<1x128xi32>
    %373 = arith.cmpi sge, %315, %372 : vector<1x128xi32>
    %c48_i32_113 = arith.constant 48 : i32
    %374 = vector.broadcast %c48_i32_113 : i32 to vector<1x128xi32>
    %375 = arith.cmpi slt, %315, %374 : vector<1x128xi32>
    %376 = arith.andi %373, %375 : vector<1x128xi1>
    %377 = arith.extui %376 : vector<1x128xi1> to vector<1x128xi32>
    %378 = arith.sitofp %377 : vector<1x128xi32> to vector<1x128xf32>
    %379 = vector.broadcast %378 : vector<1x128xf32> to vector<16x128xf32>
    %380 = arith.mulf %309, %379 : vector<16x128xf32>
    %381 = arith.truncf %380 : vector<16x128xf32> to vector<16x128xbf16>
    %382 = vector.broadcast %378 : vector<1x128xf32> to vector<16x128xf32>
    %383 = arith.mulf %310, %382 : vector<16x128xf32>
    %384 = arith.truncf %383 : vector<16x128xf32> to vector<16x128xbf16>
    "tpu.trace_start"() <{level = 10 : i32, message = "nd,md->nm"}> : () -> ()
    %cst_114 = arith.constant dense<0.000000e+00> : vector<8x16xf32>
    %385 = tpu.matmul %316, %381, %cst_114 {dimension_numbers = #tpu.dot_dimension_numbers<[1], [1], [0], [0], [0, 0, 1, 0], [], []>} : vector<8x128xbf16>, vector<16x128xbf16>, vector<8x16xf32> -> vector<8x16xf32>
    "tpu.trace_stop"() : () -> ()
    %cst_115 = arith.constant dense<0xFF800000> : vector<8xf32>
    %386 = vector.multi_reduction <maximumf>, %385, %cst_115 [1] : vector<8x16xf32> to vector<8xf32>
    %387 = vector.shape_cast %386 : vector<8xf32> to vector<8x1xf32>
    %388 = vector.broadcast %387 : vector<8x1xf32> to vector<8x16xf32>
    %389 = arith.subf %385, %388 : vector<8x16xf32>
    %390 = math.exp %389 : vector<8x16xf32>
    %cst_116 = arith.constant dense<0.000000e+00> : vector<8xf32>
    %391 = vector.multi_reduction <add>, %390, %cst_116 [1] : vector<8x16xf32> to vector<8xf32>
    %392 = vector.shape_cast %391 : vector<8xf32> to vector<8x1xf32>
    %393 = tpu.reciprocal %392 {approx = true} : vector<8x1xf32> -> vector<8x1xf32>
    %394 = vector.broadcast %393 : vector<8x1xf32> to vector<8x16xf32>
    %395 = arith.mulf %390, %394 : vector<8x16xf32>
    %396 = arith.truncf %395 : vector<8x16xf32> to vector<8x16xbf16>
    %cst_117 = arith.constant dense<0.000000e+00> : vector<8x128xf32>
    %397 = tpu.matmul %396, %384, %cst_117 {dimension_numbers = #tpu.dot_dimension_numbers<[1], [0], [0], [1], [0, 0, 1, 1], [], []>} : vector<8x16xbf16>, vector<16x128xbf16>, vector<8x128xf32> -> vector<8x128xf32>
    %398 = arith.addf %371, %397 : vector<8x128xf32>
    %c48_i32_118 = arith.constant 48 : i32
    %399 = vector.broadcast %c48_i32_118 : i32 to vector<1x128xi32>
    %400 = arith.cmpi sge, %315, %399 : vector<1x128xi32>
    %c64_i32_119 = arith.constant 64 : i32
    %401 = vector.broadcast %c64_i32_119 : i32 to vector<1x128xi32>
    %402 = arith.cmpi slt, %315, %401 : vector<1x128xi32>
    %403 = arith.andi %400, %402 : vector<1x128xi1>
    %404 = arith.extui %403 : vector<1x128xi1> to vector<1x128xi32>
    %405 = arith.sitofp %404 : vector<1x128xi32> to vector<1x128xf32>
    %406 = vector.broadcast %405 : vector<1x128xf32> to vector<16x128xf32>
    %407 = arith.mulf %309, %406 : vector<16x128xf32>
    %408 = arith.truncf %407 : vector<16x128xf32> to vector<16x128xbf16>
    %409 = vector.broadcast %405 : vector<1x128xf32> to vector<16x128xf32>
    %410 = arith.mulf %310, %409 : vector<16x128xf32>
    %411 = arith.truncf %410 : vector<16x128xf32> to vector<16x128xbf16>
    "tpu.trace_start"() <{level = 10 : i32, message = "nd,md->nm"}> : () -> ()
    %cst_120 = arith.constant dense<0.000000e+00> : vector<8x16xf32>
    %412 = tpu.matmul %316, %408, %cst_120 {dimension_numbers = #tpu.dot_dimension_numbers<[1], [1], [0], [0], [0, 0, 1, 0], [], []>} : vector<8x128xbf16>, vector<16x128xbf16>, vector<8x16xf32> -> vector<8x16xf32>
    "tpu.trace_stop"() : () -> ()
    %cst_121 = arith.constant dense<0xFF800000> : vector<8xf32>
    %413 = vector.multi_reduction <maximumf>, %412, %cst_121 [1] : vector<8x16xf32> to vector<8xf32>
    %414 = vector.shape_cast %413 : vector<8xf32> to vector<8x1xf32>
    %415 = vector.broadcast %414 : vector<8x1xf32> to vector<8x16xf32>
    %416 = arith.subf %412, %415 : vector<8x16xf32>
    %417 = math.exp %416 : vector<8x16xf32>
    %cst_122 = arith.constant dense<0.000000e+00> : vector<8xf32>
    %418 = vector.multi_reduction <add>, %417, %cst_122 [1] : vector<8x16xf32> to vector<8xf32>
    %419 = vector.shape_cast %418 : vector<8xf32> to vector<8x1xf32>
    %420 = tpu.reciprocal %419 {approx = true} : vector<8x1xf32> -> vector<8x1xf32>
    %421 = vector.broadcast %420 : vector<8x1xf32> to vector<8x16xf32>
    %422 = arith.mulf %417, %421 : vector<8x16xf32>
    %423 = arith.truncf %422 : vector<8x16xf32> to vector<8x16xbf16>
    %cst_123 = arith.constant dense<0.000000e+00> : vector<8x128xf32>
    %424 = tpu.matmul %423, %411, %cst_123 {dimension_numbers = #tpu.dot_dimension_numbers<[1], [0], [0], [1], [0, 0, 1, 1], [], []>} : vector<8x16xbf16>, vector<16x128xbf16>, vector<8x128xf32> -> vector<8x128xf32>
    %425 = arith.addf %398, %424 : vector<8x128xf32>
    %c64_i32_124 = arith.constant 64 : i32
    %426 = vector.broadcast %c64_i32_124 : i32 to vector<1x128xi32>
    %427 = arith.cmpi sge, %315, %426 : vector<1x128xi32>
    %c80_i32_125 = arith.constant 80 : i32
    %428 = vector.broadcast %c80_i32_125 : i32 to vector<1x128xi32>
    %429 = arith.cmpi slt, %315, %428 : vector<1x128xi32>
    %430 = arith.andi %427, %429 : vector<1x128xi1>
    %431 = arith.extui %430 : vector<1x128xi1> to vector<1x128xi32>
    %432 = arith.sitofp %431 : vector<1x128xi32> to vector<1x128xf32>
    %433 = vector.broadcast %432 : vector<1x128xf32> to vector<16x128xf32>
    %434 = arith.mulf %309, %433 : vector<16x128xf32>
    %435 = arith.truncf %434 : vector<16x128xf32> to vector<16x128xbf16>
    %436 = vector.broadcast %432 : vector<1x128xf32> to vector<16x128xf32>
    %437 = arith.mulf %310, %436 : vector<16x128xf32>
    %438 = arith.truncf %437 : vector<16x128xf32> to vector<16x128xbf16>
    "tpu.trace_start"() <{level = 10 : i32, message = "nd,md->nm"}> : () -> ()
    %cst_126 = arith.constant dense<0.000000e+00> : vector<8x16xf32>
    %439 = tpu.matmul %316, %435, %cst_126 {dimension_numbers = #tpu.dot_dimension_numbers<[1], [1], [0], [0], [0, 0, 1, 0], [], []>} : vector<8x128xbf16>, vector<16x128xbf16>, vector<8x16xf32> -> vector<8x16xf32>
    "tpu.trace_stop"() : () -> ()
    %cst_127 = arith.constant dense<0xFF800000> : vector<8xf32>
    %440 = vector.multi_reduction <maximumf>, %439, %cst_127 [1] : vector<8x16xf32> to vector<8xf32>
    %441 = vector.shape_cast %440 : vector<8xf32> to vector<8x1xf32>
    %442 = vector.broadcast %441 : vector<8x1xf32> to vector<8x16xf32>
    %443 = arith.subf %439, %442 : vector<8x16xf32>
    %444 = math.exp %443 : vector<8x16xf32>
    %cst_128 = arith.constant dense<0.000000e+00> : vector<8xf32>
    %445 = vector.multi_reduction <add>, %444, %cst_128 [1] : vector<8x16xf32> to vector<8xf32>
    %446 = vector.shape_cast %445 : vector<8xf32> to vector<8x1xf32>
    %447 = tpu.reciprocal %446 {approx = true} : vector<8x1xf32> -> vector<8x1xf32>
    %448 = vector.broadcast %447 : vector<8x1xf32> to vector<8x16xf32>
    %449 = arith.mulf %444, %448 : vector<8x16xf32>
    %450 = arith.truncf %449 : vector<8x16xf32> to vector<8x16xbf16>
    %cst_129 = arith.constant dense<0.000000e+00> : vector<8x128xf32>
    %451 = tpu.matmul %450, %438, %cst_129 {dimension_numbers = #tpu.dot_dimension_numbers<[1], [0], [0], [1], [0, 0, 1, 1], [], []>} : vector<8x16xbf16>, vector<16x128xbf16>, vector<8x128xf32> -> vector<8x128xf32>
    %452 = arith.addf %425, %451 : vector<8x128xf32>
    %c80_i32_130 = arith.constant 80 : i32
    %453 = vector.broadcast %c80_i32_130 : i32 to vector<1x128xi32>
    %454 = arith.cmpi sge, %315, %453 : vector<1x128xi32>
    %c96_i32_131 = arith.constant 96 : i32
    %455 = vector.broadcast %c96_i32_131 : i32 to vector<1x128xi32>
    %456 = arith.cmpi slt, %315, %455 : vector<1x128xi32>
    %457 = arith.andi %454, %456 : vector<1x128xi1>
    %458 = arith.extui %457 : vector<1x128xi1> to vector<1x128xi32>
    %459 = arith.sitofp %458 : vector<1x128xi32> to vector<1x128xf32>
    %460 = vector.broadcast %459 : vector<1x128xf32> to vector<16x128xf32>
    %461 = arith.mulf %309, %460 : vector<16x128xf32>
    %462 = arith.truncf %461 : vector<16x128xf32> to vector<16x128xbf16>
    %463 = vector.broadcast %459 : vector<1x128xf32> to vector<16x128xf32>
    %464 = arith.mulf %310, %463 : vector<16x128xf32>
    %465 = arith.truncf %464 : vector<16x128xf32> to vector<16x128xbf16>
    "tpu.trace_start"() <{level = 10 : i32, message = "nd,md->nm"}> : () -> ()
    %cst_132 = arith.constant dense<0.000000e+00> : vector<8x16xf32>
    %466 = tpu.matmul %316, %462, %cst_132 {dimension_numbers = #tpu.dot_dimension_numbers<[1], [1], [0], [0], [0, 0, 1, 0], [], []>} : vector<8x128xbf16>, vector<16x128xbf16>, vector<8x16xf32> -> vector<8x16xf32>
    "tpu.trace_stop"() : () -> ()
    %cst_133 = arith.constant dense<0xFF800000> : vector<8xf32>
    %467 = vector.multi_reduction <maximumf>, %466, %cst_133 [1] : vector<8x16xf32> to vector<8xf32>
    %468 = vector.shape_cast %467 : vector<8xf32> to vector<8x1xf32>
    %469 = vector.broadcast %468 : vector<8x1xf32> to vector<8x16xf32>
    %470 = arith.subf %466, %469 : vector<8x16xf32>
    %471 = math.exp %470 : vector<8x16xf32>
    %cst_134 = arith.constant dense<0.000000e+00> : vector<8xf32>
    %472 = vector.multi_reduction <add>, %471, %cst_134 [1] : vector<8x16xf32> to vector<8xf32>
    %473 = vector.shape_cast %472 : vector<8xf32> to vector<8x1xf32>
    %474 = tpu.reciprocal %473 {approx = true} : vector<8x1xf32> -> vector<8x1xf32>
    %475 = vector.broadcast %474 : vector<8x1xf32> to vector<8x16xf32>
    %476 = arith.mulf %471, %475 : vector<8x16xf32>
    %477 = arith.truncf %476 : vector<8x16xf32> to vector<8x16xbf16>
    %cst_135 = arith.constant dense<0.000000e+00> : vector<8x128xf32>
    %478 = tpu.matmul %477, %465, %cst_135 {dimension_numbers = #tpu.dot_dimension_numbers<[1], [0], [0], [1], [0, 0, 1, 1], [], []>} : vector<8x16xbf16>, vector<16x128xbf16>, vector<8x128xf32> -> vector<8x128xf32>
    %479 = arith.addf %452, %478 : vector<8x128xf32>
    %c96_i32_136 = arith.constant 96 : i32
    %480 = vector.broadcast %c96_i32_136 : i32 to vector<1x128xi32>
    %481 = arith.cmpi sge, %315, %480 : vector<1x128xi32>
    %c112_i32_137 = arith.constant 112 : i32
    %482 = vector.broadcast %c112_i32_137 : i32 to vector<1x128xi32>
    %483 = arith.cmpi slt, %315, %482 : vector<1x128xi32>
    %484 = arith.andi %481, %483 : vector<1x128xi1>
    %485 = arith.extui %484 : vector<1x128xi1> to vector<1x128xi32>
    %486 = arith.sitofp %485 : vector<1x128xi32> to vector<1x128xf32>
    %487 = vector.broadcast %486 : vector<1x128xf32> to vector<16x128xf32>
    %488 = arith.mulf %309, %487 : vector<16x128xf32>
    %489 = arith.truncf %488 : vector<16x128xf32> to vector<16x128xbf16>
    %490 = vector.broadcast %486 : vector<1x128xf32> to vector<16x128xf32>
    %491 = arith.mulf %310, %490 : vector<16x128xf32>
    %492 = arith.truncf %491 : vector<16x128xf32> to vector<16x128xbf16>
    "tpu.trace_start"() <{level = 10 : i32, message = "nd,md->nm"}> : () -> ()
    %cst_138 = arith.constant dense<0.000000e+00> : vector<8x16xf32>
    %493 = tpu.matmul %316, %489, %cst_138 {dimension_numbers = #tpu.dot_dimension_numbers<[1], [1], [0], [0], [0, 0, 1, 0], [], []>} : vector<8x128xbf16>, vector<16x128xbf16>, vector<8x16xf32> -> vector<8x16xf32>
    "tpu.trace_stop"() : () -> ()
    %cst_139 = arith.constant dense<0xFF800000> : vector<8xf32>
    %494 = vector.multi_reduction <maximumf>, %493, %cst_139 [1] : vector<8x16xf32> to vector<8xf32>
    %495 = vector.shape_cast %494 : vector<8xf32> to vector<8x1xf32>
    %496 = vector.broadcast %495 : vector<8x1xf32> to vector<8x16xf32>
    %497 = arith.subf %493, %496 : vector<8x16xf32>
    %498 = math.exp %497 : vector<8x16xf32>
    %cst_140 = arith.constant dense<0.000000e+00> : vector<8xf32>
    %499 = vector.multi_reduction <add>, %498, %cst_140 [1] : vector<8x16xf32> to vector<8xf32>
    %500 = vector.shape_cast %499 : vector<8xf32> to vector<8x1xf32>
    %501 = tpu.reciprocal %500 {approx = true} : vector<8x1xf32> -> vector<8x1xf32>
    %502 = vector.broadcast %501 : vector<8x1xf32> to vector<8x16xf32>
    %503 = arith.mulf %498, %502 : vector<8x16xf32>
    %504 = arith.truncf %503 : vector<8x16xf32> to vector<8x16xbf16>
    %cst_141 = arith.constant dense<0.000000e+00> : vector<8x128xf32>
    %505 = tpu.matmul %504, %492, %cst_141 {dimension_numbers = #tpu.dot_dimension_numbers<[1], [0], [0], [1], [0, 0, 1, 1], [], []>} : vector<8x16xbf16>, vector<16x128xbf16>, vector<8x128xf32> -> vector<8x128xf32>
    %506 = arith.addf %479, %505 : vector<8x128xf32>
    %c112_i32_142 = arith.constant 112 : i32
    %507 = vector.broadcast %c112_i32_142 : i32 to vector<1x128xi32>
    %508 = arith.cmpi sge, %315, %507 : vector<1x128xi32>
    %c128_i32_143 = arith.constant 128 : i32
    %509 = vector.broadcast %c128_i32_143 : i32 to vector<1x128xi32>
    %510 = arith.cmpi slt, %315, %509 : vector<1x128xi32>
    %511 = arith.andi %508, %510 : vector<1x128xi1>
    %512 = arith.extui %511 : vector<1x128xi1> to vector<1x128xi32>
    %513 = arith.sitofp %512 : vector<1x128xi32> to vector<1x128xf32>
    %514 = vector.broadcast %513 : vector<1x128xf32> to vector<16x128xf32>
    %515 = arith.mulf %309, %514 : vector<16x128xf32>
    %516 = arith.truncf %515 : vector<16x128xf32> to vector<16x128xbf16>
    %517 = vector.broadcast %513 : vector<1x128xf32> to vector<16x128xf32>
    %518 = arith.mulf %310, %517 : vector<16x128xf32>
    %519 = arith.truncf %518 : vector<16x128xf32> to vector<16x128xbf16>
    "tpu.trace_start"() <{level = 10 : i32, message = "nd,md->nm"}> : () -> ()
    %cst_144 = arith.constant dense<0.000000e+00> : vector<8x16xf32>
    %520 = tpu.matmul %316, %516, %cst_144 {dimension_numbers = #tpu.dot_dimension_numbers<[1], [1], [0], [0], [0, 0, 1, 0], [], []>} : vector<8x128xbf16>, vector<16x128xbf16>, vector<8x16xf32> -> vector<8x16xf32>
    "tpu.trace_stop"() : () -> ()
    %cst_145 = arith.constant dense<0xFF800000> : vector<8xf32>
    %521 = vector.multi_reduction <maximumf>, %520, %cst_145 [1] : vector<8x16xf32> to vector<8xf32>
    %522 = vector.shape_cast %521 : vector<8xf32> to vector<8x1xf32>
    %523 = vector.broadcast %522 : vector<8x1xf32> to vector<8x16xf32>
    %524 = arith.subf %520, %523 : vector<8x16xf32>
    %525 = math.exp %524 : vector<8x16xf32>
    %cst_146 = arith.constant dense<0.000000e+00> : vector<8xf32>
    %526 = vector.multi_reduction <add>, %525, %cst_146 [1] : vector<8x16xf32> to vector<8xf32>
    %527 = vector.shape_cast %526 : vector<8xf32> to vector<8x1xf32>
    %528 = tpu.reciprocal %527 {approx = true} : vector<8x1xf32> -> vector<8x1xf32>
    %529 = vector.broadcast %528 : vector<8x1xf32> to vector<8x16xf32>
    %530 = arith.mulf %525, %529 : vector<8x16xf32>
    %531 = arith.truncf %530 : vector<8x16xf32> to vector<8x16xbf16>
    %cst_147 = arith.constant dense<0.000000e+00> : vector<8x128xf32>
    %532 = tpu.matmul %531, %519, %cst_147 {dimension_numbers = #tpu.dot_dimension_numbers<[1], [0], [0], [1], [0, 0, 1, 1], [], []>} : vector<8x16xbf16>, vector<16x128xbf16>, vector<8x128xf32> -> vector<8x128xf32>
    %533 = arith.addf %506, %532 : vector<8x128xf32>
    %534 = arith.truncf %533 : vector<8x128xf32> to vector<8x128xbf16>
    %c0_148 = arith.constant 0 : index
    %c0_149 = arith.constant 0 : index
    %c0_150 = arith.constant 0 : index
    %535 = vector.load %arg17[%c0_148, %c0_149, %c0_150] : memref<1x128x128xbf16, #tpu.memory_space<vmem>>, vector<1x128x128xbf16>
    %536 = vector.shape_cast %535 : vector<1x128x128xbf16> to vector<128x128xbf16>
    %cst_151 = arith.constant dense<0.000000e+00> : vector<8x128xf32>
    %537 = tpu.matmul %534, %536, %cst_151 {dimension_numbers = #tpu.dot_dimension_numbers<[1], [0], [0], [1], [0, 0, 1, 1], [], []>} : vector<8x128xbf16>, vector<128x128xbf16>, vector<8x128xf32> -> vector<8x128xf32>
    %538 = arith.addf %537, %314 : vector<8x128xf32>
    %cst_152 = arith.constant dense<0.000000e+00> : vector<8xf32>
    %539 = vector.multi_reduction <add>, %538, %cst_152 [1] : vector<8x128xf32> to vector<8xf32>
    %540 = vector.shape_cast %539 : vector<8xf32> to vector<8x1xf32>
    %cst_153 = arith.constant 1.280000e+02 : f32
    %541 = vector.broadcast %cst_153 : f32 to vector<8x1xf32>
    %542 = arith.divf %540, %541 : vector<8x1xf32>
    %543 = vector.broadcast %542 : vector<8x1xf32> to vector<8x128xf32>
    %544 = arith.subf %538, %543 : vector<8x128xf32>
    %545 = arith.mulf %544, %544 : vector<8x128xf32>
    %cst_154 = arith.constant dense<0.000000e+00> : vector<8xf32>
    %546 = vector.multi_reduction <add>, %545, %cst_154 [1] : vector<8x128xf32> to vector<8xf32>
    %547 = vector.shape_cast %546 : vector<8xf32> to vector<8x1xf32>
    %cst_155 = arith.constant 1.280000e+02 : f32
    %548 = vector.broadcast %cst_155 : f32 to vector<8x1xf32>
    %549 = arith.divf %547, %548 : vector<8x1xf32>
    %cst_156 = arith.constant 9.99999974E-6 : f32
    %550 = vector.broadcast %cst_156 : f32 to vector<8x1xf32>
    %551 = arith.addf %549, %550 : vector<8x1xf32>
    %552 = math.rsqrt %551 : vector<8x1xf32>
    %553 = vector.broadcast %552 : vector<8x1xf32> to vector<8x128xf32>
    %554 = arith.mulf %544, %553 : vector<8x128xf32>
    %c0_157 = arith.constant 0 : index
    %c0_158 = arith.constant 0 : index
    %c0_159 = arith.constant 0 : index
    %555 = vector.load %arg19[%c0_157, %c0_158, %c0_159] : memref<1x1x128xf32, #tpu.memory_space<vmem>>, vector<1x1x128xf32>
    %556 = vector.shape_cast %555 : vector<1x1x128xf32> to vector<1x128xf32>
    %557 = vector.broadcast %556 : vector<1x128xf32> to vector<8x128xf32>
    %558 = arith.mulf %554, %557 : vector<8x128xf32>
    %c0_160 = arith.constant 0 : index
    %c0_161 = arith.constant 0 : index
    %c0_162 = arith.constant 0 : index
    %559 = vector.load %arg20[%c0_160, %c0_161, %c0_162] : memref<1x1x128xf32, #tpu.memory_space<vmem>>, vector<1x1x128xf32>
    %560 = vector.shape_cast %559 : vector<1x1x128xf32> to vector<1x128xf32>
    %561 = vector.broadcast %560 : vector<1x128xf32> to vector<8x128xf32>
    %562 = arith.addf %558, %561 : vector<8x128xf32>
    %563 = arith.truncf %562 : vector<8x128xf32> to vector<8x128xbf16>
    %c0_163 = arith.constant 0 : index
    %c0_164 = arith.constant 0 : index
    %c0_165 = arith.constant 0 : index
    %564 = vector.load %arg21[%c0_163, %c0_164, %c0_165] : memref<1x128x512xbf16, #tpu.memory_space<vmem>>, vector<1x128x512xbf16>
    %565 = vector.shape_cast %564 : vector<1x128x512xbf16> to vector<128x512xbf16>
    %cst_166 = arith.constant dense<0.000000e+00> : vector<8x512xf32>
    %566 = tpu.matmul %563, %565, %cst_166 {dimension_numbers = #tpu.dot_dimension_numbers<[1], [0], [0], [1], [0, 0, 1, 1], [], []>} : vector<8x128xbf16>, vector<128x512xbf16>, vector<8x512xf32> -> vector<8x512xf32>
    %c0_167 = arith.constant 0 : index
    %c0_168 = arith.constant 0 : index
    %c0_169 = arith.constant 0 : index
    %567 = vector.load %arg22[%c0_167, %c0_168, %c0_169] : memref<1x1x512xf32, #tpu.memory_space<vmem>>, vector<1x1x512xf32>
    %568 = vector.shape_cast %567 : vector<1x1x512xf32> to vector<1x512xf32>
    %569 = vector.broadcast %568 : vector<1x512xf32> to vector<8x512xf32>
    %570 = arith.addf %566, %569 : vector<8x512xf32>
    %cst_170 = arith.constant -1.702000e+00 : f32
    %571 = vector.broadcast %cst_170 : f32 to vector<8x512xf32>
    %572 = arith.mulf %571, %570 : vector<8x512xf32>
    %573 = math.exp %572 : vector<8x512xf32>
    %cst_171 = arith.constant 1.000000e+00 : f32
    %574 = vector.broadcast %cst_171 : f32 to vector<8x512xf32>
    %575 = arith.addf %574, %573 : vector<8x512xf32>
    %cst_172 = arith.constant 1.000000e+00 : f32
    %576 = vector.broadcast %cst_172 : f32 to vector<8x512xf32>
    %577 = arith.divf %576, %575 : vector<8x512xf32>
    %578 = arith.mulf %570, %577 : vector<8x512xf32>
    %579 = arith.truncf %578 : vector<8x512xf32> to vector<8x512xbf16>
    %c0_173 = arith.constant 0 : index
    %c0_174 = arith.constant 0 : index
    %c0_175 = arith.constant 0 : index
    %580 = vector.load %arg23[%c0_173, %c0_174, %c0_175] : memref<1x512x128xbf16, #tpu.memory_space<vmem>>, vector<1x512x128xbf16>
    %581 = vector.shape_cast %580 : vector<1x512x128xbf16> to vector<512x128xbf16>
    %cst_176 = arith.constant dense<0.000000e+00> : vector<8x128xf32>
    %582 = tpu.matmul %579, %581, %cst_176 {dimension_numbers = #tpu.dot_dimension_numbers<[1], [0], [0], [1], [0, 0, 1, 1], [], []>} : vector<8x512xbf16>, vector<512x128xbf16>, vector<8x128xf32> -> vector<8x128xf32>
    %583 = arith.addf %538, %582 : vector<8x128xf32>
    %c0_177 = arith.constant 0 : index
    %c0_178 = arith.constant 0 : index
    %c0_179 = arith.constant 0 : index
    %584 = vector.load %arg24[%c0_177, %c0_178, %c0_179] : memref<1x1x128xf32, #tpu.memory_space<vmem>>, vector<1x1x128xf32>
    %585 = vector.shape_cast %584 : vector<1x1x128xf32> to vector<1x128xf32>
    %586 = vector.broadcast %585 : vector<1x128xf32> to vector<8x128xf32>
    %587 = arith.addf %583, %586 : vector<8x128xf32>
    %cst_180 = arith.constant dense<0.000000e+00> : vector<8xf32>
    %588 = vector.multi_reduction <add>, %587, %cst_180 [1] : vector<8x128xf32> to vector<8xf32>
    %589 = vector.shape_cast %588 : vector<8xf32> to vector<8x1xf32>
    %cst_181 = arith.constant 1.280000e+02 : f32
    %590 = vector.broadcast %cst_181 : f32 to vector<8x1xf32>
    %591 = arith.divf %589, %590 : vector<8x1xf32>
    %592 = vector.broadcast %591 : vector<8x1xf32> to vector<8x128xf32>
    %593 = arith.subf %587, %592 : vector<8x128xf32>
    %594 = arith.mulf %593, %593 : vector<8x128xf32>
    %cst_182 = arith.constant dense<0.000000e+00> : vector<8xf32>
    %595 = vector.multi_reduction <add>, %594, %cst_182 [1] : vector<8x128xf32> to vector<8xf32>
    %596 = vector.shape_cast %595 : vector<8xf32> to vector<8x1xf32>
    %cst_183 = arith.constant 1.280000e+02 : f32
    %597 = vector.broadcast %cst_183 : f32 to vector<8x1xf32>
    %598 = arith.divf %596, %597 : vector<8x1xf32>
    %cst_184 = arith.constant 9.99999974E-6 : f32
    %599 = vector.broadcast %cst_184 : f32 to vector<8x1xf32>
    %600 = arith.addf %598, %599 : vector<8x1xf32>
    %601 = math.rsqrt %600 : vector<8x1xf32>
    %602 = vector.broadcast %601 : vector<8x1xf32> to vector<8x128xf32>
    %603 = arith.mulf %593, %602 : vector<8x128xf32>
    %c0_185 = arith.constant 0 : index
    %c0_186 = arith.constant 0 : index
    %c0_187 = arith.constant 0 : index
    %604 = vector.load %arg25[%c0_185, %c0_186, %c0_187] : memref<1x1x128xf32, #tpu.memory_space<vmem>>, vector<1x1x128xf32>
    %605 = vector.shape_cast %604 : vector<1x1x128xf32> to vector<1x128xf32>
    %606 = vector.broadcast %605 : vector<1x128xf32> to vector<8x128xf32>
    %607 = arith.mulf %603, %606 : vector<8x128xf32>
    %c0_188 = arith.constant 0 : index
    %c0_189 = arith.constant 0 : index
    %c0_190 = arith.constant 0 : index
    %608 = vector.load %arg26[%c0_188, %c0_189, %c0_190] : memref<1x1x128xf32, #tpu.memory_space<vmem>>, vector<1x1x128xf32>
    %609 = vector.shape_cast %608 : vector<1x1x128xf32> to vector<1x128xf32>
    %610 = vector.broadcast %609 : vector<1x128xf32> to vector<8x128xf32>
    %611 = arith.addf %607, %610 : vector<8x128xf32>
    %c0_191 = arith.constant 0 : index
    %c0_192 = arith.constant 0 : index
    %c0_193 = arith.constant 0 : index
    %c0_194 = arith.constant 0 : index
    %612 = vector.load %arg27[%c0_191, %c0_192, %c0_193, %c0_194] : memref<1x1x8x128xf32, #tpu.memory_space<vmem>>, vector<1x1x8x128xf32>
    %613 = vector.shape_cast %612 : vector<1x1x8x128xf32> to vector<8x128xf32>
    %614 = vector.shape_cast %611 : vector<8x128xf32> to vector<1x1x8x128xf32>
    tpu.vector_store %arg27[%c0_191, %c0_192, %c0_193, %c0_194], %614 {strides = array<i32>} : memref<1x1x8x128xf32, #tpu.memory_space<vmem>>, vector<1x1x8x128xf32>,
    return
  }
  func.func @transform_0(%arg0: i32, %arg1: i32) -> (i32, i32, i32, i32) {
    %c0_i32 = arith.constant 0 : i32
    %c0_i32_0 = arith.constant 0 : i32
    %c0_i32_1 = arith.constant 0 : i32
    return %arg0, %arg1, %c0_i32, %c0_i32_0 : i32, i32, i32, i32
  }
  func.func @transform_1(%arg0: i32, %arg1: i32) -> (i32, i32, i32, i32) {
    %c0_i32 = arith.constant 0 : i32
    %c0_i32_0 = arith.constant 0 : i32
    %c0_i32_1 = arith.constant 0 : i32
    %c0_i32_2 = arith.constant 0 : i32
    return %arg0, %c0_i32, %c0_i32_0, %c0_i32_1 : i32, i32, i32, i32
  }
  func.func @transform_2(%arg0: i32, %arg1: i32) -> (i32, i32, i32) {
    %c0_i32 = arith.constant 0 : i32
    %c0_i32_0 = arith.constant 0 : i32
    %c0_i32_1 = arith.constant 0 : i32
    return %arg1, %c0_i32, %c0_i32_0 : i32, i32, i32
  }
  func.func @transform_3(%arg0: i32, %arg1: i32) -> (i32, i32, i32) {
    %c0_i32 = arith.constant 0 : i32
    %c0_i32_0 = arith.constant 0 : i32
    %c0_i32_1 = arith.constant 0 : i32
    return %arg0, %c0_i32, %c0_i32_0 : i32, i32, i32
  }
  func.func @transform_4(%arg0: i32, %arg1: i32) -> (i32, i32, i32) {
    %c0_i32 = arith.constant 0 : i32
    %c0_i32_0 = arith.constant 0 : i32
    %c0_i32_1 = arith.constant 0 : i32
    return %arg0, %c0_i32, %c0_i32_0 : i32, i32, i32
  }
  func.func @transform_5(%arg0: i32, %arg1: i32) -> (i32, i32, i32) {
    %c0_i32 = arith.constant 0 : i32
    %c0_i32_0 = arith.constant 0 : i32
    %c0_i32_1 = arith.constant 0 : i32
    return %arg0, %c0_i32, %c0_i32_0 : i32, i32, i32
  }
  func.func @transform_6(%arg0: i32, %arg1: i32) -> (i32, i32, i32) {
    %c0_i32 = arith.constant 0 : i32
    %c0_i32_0 = arith.constant 0 : i32
    %c0_i32_1 = arith.constant 0 : i32
    return %arg0, %c0_i32, %c0_i32_0 : i32, i32, i32
  }
  func.func @transform_7(%arg0: i32, %arg1: i32) -> (i32, i32) {
    %c0_i32 = arith.constant 0 : i32
    %c0_i32_0 = arith.constant 0 : i32
    %c0_i32_1 = arith.constant 0 : i32
    return %c0_i32, %c0_i32_0 : i32, i32
  }
  func.func @transform_8(%arg0: i32, %arg1: i32) -> (i32, i32) {
    %c0_i32 = arith.constant 0 : i32
    %c0_i32_0 = arith.constant 0 : i32
    %c0_i32_1 = arith.constant 0 : i32
    return %c0_i32, %c0_i32_0 : i32, i32
  }
  func.func @transform_9(%arg0: i32, %arg1: i32) -> (i32, i32) {
    %c0_i32 = arith.constant 0 : i32
    %c0_i32_0 = arith.constant 0 : i32
    %c0_i32_1 = arith.constant 0 : i32
    return %c0_i32, %c0_i32_0 : i32, i32
  }
  func.func @transform_10(%arg0: i32, %arg1: i32) -> (i32, i32) {
    %c0_i32 = arith.constant 0 : i32
    %c0_i32_0 = arith.constant 0 : i32
    %c0_i32_1 = arith.constant 0 : i32
    return %c0_i32, %c0_i32_0 : i32, i32
  }
  func.func @transform_11(%arg0: i32, %arg1: i32) -> (i32, i32, i32) {
    %c0_i32 = arith.constant 0 : i32
    %c0_i32_0 = arith.constant 0 : i32
    %c0_i32_1 = arith.constant 0 : i32
    return %arg0, %c0_i32, %c0_i32_0 : i32, i32, i32
  }
  func.func @transform_12(%arg0: i32, %arg1: i32) -> (i32, i32, i32) {
    %c0_i32 = arith.constant 0 : i32
    %c0_i32_0 = arith.constant 0 : i32
    %c0_i32_1 = arith.constant 0 : i32
    return %arg0, %c0_i32, %c0_i32_0 : i32, i32, i32
  }
  func.func @transform_13(%arg0: i32, %arg1: i32) -> (i32, i32, i32) {
    %c0_i32 = arith.constant 0 : i32
    %c0_i32_0 = arith.constant 0 : i32
    %c0_i32_1 = arith.constant 0 : i32
    return %arg0, %c0_i32, %c0_i32_0 : i32, i32, i32
  }
  func.func @transform_14(%arg0: i32, %arg1: i32) -> (i32, i32, i32) {
    %c0_i32 = arith.constant 0 : i32
    %c0_i32_0 = arith.constant 0 : i32
    %c0_i32_1 = arith.constant 0 : i32
    return %arg0, %c0_i32, %c0_i32_0 : i32, i32, i32
  }
  func.func @transform_15(%arg0: i32, %arg1: i32) -> (i32, i32, i32) {
    %c0_i32 = arith.constant 0 : i32
    %c0_i32_0 = arith.constant 0 : i32
    %c0_i32_1 = arith.constant 0 : i32
    return %arg0, %c0_i32, %c0_i32_0 : i32, i32, i32
  }
  func.func @transform_16(%arg0: i32, %arg1: i32) -> (i32, i32, i32) {
    %c0_i32 = arith.constant 0 : i32
    %c0_i32_0 = arith.constant 0 : i32
    %c0_i32_1 = arith.constant 0 : i32
    return %arg0, %c0_i32, %c0_i32_0 : i32, i32, i32
  }
  func.func @transform_17(%arg0: i32, %arg1: i32) -> (i32, i32, i32) {
    %c0_i32 = arith.constant 0 : i32
    %c0_i32_0 = arith.constant 0 : i32
    %c0_i32_1 = arith.constant 0 : i32
    return %arg0, %c0_i32, %c0_i32_0 : i32, i32, i32
  }
  func.func @transform_18(%arg0: i32, %arg1: i32) -> (i32, i32, i32) {
    %c0_i32 = arith.constant 0 : i32
    %c0_i32_0 = arith.constant 0 : i32
    %c0_i32_1 = arith.constant 0 : i32
    return %arg0, %c0_i32, %c0_i32_0 : i32, i32, i32
  }
  func.func @transform_19(%arg0: i32, %arg1: i32) -> (i32, i32, i32) {
    %c0_i32 = arith.constant 0 : i32
    %c0_i32_0 = arith.constant 0 : i32
    %c0_i32_1 = arith.constant 0 : i32
    return %arg0, %c0_i32, %c0_i32_0 : i32, i32, i32
  }
  func.func @transform_20(%arg0: i32, %arg1: i32) -> (i32, i32, i32) {
    %c0_i32 = arith.constant 0 : i32
    %c0_i32_0 = arith.constant 0 : i32
    %c0_i32_1 = arith.constant 0 : i32
    return %arg0, %c0_i32, %c0_i32_0 : i32, i32, i32
  }
  func.func @transform_21(%arg0: i32, %arg1: i32) -> (i32, i32, i32) {
    %c0_i32 = arith.constant 0 : i32
    %c0_i32_0 = arith.constant 0 : i32
    %c0_i32_1 = arith.constant 0 : i32
    return %arg0, %c0_i32, %c0_i32_0 : i32, i32, i32
  }
  func.func @transform_22(%arg0: i32, %arg1: i32) -> (i32, i32, i32) {
    %c0_i32 = arith.constant 0 : i32
    %c0_i32_0 = arith.constant 0 : i32
    %c0_i32_1 = arith.constant 0 : i32
    return %arg0, %c0_i32, %c0_i32_0 : i32, i32, i32
  }
  func.func @transform_23(%arg0: i32, %arg1: i32) -> (i32, i32, i32) {
    %c0_i32 = arith.constant 0 : i32
    %c0_i32_0 = arith.constant 0 : i32
    %c0_i32_1 = arith.constant 0 : i32
    return %arg0, %c0_i32, %c0_i32_0 : i32, i32, i32
  }
  func.func @transform_24(%arg0: i32, %arg1: i32) -> (i32, i32, i32) {
    %c0_i32 = arith.constant 0 : i32
    %c0_i32_0 = arith.constant 0 : i32
    %c0_i32_1 = arith.constant 0 : i32
    return %arg0, %c0_i32, %c0_i32_0 : i32, i32, i32
  }
  func.func @transform_25(%arg0: i32, %arg1: i32) -> (i32, i32, i32, i32) {
    %c0_i32 = arith.constant 0 : i32
    %c0_i32_0 = arith.constant 0 : i32
    %c0_i32_1 = arith.constant 0 : i32
    return %arg0, %arg1, %c0_i32, %c0_i32_0 : i32, i32, i32, i32
  }
}

</mosaic_0001>

<bundles_post_ra>
// kernel: disaoformer_forward.1
= control target key start
LH: loop header
LB: loop body
LE: loop exit
PB: predicated region body
PF: predicated region fallthrough
CT: control target
= control target key end

     0   :  { %s7653_s0 = inlined_call_operand.vmem [shape: f32[2,2,8,768], index: 0, kind: input, shape index: {}]   ;;  %s7654_s1 = inlined_call_operand.vmem [shape: f32[2,1,8,128], index: 1, kind: input, shape index: {}]   ;;  %s7655_s2 = inlined_call_operand.vmem [shape: f32[2,16,128], index: 2, kind: input, shape index: {}]   ;;  %s7656_s3 = inlined_call_operand.hbm [shape: f32[2,1,768], index: 3, kind: input, shape index: {}]   ;;  %s7657_s4 = inlined_call_operand.hbm [shape: f32[2,1,768], index: 4, kind: input, shape index: {}]   ;;  %s7658_s5 = inlined_call_operand.hbm [shape: bf16[2,768,128], index: 5, kind: input, shape index: {}]   ;;  %s7659_s6 = inlined_call_operand.hbm [shape: f32[2,1,128], index: 6, kind: input, shape index: {}]   ;;  %s7660_s7 = inlined_call_operand.hbm [shape: bf16[128,384], index: 7, kind: input, shape index: {}]   ;;  %s7661_s8 = inlined_call_operand.vmem [shape: f32[1,384], index: 8, kind: input, shape index: {}]   ;;  %s7662_s9 = inlined_call_operand.hbm [shape: bf16[128,128], index: 9, kind: input, shape index: {}]   ;;  %s7663_s10 = inlined_call_operand.vmem [shape: f32[1,128], index: 10, kind: input, shape index: {}]   ;;  %s7664_s11 = inlined_call_operand.hbm [shape: f32[2,1,128], index: 11, kind: input, shape index: {}]   ;;  %s7665_s12 = inlined_call_operand.hbm [shape: f32[2,1,128], index: 12, kind: input, shape index: {}]   ;;  %s7666_s13 = inlined_call_operand.hbm [shape: bf16[2,128,128], index: 13, kind: input, shape index: {}]   ;;  %s7667_s14 = inlined_call_operand.vmem [shape: bf16[2,128,256], index: 14, kind: input, shape index: {}]   ;;  %s7668_s15 = inlined_call_operand.hbm [shape: bf16[2,128,128], index: 15, kind: input, shape index: {}]   ;;  %s7669_s16 = inlined_call_operand.hbm [shape: f32[2,1,128], index: 16, kind: input, shape index: {}]   ;;  %s7670_s17 = inlined_call_operand.hbm [shape: f32[2,1,128], index: 17, kind: input, shape index: {}]   ;;  %s7671_s18 = inlined_call_operand.hbm [shape: f32[2,1,128], index: 18, kind: input, shape index: {}]   ;;  %s7672_s19 = inlined_call_operand.hbm [shape: bf16[2,128,512], index: 19, kind: input, shape index: {}]   ;;  %s7673_s20 = inlined_call_operand.hbm [shape: f32[2,1,512], index: 20, kind: input, shape index: {}]   ;;  %s7674_s21 = inlined_call_operand.hbm [shape: bf16[2,512,128], index: 21, kind: input, shape index: {}]   ;;  %s7675_s22 = inlined_call_operand.hbm [shape: f32[2,1,128], index: 22, kind: input, shape index: {}]   ;;  %s7676_s23 = inlined_call_operand.hbm [shape: f32[2,1,128], index: 23, kind: input, shape index: {}]   ;;  %s7677_s24 = inlined_call_operand.hbm [shape: f32[2,1,128], index: 24, kind: input, shape index: {}]   ;;  %s7678_s25 = inlined_call_operand.vmem [shape: f32[2,2,8,128], index: 25, kind: output, shape index: {}]  }
   0x1   :  { %7694 = sst [smem:[#allocation54_spill]] %s7653_s0 }
   0x2   :  { %7695 = sst [smem:[#allocation55_spill]] %s7654_s1 }
   0x3   :  { %7696 = sst [smem:[#allocation56_spill]] %s7655_s2 }
   0x4   :  { %7697 = sst [smem:[#allocation57_spill]] %s7656_s3 }
   0x5   :  { %7698 = sst [smem:[#allocation58_spill]] %s7657_s4 }
   0x6   :  { %7699 = sst [smem:[#allocation59_spill]] %s7658_s5 }
   0x7   :  { %7700 = sst [smem:[#allocation60_spill]] %s7659_s6 }
   0x8   :  { %7701 = sst [smem:[#allocation61_spill]] %s7660_s7 }
   0x9   :  { %7702 = sst [smem:[#allocation62_spill]] %s7661_s8 }
   0xa   :  { %7703 = sst [smem:[#allocation63_spill]] %s7662_s9 }
   0xb   :  { %7704 = sst [smem:[#allocation64_spill]] %s7663_s10 }
   0xc   :  { %7705 = sst [smem:[#allocation65_spill]] %s7664_s11 }
   0xd   :  { %7706 = sst [smem:[#allocation66_spill]] %s7665_s12 }
   0xe   :  { %7707 = sst [smem:[#allocation67_spill]] %s7666_s13 }
   0xf   :  { %7708 = sst [smem:[#allocation68_spill]] %s7667_s14 }
  0x10   :  { %7709 = sst [smem:[#allocation69_spill]] %s7668_s15 }
  0x11   :  { %7710 = sst [smem:[#allocation70_spill]] %s7676_s23 }
  0x12   :  { %7711 = sst [smem:[#allocation71_spill]] %s7677_s24 }
  0x13   :  { %7712 = sst [smem:[#allocation72_spill]] %s7678_s25 }
  0x14   :  { %30 = vsyncpa [#allocation3], 0 }
  0x15   :  { %32 = vsyncpa [#allocation3 + $0x1], 0 }
  0x16   :  { %33 = vsyncpa [#allocation5], 0 }
  0x17   :  { %35 = vsyncpa [#allocation5 + $0x1], 0 }
  0x18   :  { %36 = vsyncpa [#allocation8], 0 }
  0x19   :  { %38 = vsyncpa [#allocation8 + $0x1], 0 }
  0x1a   :  { %39 = vsyncpa [#allocation11], 0  ;;  %s6678_s29 = smov 0   ;;  %s6680_s2 = smov 0  }
  0x1b   :  { %s6682_s6 = smov 0   ;;  %s6684_s30 = smov 0  }
  0x1c   :  { %s6686_s7 = smov 0   ;;  %s6688_s3 = smov 0  }
  0x1d   :  { %s6690_s26 = smov 0   ;;  %s6692_s1 = smov 0  }
  0x1e LB: > { %7713 = sst [smem:[#allocation43_spill]] %s6509_s2  ;;  %s7679_s8 = sadd.s32 4294967295, %s6533_s1   ;;  %s6533_s1 = sphi %s6692_s1, %s45_s1   ;;  %s6529_s26 = sphi %s6690_s26, %s7769_s26   ;;  %s6525_s3 = sphi %s6688_s3, %s7766_s3   ;;  %s6521_s7 = sphi %s6686_s7, %s7768_s7   ;;  %s6517_s30 = sphi %s6684_s30, %s7765_s30   ;;  %s6513_s6 = sphi %s6682_s6, %s7764_s6   ;;  %s6509_s2 = sphi %s6680_s2, %s7763_s2   ;;  %s6505_s29 = sphi %s6678_s29, %s7762_s29  }
  0x1f   : > { %7714 = sst [smem:[#allocation44_spill]] %s6513_s6  ;;  %s54_s27 = sadd.s32 1, %s6525_s3 }
  0x20   : > { %7715 = sst [smem:[#allocation45_spill]] %s6517_s30  ;;  %p55_p0 = scmp.ge.s32.totalorder %s54_s27, 2 }
  0x21   : > { %7716 = sst [smem:[#allocation46_spill]] %s6521_s7  ;;  %s57_s4 = sadd.s32 1, %s6529_s26 }
  0x22   : > { %7717 = sst [smem:[#allocation47_spill]] %s6525_s3  ;;  %s144_s28 = sadd.s32 1, %s6513_s6 }
  0x23   : > { %7718 = sst [smem:[#allocation48_spill]] %s6533_s1  ;;  %p151_p1 = scmp.ne.s32.totalorder %s6513_s6, %s6509_s2 }
  0x24   : > { %s7771_s27 = smov (%p55_p0, %s54_s27), 0  ;;  %s7773_s4 = smov (!%p55_p0, %s57_s4), %s6529_s26 }
  0x25   : > { %7719 = sst [smem:[#allocation49_spill]] %s7771_s27  ;;  %p152_p2 = scmp.eq.s32.totalorder %s6533_s1, 0 }
  0x26   : > { %p157_p3 = scmp.ne.s32.totalorder %s6509_s2, %s6505_s29  ;;  %p59_p4 = scmp.ge.s32.totalorder %s7773_s4, 2 }
  0x27   : > { %p6729_p5 = scmp.eq.s32.totalorder %s7679_s8, 0  ;;  %p6733_p6 = por %p152_p2, %p151_p1 }
  0x28   : > { %p4674_p7 = scmp.ge.s32.totalorder %s6533_s1, 1  ;;  %s7775_s4 = smov (%p59_p4, %s7773_s4), 0 }
  0x29   : > { %s7720_s9 = scalar_select %p6729_p5, 1, 0 }
  0x2a   : > { %7723 = sst [smem:[#allocation51_spill]] %s7775_s4  ;;  %p6742_p8 = por %p6729_p5, %p157_p3 }
  0x2b   : > { %7721 = sst [smem:[#allocation50_spill]] %s7720_s9  ;;  %p722_p9 = scmp.lt.s32.totalorder %s6533_s1, 5 }
  0x2c   : > { %s7724_s0 = scalar_select %p6742_p8, 1, 0 }
  0x2d   : > { %s141_s29 = ssub.s32 %s6529_s26, %s7775_s4  ;;  %p6749_p11 = pnand %p4674_p7, %p722_p9 }
  0x2e   : > { %7725 = sst [smem:[#allocation52_spill]] %s7724_s0  ;;  %p142_p10 = scmp.eq.s32.totalorder %s141_s29, 0 }
  0x2f   : > { %s7727_s25 = sld [smem:[#allocation61_spill]]  ;;  %p5673_p12 = pneg %p6749_p11 }
  0x30   : > { %s6757_s10 = scalar_select %p142_p10, %s6513_s6, %s144_s28  }
  0x31   : > { %s6535_s30 = smov [#allocation9]   ;;  %p5674_p13 = pnand %p5673_p12, %p6729_p5 }
  0x32   : > { %7728 = sst [smem:[#allocation53_spill]] %s6757_s10  ;;  %s735_s7 = sshll.u32 %s6535_s30, 4  ;;  %s736_s7 = int_to_ptr.vmem [resolvable:$true] %s735_s7 }
  0x33   : > { %s7729_s0 = sld [smem:[#allocation63_spill]]  ;;  %s6536_s24 = smov 192  }
  0x34   : > { %s6537_s23 = smov 12   ;;  %s6538_s3 = smov [#allocation10]  }
  0x35   : > { %s733_s14 = sshll.u32 %s7727_s25, 4  ;;  %s752_s25 = sshll.u32 %s6538_s3, 4  ;;  %s734_s14 = int_to_ptr.hbm [resolvable:$true] %s733_s14  ;;  %s753_s25 = int_to_ptr.vmem [resolvable:$true] %s752_s25 }
  0x36   : > { %5676 = dma.hbm_to_vmem [thread:$0]  (!%p5674_p13), %s734_s14, 3072, %s736_s7, [#allocation8], %s6536_s24, %s6536_s24, %s6537_s23  }
  0x37   : > { %s6539_s27 = smov 64   ;;  %s6540_s28 = smov 4  }
  0x38   : > { %p4677_p0 = scmp.ge.s32.totalorder %s6533_s1, 4 }
  0x39   : > { %s750_s2 = sshll.u32 %s7729_s0, 4  ;;  %s6768_s30 = sand.u32 (!%p4677_p0), 1, %s6533_s1   ;;  %s751_s2 = int_to_ptr.hbm [resolvable:$true] %s750_s2 }
  0x3a   : > { %5679 = dma.hbm_to_vmem [thread:$0]  (!%p5674_p13), %s751_s2, 1024, %s753_s25, [#allocation11], %s6539_s27, %s6539_s27, %s6540_s28  }
  0x3b   : > { %765 = sbr.rel (%p4677_p0) target bundleno = 130 (0x82), region = 32  ;;  %s6771_s4 = sand.u32 (!%p4677_p0), 1, %s6513_s6  }
  0x3c   : > { %s5621_s14 = smul.u32 (!%p4677_p0), 6, %s6771_s4  ;;  %s7730_s0 = sld [smem:[#allocation57_spill]] (!%p4677_p0) }
  0x3d   : > { %s5622_s23 = smul.u32 (!%p4677_p0), 6, %s6529_s26  ;;  %s7731_s10 = sld [smem:[#allocation58_spill]] (!%p4677_p0) }
  0x3e   : > { %s800_s29 = scalar_lea.vmem (!%p4677_p0), [#allocation2], %s5621_s14  ;;  %s6782_s9 = scalar_lea.sflag (!%p4677_p0), [#allocation3], %s6768_s30 }
  0x3f   : > { %s808_s3 = sshll.u32 (!%p4677_p0), %s800_s29, 4  ;;  %s819_s24 = scalar_lea.vmem (!%p4677_p0), [#allocation4], %s5621_s14  ;;  %s809_s3 = int_to_ptr.vmem [resolvable:$true] %s808_s3 }
  0x40   : > { %s827_s7 = sshll.u32 %s819_s24, 4  ;;  %s7732_s27 = sld [smem:[#allocation59_spill]]  ;;  %s828_s7 = int_to_ptr.vmem [resolvable:$true] %s827_s7 }
  0x41   : > { %s7691_s28 = smov 64   ;;  %s7693_s24 = smov 4  }
  0x42   : > { %s804_s2 = scalar_lea.hbm %s7730_s0, %s5622_s23  ;;  %s6788_s0 = scalar_lea.sflag [#allocation5], %s6768_s30 }
  0x43   : > { %s806_s25 = sshll.u32 %s804_s2, 4  ;;  %s823_s6 = scalar_lea.hbm %s7731_s10, %s5622_s23  ;;  %s807_s25 = int_to_ptr.hbm [resolvable:$true] %s806_s25 }
  0x44   : > { %5635 = dma.hbm_to_vmem [thread:$0]  (%p6733_p6), %s807_s25, 96, %s809_s3, %s6782_s9  }
  0x45   : > { %s825_s1 = sshll.u32 %s823_s6, 4  ;;  %s5625_s10 = smul.u32 384, %s6771_s4  ;;  %s826_s1 = int_to_ptr.hbm [resolvable:$true] %s825_s1 }
  0x46   : > { %5636 = dma.hbm_to_vmem [thread:$0]  (%p6733_p6), %s826_s1, 96, %s828_s7, %s6788_s0  }
  0x47   : > { %s5626_s23 = smul.u32 384, %s6529_s26  ;;  %s838_s14 = scalar_lea.vmem [#allocation6], %s5625_s10 }
  0x48   : > { %s846_s3 = sshll.u32 %s838_s14, 4  ;;  %s859_s2 = scalar_lea.vmem [#allocation7], %s6771_s4  ;;  %s847_s3 = int_to_ptr.vmem [resolvable:$true] %s846_s3 }
  0x49   : > { %s843_s6 = scalar_lea.hbm %s7732_s27, %s5626_s23  ;;  %s7733_s23 = sld [smem:[#allocation60_spill]] }
  0x4a   : > { %s844_s25 = sshll.u32 %s843_s6, 4  ;;  %s866_s29 = sshll.u32 %s859_s2, 4  ;;  %s845_s25 = int_to_ptr.hbm [resolvable:$true] %s844_s25  ;;  %s867_s29 = int_to_ptr.vmem [resolvable:$true] %s866_s29 }
  0x4b   : > { %5637 = dma.hbm_to_vmem [thread:$0]  (%p6733_p6), %s845_s25, 6144, %s847_s3, %s6788_s0, %s7691_s28, %s7691_s28, %s7693_s24  }
  0x4c   : > { %s6810_s6 = scalar_lea.sflag [#allocation8], %s6768_s30  ;;  %s7734_s11 = sld [smem:[#allocation65_spill]] }
  0x4d   : > { %s876_s1 = scalar_lea.vmem [#allocation12], %s6771_s4  ;;  %s7735_s12 = sld [smem:[#allocation66_spill]] }
  0x4e   : > { %s883_s7 = sshll.u32 %s876_s1, 4  ;;  %s893_s28 = scalar_lea.vmem [#allocation13], %s6771_s4  ;;  %s884_s7 = int_to_ptr.vmem [resolvable:$true] %s883_s7 }
  0x4f   : > { %s862_s10 = scalar_lea.hbm %s7733_s23, %s6529_s26  ;;  %s4679_s14 = sshll.u32 %s6771_s4, 6 }
  0x50   : > { %s864_s27 = sshll.u32 %s862_s10, 4  ;;  %s5439_s3 = sshll.u32 %s6529_s26, 6  ;;  %s865_s27 = int_to_ptr.hbm [resolvable:$true] %s864_s27 }
  0x51   : > { %5638 = dma.hbm_to_vmem [thread:$0]  (%p6733_p6), %s865_s27, 16, %s867_s29, %s6810_s6  }
  0x52   : > { %s879_s25 = scalar_lea.hbm %s7734_s11, %s6529_s26  ;;  %s900_s29 = sshll.u32 %s893_s28, 4  ;;  %s901_s29 = int_to_ptr.vmem [resolvable:$true] %s900_s29 }
  0x53   : > { %s881_s23 = sshll.u32 %s879_s25, 4  ;;  %s896_s2 = scalar_lea.hbm %s7735_s12, %s6529_s26  ;;  %s882_s23 = int_to_ptr.hbm [resolvable:$true] %s881_s23 }
  0x54   : > { %5639 = dma.hbm_to_vmem [thread:$0]  (%p6733_p6), %s882_s23, 16, %s884_s7, %s6782_s9  }
  0x55   : > { %s898_s27 = sshll.u32 %s896_s2, 4  ;;  %s7736_s13 = sld [smem:[#allocation67_spill]]  ;;  %s899_s27 = int_to_ptr.hbm [resolvable:$true] %s898_s27 }
  0x56   : > { %5640 = dma.hbm_to_vmem [thread:$0]  (%p6733_p6), %s899_s27, 16, %s901_s29, %s6788_s0  }
  0x57   : > { %s911_s23 = scalar_lea.vmem [#allocation14], %s4679_s14  ;;  %s7737_s28 = smov 64  }
  0x58   : > { %s919_s10 = sshll.u32 %s911_s23, 4  ;;  %s7738_s15 = sld [smem:[#allocation69_spill]]  ;;  %s920_s10 = int_to_ptr.vmem [resolvable:$true] %s919_s10 }
  0x59   : > { %s941_s25 = scalar_lea.vmem [#allocation15], %s4679_s14  ;;  %s5441_s2 = sshll.u32 %s6529_s26, 8 }
  0x5a   : > { %s949_s1 = sshll.u32 %s941_s25, 4  ;;  %s4688_s23 = sshll.u32 %s6771_s4, 2  ;;  %s950_s1 = int_to_ptr.vmem [resolvable:$true] %s949_s1 }
  0x5b   : > { %s916_s7 = scalar_lea.hbm %s7736_s13, %s5439_s3 }
  0x5c   : > { %s917_s30 = sshll.u32 %s916_s7, 4  ;;  %s918_s30 = int_to_ptr.hbm [resolvable:$true] %s917_s30 }
  0x5d   : > { %5641 = dma.hbm_to_vmem [thread:$0]  (%p6733_p6), %s918_s30, 1024, %s920_s10, %s6810_s6, %s7737_s28, %s7737_s28, %s7693_s24  }
  0x5e   : > { %s946_s27 = scalar_lea.hbm %s7738_s15, %s5439_s3  ;;  %s965_s10 = scalar_lea.hbm %s7669_s16, %s6529_s26 }
  0x5f   : > { %s947_s11 = sshll.u32 %s946_s27, 4  ;;  %s962_s30 = scalar_lea.vmem [#allocation16], %s6771_s4  ;;  %s948_s11 = int_to_ptr.hbm [resolvable:$true] %s947_s11 }
  0x60   : > { %5642 = dma.hbm_to_vmem [thread:$0]  (%p6733_p6), %s948_s11, 1024, %s950_s1, %s6782_s9, %s7737_s28, %s7737_s28, %s7693_s24  }
  0x61   : > { %s969_s3 = sshll.u32 %s962_s30, 4  ;;  %s967_s14 = sshll.u32 %s965_s10, 4  ;;  %s970_s3 = int_to_ptr.vmem [resolvable:$true] %s969_s3  ;;  %s968_s14 = int_to_ptr.hbm [resolvable:$true] %s967_s14 }
  0x62   : > { %5643 = dma.hbm_to_vmem [thread:$0]  (%p6733_p6), %s968_s14, 16, %s970_s3, %s6788_s0  }
  0x63   : > { %s982_s11 = scalar_lea.hbm %s7670_s17, %s6529_s26  ;;  %s979_s27 = scalar_lea.vmem [#allocation17], %s6771_s4 }
  0x64   : > { %s986_s25 = sshll.u32 %s979_s27, 4  ;;  %s984_s1 = sshll.u32 %s982_s11, 4  ;;  %s987_s25 = int_to_ptr.vmem [resolvable:$true] %s986_s25  ;;  %s985_s1 = int_to_ptr.hbm [resolvable:$true] %s984_s1 }
  0x65   : > { %5644 = dma.hbm_to_vmem [thread:$0]  (%p6733_p6), %s985_s1, 16, %s987_s25, %s6810_s6  }
  0x66   : > { %s999_s10 = scalar_lea.hbm %s7671_s18, %s6529_s26  ;;  %s996_s30 = scalar_lea.vmem [#allocation18], %s6771_s4 }
  0x67   : > { %s1003_s24 = sshll.u32 %s996_s30, 4  ;;  %s1001_s3 = sshll.u32 %s999_s10, 4  ;;  %s1004_s24 = int_to_ptr.vmem [resolvable:$true] %s1003_s24  ;;  %s1002_s3 = int_to_ptr.hbm [resolvable:$true] %s1001_s3 }
  0x68   : > { %s4685_s14 = sshll.u32 %s6771_s4, 8  ;;  %s1019_s27 = scalar_lea.hbm %s7672_s19, %s5441_s2 }
  0x69   : > { %5645 = dma.hbm_to_vmem [thread:$0]  (%p6733_p6), %s1002_s3, 16, %s1004_s24, %s6782_s9  }
  0x6a   : > { %s1014_s25 = scalar_lea.vmem [#allocation19], %s4685_s14  ;;  %s1020_s7 = sshll.u32 %s1019_s27, 4  ;;  %s1021_s7 = int_to_ptr.hbm [resolvable:$true] %s1020_s7 }
  0x6b   : > { %s1022_s1 = sshll.u32 %s1014_s25, 4  ;;  %s6543_s10 = smov 256   ;;  %s1023_s1 = int_to_ptr.vmem [resolvable:$true] %s1022_s1 }
  0x6c   : > { %s6544_s30 = smov 16   ;;  %s4689_s24 = sshll.u32 %s6529_s26, 2 }
  0x6d   : > { %5646 = dma.hbm_to_vmem [thread:$0]  (%p6733_p6), %s1021_s7, 4096, %s1023_s1, %s6788_s0, %s6543_s10, %s6543_s10, %s6544_s30  }
  0x6e   : > { %s1040_s29 = scalar_lea.hbm %s7673_s20, %s4689_s24  ;;  %s1036_s11 = scalar_lea.vmem [#allocation20], %s4688_s23 }
  0x6f   : > { %s1044_s13 = sshll.u32 %s1036_s11, 4  ;;  %s1042_s25 = sshll.u32 %s1040_s29, 4  ;;  %s1045_s13 = int_to_ptr.vmem [resolvable:$true] %s1044_s13  ;;  %s1043_s25 = int_to_ptr.hbm [resolvable:$true] %s1042_s25 }
  0x70   : > { %5647 = dma.hbm_to_vmem [thread:$0]  (%p6733_p6), %s1043_s25, 64, %s1045_s13, %s6810_s6  }
  0x71   : > { %s1060_s1 = scalar_lea.hbm %s7674_s21, %s5441_s2  ;;  %s1055_s7 = scalar_lea.vmem [#allocation21], %s4685_s14 }
  0x72   : > { %s1063_s10 = sshll.u32 %s1055_s7, 4  ;;  %s1061_s12 = sshll.u32 %s1060_s1, 4  ;;  %s1064_s10 = int_to_ptr.vmem [resolvable:$true] %s1063_s10  ;;  %s1062_s12 = int_to_ptr.hbm [resolvable:$true] %s1061_s12 }
  0x73   : > { %s7739_s23 = smov 4   ;;  %s1079_s15 = scalar_lea.hbm %s7675_s22, %s6529_s26 }
  0x74   : > { %5648 = dma.hbm_to_vmem [thread:$0]  (%p6733_p6), %s1062_s12, 4096, %s1064_s10, %s6782_s9, %s7737_s28, %s7737_s28, %s7739_s23  }
  0x75   : > { %s1076_s24 = scalar_lea.vmem [#allocation22], %s6771_s4  ;;  %s1081_s14 = sshll.u32 %s1079_s15, 4  ;;  %s1082_s14 = int_to_ptr.hbm [resolvable:$true] %s1081_s14 }
  0x76   : > { %s1083_s2 = sshll.u32 %s1076_s24, 4  ;;  %s7740_s11 = sld [smem:[#allocation70_spill]]  ;;  %s1084_s2 = int_to_ptr.vmem [resolvable:$true] %s1083_s2 }
  0x77   : > { %5649 = dma.hbm_to_vmem [thread:$0]  (%p6733_p6), %s1082_s14, 16, %s1084_s2, %s6788_s0  }
  0x78   : > { %s1093_s27 = scalar_lea.vmem [#allocation23], %s6771_s4  ;;  %s7741_s12 = sld [smem:[#allocation71_spill]] }
  0x79   : > { %s1100_s28 = sshll.u32 %s1093_s27, 4  ;;  %s1110_s30 = scalar_lea.vmem [#allocation24], %s6771_s4  ;;  %s1101_s28 = int_to_ptr.vmem [resolvable:$true] %s1100_s28 }
  0x7a   : > { %s1117_s13 = sshll.u32 %s1110_s30, 4  ;;  %s1118_s13 = int_to_ptr.vmem [resolvable:$true] %s1117_s13 }
  0x7c   : > { %s1096_s25 = scalar_lea.hbm %s7740_s11, %s6529_s26 }
  0x7d   : > { %s1098_s1 = sshll.u32 %s1096_s25, 4  ;;  %s1099_s1 = int_to_ptr.hbm [resolvable:$true] %s1098_s1 }
  0x7e   : > { %5650 = dma.hbm_to_vmem [thread:$0]  (%p6733_p6), %s1099_s1, 16, %s1101_s28, %s6810_s6  }
  0x7f   : > { %s1113_s23 = scalar_lea.hbm %s7741_s12, %s6529_s26 }
  0x80   : > { %s1115_s15 = sshll.u32 %s1113_s23, 4  ;;  %s1116_s15 = int_to_ptr.hbm [resolvable:$true] %s1115_s15 }
  0x81   : > { %5651 = dma.hbm_to_vmem [thread:$0]  (%p6733_p6), %s1116_s15, 16, %s1118_s13, %s6782_s9  }
  0x82 PF: > { %1126 = sbr.rel (%p6749_p11) target bundleno = 3810 (0xee2), region = 120  ;;  %s7742_s0 = sld [smem:[#allocation48_spill]] (!%p6749_p11) }
  0x83   : > { %s7744_s2 = sld [smem:[#allocation43_spill]] (!%p6749_p11) }
  0x88   : > { %s7743_s24 = sadd.s32 4294967295, %s7742_s0  }
  0x89   : > { %s1128_s6 = sand.u32 1, %s7743_s24   ;;  %s6929_s3 = sand.u32 1, %s7744_s2  }
  0x8a   : > { %s5627_s29 = smul.u32 6, %s6929_s3  ;;  %s6932_s4 = scalar_lea.sflag [#allocation3], %s1128_s6 }
  0x8c   : > { %s6934_s11 = scalar_lea.vmem [#allocation2], %s5627_s29 }
  0x8d   : > { %6432 = dma.done.wait (%p6742_p8), %s6932_s4, 96  }
  0x8e   : > { %6434 = vsyncadd (%p6742_p8), %s6932_s4, 4294967200  ;;  %s6942_s8 = scalar_lea.sflag [#allocation5], %s1128_s6  ;;  %s6944_s9 = scalar_lea.vmem [#allocation4], %s5627_s29 }
  0x8f   : > { %6436 = dma.done.wait (%p6742_p8), %s6942_s8, 6240  }
  0x90   : > { %6438 = vsyncadd (%p6742_p8), %s6942_s8, 4294961056  ;;  %s5628_s5 = smul.u32 384, %s6929_s3  ;;  %s6955_s27 = scalar_lea.sflag [#allocation8], %s1128_s6 }
  0x91   : > { %s1161_s28 = scalar_lea.vmem [#allocation7], %s6929_s3 }
  0x92   : > { %s6953_s25 = scalar_lea.vmem [#allocation6], %s5628_s5 }
  0x93   : > { %6440 = dma.done.wait (%p6742_p8), %s6955_s27, 16  }
  0x94   : > { %6442 = vsyncadd (%p6742_p8), %s6955_s27, 4294967280 }
  0x95   : > { %6444 = dma.done.wait (%p6729_p5), [#allocation8], 3072  }
  0x96   : > { %6446 = vsyncadd (%p6729_p5), [#allocation8], 4294964224 }
  0x97   : > { %6448 = dma.done.wait (%p6729_p5), [#allocation11], 1024  }
  0x98   : > { %6450 = vsyncadd (%p6729_p5), [#allocation11], 4294966272  ;;  %s1180_s7 = scalar_lea.vmem [#allocation12], %s6929_s3 }
  0x99   : > { %6452 = dma.done.wait (%p6742_p8), %s6932_s4, 16  }
  0x9a   : > { %6454 = vsyncadd (%p6742_p8), %s6932_s4, 4294967280  ;;  %s1189_s10 = scalar_lea.vmem [#allocation13], %s6929_s3 }
  0x9b   : > { %6456 = dma.done.wait (%p6742_p8), %s6942_s8, 16  }
  0x9c   : > { %6458 = vsyncadd (%p6742_p8), %s6942_s8, 4294967280  ;;  %s4696_s12 = sshll.u32 %s6929_s3, 6 }
  0x9d   : > { %s6987_s23 = scalar_lea.vmem [#allocation14], %s4696_s12 }
  0x9e   : > { %6460 = dma.done.wait (%p6742_p8), %s6955_s27, 1024  }
  0x9f   : > { %6462 = vsyncadd (%p6742_p8), %s6955_s27, 4294966272  ;;  %s6995_s30 = scalar_lea.vmem [#allocation15], %s4696_s12 }
  0xa0   : > { %6464 = dma.done.wait (%p6742_p8), %s6932_s4, 1024  }
  0xa1   : > { %6466 = vsyncadd (%p6742_p8), %s6932_s4, 4294966272  ;;  %s1218_s13 = scalar_lea.vmem [#allocation16], %s6929_s3 }
  0xa2   : > { %6468 = dma.done.wait (%p6742_p8), %s6942_s8, 16  }
  0xa3   : > { %6470 = vsyncadd (%p6742_p8), %s6942_s8, 4294967280 }
  0xa4   : > { %6472 = dma.done.wait (%p6742_p8), %s6955_s27, 16  }
  0xa5   : > { %6474 = vsyncadd (%p6742_p8), %s6955_s27, 4294967280 }
  0xa6   : > { %6476 = dma.done.wait (%p6742_p8), %s6932_s4, 16  }
  0xa7   : > { %6478 = vsyncadd (%p6742_p8), %s6932_s4, 4294967280  ;;  %s4698_s24 = sshll.u32 %s6929_s3, 8 }
  0xa8   : > { %s7025_s2 = scalar_lea.vmem [#allocation19], %s4698_s24 }
  0xa9   : > { %6480 = dma.done.wait (%p6742_p8), %s6942_s8, 4096  }
  0xaa   : > { %6482 = vsyncadd (%p6742_p8), %s6942_s8, 4294963200  ;;  %s4699_s6 = sshll.u32 %s6929_s3, 2 }
  0xab   : > { %s7034_s29 = scalar_lea.vmem [#allocation20], %s4699_s6 }
  0xac   : > { %6484 = dma.done.wait (%p6742_p8), %s6955_s27, 64  }
  0xad   : > { %6486 = vsyncadd (%p6742_p8), %s6955_s27, 4294967232  ;;  %s7042_s5 = scalar_lea.vmem [#allocation21], %s4698_s24 }
  0xae   : > { %6488 = dma.done.wait (%p6742_p8), %s6932_s4, 4096  }
  0xaf   : > { %6490 = vsyncadd (%p6742_p8), %s6932_s4, 4294963200 }
  0xb0   : > { %6492 = dma.done.wait (%p6742_p8), %s6942_s8, 16  }
  0xb1   : > { %6494 = vsyncadd (%p6742_p8), %s6942_s8, 4294967280 }
  0xb2   : > { %6496 = dma.done.wait (%p6742_p8), %s6955_s27, 16  }
  0xb3   : > { %6498 = vsyncadd (%p6742_p8), %s6955_s27, 4294967280 }
  0xb4   : > { %6500 = dma.done.wait (%p6742_p8), %s6932_s4, 16  }
  0xb5   : > { %6502 = vsyncadd (%p6742_p8), %s6932_s4, 4294967280  ;;  %s7747_s8 = sld [smem:[#allocation46_spill]]  ;;  %v6545_v11 = vmov 768.0   ;;  %v5452_v14 = vld [vmem:[%s6953_s25 + $0x38] sm:$0xff]  ;;  %v5451_v17 = vld [vmem:[%s6953_s25 + $0x30] sm:$0xff] }
  0xb6   : > { %s7748_s6 = sld [smem:[#allocation45_spill]]  ;;  %5771 = vrcp.f32 %v6545_v11  ;;  %v5460_v15 = vld [vmem:[%s6953_s25 + $0x78] sm:$0xff]  ;;  %1982 = vmatpush.bf16.msra.mxu0 %v5452_v14  ;;  %v5459_v18 = vld [vmem:[%s6953_s25 + $0x70] sm:$0xff]  ;;  %v5450_v22 = vld [vmem:[%s6953_s25 + $0x28] sm:$0xff] }
  0xb7   : > { %s7749_s15 = sld [smem:[#allocation54_spill]]  ;;  %1995 = vmatpush.bf16.msra.mxu1 %v5460_v15  ;;  %v5468_v19 = vld [vmem:[%s6953_s25 + $0xb8] sm:$0xff]  ;;  %v5458_v23 = vld [vmem:[%s6953_s25 + $0x68] sm:$0xff]  ;;  %v5449_v25 = vld [vmem:[%s6953_s25 + $0x20] sm:$0xff] }
  0xb8   : > { %v5476_v20 = vld [vmem:[%s6953_s25 + $0xf8] sm:$0xff]  ;;  %2008 = vmatpush.bf16.msra.mxu2 %v5468_v19  ;;  %v5457_v26 = vld [vmem:[%s6953_s25 + $0x60] sm:$0xff]  ;;  %v5467_v49 = vld [vmem:[%s6953_s25 + $0xb0] sm:$0xff]  ;;  %s7752_s14 = sld [smem:[#allocation64_spill]] }
  0xb9   : > { %2021 = vmatpush.bf16.msra.mxu3 %v5476_v20  ;;  %v5448_v47 = vld [vmem:[%s6953_s25 + $0x18] sm:$0xff]  ;;  %v5475_v50 = vld [vmem:[%s6953_s25 + $0xf0] sm:$0xff]  ;;  %v5466_v53 = vld [vmem:[%s6953_s25 + $0xa8] sm:$0xff] }
  0xba   : > { %1983 = vmatpush.bf16.msra.mxu0 %v5451_v17  ;;  %v5456_v48 = vld [vmem:[%s6953_s25 + $0x58] sm:$0xff]  ;;  %v5447_v51 = vld [vmem:[%s6953_s25 + $0x10] sm:$0xff]  ;;  %v5474_v54 = vld [vmem:[%s6953_s25 + $0xe8] sm:$0xff] }
  0xbb   : > { %p1458_p1 = scmp.lt.s32.totalorder %s7747_s8, 1  ;;  %1996 = vmatpush.bf16.msra.mxu1 %v5459_v18  ;;  %v5455_v52 = vld [vmem:[%s6953_s25 + $0x50] sm:$0xff]  ;;  %v5446_v55 = vld [vmem:[%s6953_s25 + $0x8] sm:$0xff]  ;;  %v5465_v57 = vld [vmem:[%s6953_s25 + $0xa0] sm:$0xff] }
  0xbc   : > { %p1460_p2 = scmp.lt.s32.totalorder %s7748_s6, 1  ;;  %v5772_v12 = vpop.eup %5771  ;;  %2009 = vmatpush.bf16.msra.mxu2 %v5467_v49  ;;  %v5454_v56 = vld [vmem:[%s6953_s25 + $0x48] sm:$0xff]  ;;  %v5473_v58 = vld [vmem:[%s6953_s25 + $0xe0] sm:$0xff]  ;;  %v5464_v61 = vld [vmem:[%s6953_s25 + $0x98] sm:$0xff] }
  0xbd   : > { %s7777_s8 = smov (!%p1458_p1, %s7747_s8), 1  ;;  %v1504_v13 = vmul.f32 768.0, %v5772_v12  ;;  %vm1508_vm0 = vweird.f32 %v5772_v12  ;;  %2022 = vmatpush.bf16.msra.mxu3 %v5475_v50  ;;  %v5445_v59 = vld [vmem:[%s6953_s25] sm:$0xff]  ;;  %v5472_v62 = vld [vmem:[%s6953_s25 + $0xd8] sm:$0xff]  ;;  %v5479_v17 = vld [vmem:[%s6953_s25 + $0x110] sm:$0xff] }
  0xbe   : > { %s7779_s6 = smov (!%p1460_p2, %s7748_s6), 1  ;;  %s5630_s27 = smul.u32 12, %s7777_s8  ;;  %1984 = vmatpush.bf16.msra.mxu0 %v5450_v22  ;;  %v5453_v60 = vld [vmem:[%s6953_s25 + $0x40] sm:$0xff]  ;;  %v5484_v63 = vld [vmem:[%s6953_s25 + $0x138] sm:$0xff]  ;;  %v5487_v18 = vld [vmem:[%s6953_s25 + $0x150] sm:$0xff] }
  0xbf   : > { %s5629_s24 = smul.u32 6, %s7779_s6  ;;  %v1505_v16 = vsub.f32 1.0, %v1504_v13  ;;  %1997 = vmatpush.bf16.msra.mxu1 %v5458_v23  ;;  %v5481_v11 = vld [vmem:[%s6953_s25 + $0x120] sm:$0xff]  ;;  %v5480_v13 = vld [vmem:[%s6953_s25 + $0x118] sm:$0xff]  ;;  %v5478_v20 = vld [vmem:[%s6953_s25 + $0x108] sm:$0xff] }
  0xc0   : > { %2010 = vmatpush.bf16.msra.mxu2 %v5466_v53  ;;  %v5488_v14 = vld [vmem:[%s6953_s25 + $0x158] sm:$0xff]  ;;  %v5477_v22 = vld [vmem:[%s6953_s25 + $0x100] sm:$0xff] }
  0xc1   : > { %s1464_s12 = sadd.s32 %s5630_s27, %s5629_s24  ;;  %v1506_v21 = vmul.f32 %v5772_v12, %v1505_v16  ;;  %2023 = vmatpush.bf16.msra.mxu3 %v5474_v54  ;;  %v5485_v23 = vld [vmem:[%s6953_s25 + $0x140] sm:$0xff] }
  0xc2   : > { %s4701_s1 = sshll.u32 %s1464_s12, 3  ;;  %1985 = vmatpush.bf16.msra.mxu0 %v5449_v25  ;;  %s7751_s12 = sld [smem:[#allocation62_spill]] }
  0xc3   : > { %s1466_s4 = scalar_lea.vmem %s7749_s15, %s4701_s1  ;;  %v1507_v24 = vadd.f32 %v5772_v12, %v1506_v21  ;;  %1998 = vmatpush.bf16.msra.mxu1 %v5457_v26  ;;  %v5486_v21 = vld [vmem:[%s6953_s25 + $0x148] sm:$0xff]  ;;  %s7750_s15 = sld [smem:[#allocation55_spill]] }
  0xc4   : > { %v1490_v0 = vld [vmem:[%s1466_s4] sm:$0xff]  ;;  %v1491_v1 = vld [vmem:[%s1466_s4 + $0x8] sm:$0xff]  ;;  %v1492_v2 = vld [vmem:[%s1466_s4 + $0x10] sm:$0xff]  ;;  %2011 = vmatpush.bf16.msra.mxu2 %v5465_v57 }
  0xc5   : > { %v1496_v3 = vadd.f32 %v1491_v1, %v1490_v0  ;;  %v1493_v4 = vld [vmem:[%s1466_s4 + $0x18] sm:$0xff]  ;;  %v1494_v6 = vld [vmem:[%s1466_s4 + $0x20] sm:$0xff]  ;;  %v1495_v8 = vld [vmem:[%s1466_s4 + $0x28] sm:$0xff]  ;;  %v7094_v27 = vsel %vm1508_vm0, %v5772_v12, %v1507_v24  ;;  %2024 = vmatpush.bf16.msra.mxu3 %v5473_v58  ;;  %s5444_s4 = sshll.u32 %s7777_s8, 7 }
  0xc6   : > { %1986 = vmatpush.bf16.msra.mxu0 %v5448_v47  ;;  %v5489_v12 = vld [vmem:[%s6953_s25 + $0x160] sm:$0xff] }
  0xc7   : > { %v1497_v5 = vadd.f32 %v1496_v3, %v1492_v2  ;;  %1999 = vmatpush.bf16.msra.mxu1 %v5456_v48  ;;  %v5483_v3 = vld [vmem:[%s6953_s25 + $0x130] sm:$0xff]  ;;  %v4977_v47 = vld [vmem:[#allocation9 + $0x9c] sm:$0xf0] }
  0xc8   : > { %2012 = vmatpush.bf16.msra.mxu2 %v5464_v61 }
  0xc9   : > { %v1498_v7 = vadd.f32 %v1497_v5, %v1493_v4  ;;  %2025 = vmatpush.bf16.msra.mxu3 %v5472_v62  ;;  %v5462_v5 = vld [vmem:[%s6953_s25 + $0x88] sm:$0xff] }
  0xca   : > { %1987 = vmatpush.bf16.msra.mxu0 %v5447_v51 }
  0xcb   : > { %v1499_v9 = vadd.f32 %v1498_v7, %v1494_v6  ;;  %2000 = vmatpush.bf16.msra.mxu1 %v5455_v52  ;;  %v5482_v7 = vld [vmem:[%s6953_s25 + $0x128] sm:$0xff] }
  0xcd   : > { %v1500_v10 = vadd.f32 %v1499_v9, %v1495_v8  ;;  %v5461_v9 = vld [vmem:[%s6953_s25 + $0x80] sm:$0xff] }
  0xce   : > { %1988 = vmatpush.bf16.msra.mxu0 %v5446_v55 }
  0xcf   : > { %1501 = vadd.xlane.f32.xlu0 %v1500_v10  ;;  %2001 = vmatpush.bf16.msra.mxu1 %v5454_v56  ;;  %v5469_v10 = vld [vmem:[%s6953_s25 + $0xc0] sm:$0xff] }
  0xd2   : > { %1989 = vmatpush.bf16.msra.mxu0 %v5445_v59 }
  0xd3   : > { %2002 = vmatpush.bf16.msra.mxu1 %v5453_v60 }
  0xd6   : > { %2034 = vmatpush.bf16.msrb.mxu0 %v5484_v63 }
  0xda   : > { %2035 = vmatpush.bf16.msrb.mxu0 %v5483_v3  ;;  %v4995_v3 = vld [vmem:[#allocation9 + $0xb0] sm:$0xf] }
  0xde   : > { %2036 = vmatpush.bf16.msrb.mxu0 %v5482_v7 }
  0xe2   : > { %2037 = vmatpush.bf16.msrb.mxu0 %v5481_v11 }
  0xe6   : > { %2038 = vmatpush.bf16.msrb.mxu0 %v5480_v13 }
  0xea   : > { %2039 = vmatpush.bf16.msrb.mxu0 %v5479_v17 }
  0xee   : > { %2040 = vmatpush.bf16.msrb.mxu0 %v5478_v20 }
  0xf2   : > { %2041 = vmatpush.bf16.msrb.mxu0 %v5477_v22 }
 0x142   : > { %v1502_v28 = vpop.xlane.xlu0 %1501 }
 0x143   : > { %v1510_v29 = vmul.f32 %v7094_v27, %v1502_v28  ;;  %v5515_v28 = vld [vmem:[#allocation9 + $0xb0] sm:$0xf0] }
 0x145   : > { %v7097_v30 = vsub.f32 %v1490_v0, %v1510_v29  ;;  %v7099_v31 = vsub.f32 %v1491_v1, %v1510_v29  ;;  %v7101_v32 = vsub.f32 %v1492_v2, %v1510_v29  ;;  %v7103_v33 = vsub.f32 %v1493_v4, %v1510_v29  ;;  %v5492_v0 = vld [vmem:[%s6953_s25 + $0x178] sm:$0xff]  ;;  %v5463_v1 = vld [vmem:[%s6953_s25 + $0x90] sm:$0xff] }
 0x146   : > { %v7109_v36 = vsub.f32 %v1494_v6, %v1510_v29  ;;  %v7113_v39 = vsub.f32 %v1495_v8, %v1510_v29  ;;  %2047 = vmatpush.bf16.msrb.mxu1 %v5492_v0  ;;  %v5471_v2 = vld [vmem:[%s6953_s25 + $0xd0] sm:$0xff]  ;;  %2013 = vmatpush.bf16.msra.mxu2 %v5463_v1  ;;  %v5470_v6 = vld [vmem:[%s6953_s25 + $0xc8] sm:$0xff] }
 0x147   : > { %v1517_v34 = vmul.f32 %v7097_v30, %v7097_v30  ;;  %v1518_v35 = vmul.f32 %v7099_v31, %v7099_v31  ;;  %v1519_v37 = vmul.f32 %v7101_v32, %v7101_v32  ;;  %v1520_v40 = vmul.f32 %v7103_v33, %v7103_v33  ;;  %v5491_v4 = vld [vmem:[%s6953_s25 + $0x170] sm:$0xff]  ;;  %2026 = vmatpush.bf16.msra.mxu3 %v5471_v2  ;;  %v5490_v8 = vld [vmem:[%s6953_s25 + $0x168] sm:$0xff]  ;;  %s7753_s25 = sld [smem:[#allocation68_spill]] }
 0x148   : > { %v1521_v42 = vmul.f32 %v7109_v36, %v7109_v36  ;;  %v1522_v44 = vmul.f32 %v7113_v39, %v7113_v39  ;;  %v5514_v29 = vld [vmem:[#allocation9 + $0xac] sm:$0xf] }
 0x149   : > { %v1523_v38 = vadd.f32 %v1518_v35, %v1517_v34  ;;  %v7161_v35 = vld [vmem:[%s6934_s11] sm:$0x3f]  ;;  %s4702_s11 = sshll.u32 %s7777_s8, 3 }
 0x14a   : > { %2048 = vmatpush.bf16.msrb.mxu1 %v5491_v4  ;;  %2014 = vmatpush.bf16.msra.mxu2 %v5462_v5  ;;  %v1550_v50 = vperm.slane %v7161_v35, 0  ;;  %v1551_v52 = vperm.slane %v7161_v35, 1  ;;  %v1552_v53 = vperm.slane %v7161_v35, 2  ;;  %v1553_v54 = vperm.slane %v7161_v35, 3  ;;  %v5516_v4 = vld [vmem:[#allocation9 + $0xb8] sm:$0xf0]  ;;  %s1470_s0 = scalar_lea.vmem %s7750_s15, %s4702_s11 }
 0x14b   : > { %v1524_v41 = vadd.f32 %v1523_v38, %v1519_v37  ;;  %2027 = vmatpush.bf16.msra.mxu3 %v5470_v6  ;;  %v4989_v38 = vld [vmem:[#allocation9 + $0xb4] sm:$0xf0] }
 0x14d   : > { %v1525_v43 = vadd.f32 %v1524_v41, %v1520_v40  ;;  %v7164_v40 = vld [vmem:[%s6944_s9] sm:$0x3f]  ;;  %v4992_v41 = vor.u32 %v5514_v29, %v4989_v38  ;;  %v5510_v29 = vld [vmem:[#allocation9 + $0x88] sm:$0xf0]  ;;  %s7289_s15 = scalar_lea.vmem %s7753_s25, %s5444_s4  ;;  %s7760_s4 = sld [smem:[#allocation72_spill]] }
 0x14e   : > { %2049 = vmatpush.bf16.msrb.mxu1 %v5490_v8  ;;  %2015 = vmatpush.bf16.msra.mxu2 %v5461_v9  ;;  %v1570_v51 = vperm.slane %v7164_v40, 0  ;;  %v1571_v56 = vperm.slane %v7164_v40, 1  ;;  %v1572_v57 = vperm.slane %v7164_v40, 2  ;;  %v1573_v58 = vperm.slane %v7164_v40, 3  ;;  %v5506_v38 = vld [vmem:[#allocation9 + $0x68] sm:$0xf0] }
 0x14f   : > { %v1526_v45 = vadd.f32 %v1525_v43, %v1521_v42  ;;  %2028 = vmatpush.bf16.msra.mxu3 %v5469_v10  ;;  %v4975_v42 = vld [vmem:[#allocation9 + $0x90] sm:$0xf]  ;;  %v5512_v43 = vld [vmem:[#allocation9 + $0x98] sm:$0xf0]  ;;  %v4996_v9 = vor.u32 %v5516_v4, %v4995_v3  ;;  %v1575_v20 = vperm.slane %v7164_v40, 5 }
 0x150   : > { %v5496_v3 = vld [vmem:[#allocation9 + $0x1c] sm:$0xf] }
 0x151   : > { %v1527_v46 = vadd.f32 %v1526_v45, %v1522_v44  ;;  %v4976_v45 = vor.u32 %v5512_v43, %v4975_v42  ;;  %v4953_v42 = vld [vmem:[#allocation9 + $0x6c] sm:$0xf0]  ;;  %v4959_v43 = vld [vmem:[#allocation9 + $0x68] sm:$0xf] }
 0x152   : > { %2050 = vmatpush.bf16.msrb.mxu1 %v5489_v12  ;;  %v4983_v12 = vld [vmem:[#allocation9 + $0x98] sm:$0xf] }
 0x153   : > { %1528 = vadd.xlane.f32.xlu0 %v1527_v46  ;;  %v5511_v46 = vld [vmem:[#allocation9 + $0x94] sm:$0xf]  ;;  %2247 = vmatpush.bf16.msrb.mxu3 %v4992_v41 }
 0x154   : > { %v4980_v48 = vor.u32 %v5511_v46, %v4977_v47  ;;  %v4939_v47 = vld [vmem:[#allocation9 + $0x48] sm:$0xf] }
 0x156   : > { %2051 = vmatpush.bf16.msrb.mxu1 %v5488_v14 }
 0x157   : > { %2248 = vmatpush.bf16.msrb.mxu3 %v4980_v48  ;;  %v5503_v48 = vld [vmem:[#allocation9 + $0x50] sm:$0xf0] }
 0x15a   : > { %2052 = vmatpush.bf16.msrb.mxu1 %v5487_v18  ;;  %v1574_v18 = vperm.slane %v7164_v40, 4  ;;  %v5505_v40 = vld [vmem:[#allocation9 + $0x64] sm:$0xf] }
 0x15e   : > { %2053 = vmatpush.bf16.msrb.mxu1 %v5486_v21 }
 0x162   : > { %2054 = vmatpush.bf16.msrb.mxu1 %v5485_v23 }
 0x1c6   : > { %v1529_v15 = vpop.xlane.xlu0 %1528 }
 0x1c7   : > { %v1530_v16 = vmul.f32 %v1529_v15, %v7094_v27  ;;  %v4987_v27 = vld [vmem:[#allocation9 + $0xa8] sm:$0xf]  ;;  %v1555_v15 = vperm.slane %v7161_v35, 5 }
 0x1c8   : > { %v4988_v37 = vor.u32 %v5515_v28, %v4987_v27  ;;  %v4965_v27 = vld [vmem:[#allocation9 + $0x84] sm:$0xf0]  ;;  %v4971_v28 = vld [vmem:[#allocation9 + $0x80] sm:$0xf] }
 0x1c9   : > { %v1531_v19 = vadd.f32 1e-05, %v1530_v16 }
 0x1ca   : > { %2234 = vmatpush.bf16.msrb.mxu2 %v4988_v37  ;;  %v4951_v37 = vld [vmem:[#allocation9 + $0x60] sm:$0xf] }
 0x1cb   : > { %5773 = vrsqrt.f32 %v1531_v19  ;;  %vm1538_vm2 = vweird.f32 %v1531_v19  ;;  %v4952_v41 = vor.u32 %v5506_v38, %v4951_v37 }
 0x1ce   : > { %2235 = vmatpush.bf16.msrb.mxu2 %v4976_v45  ;;  %v4956_v45 = vor.u32 %v5505_v40, %v4953_v42 }
 0x1d1   : > { %v5774_v24 = vpop.eup %5773 }
 0x1d2   : > { %v1533_v25 = vmul.f32 %v5774_v24, %v1531_v19  ;;  %vm1539_vm1 = vweird.f32 %v5774_v24 }
 0x1d3   : > { %vm1540_vm3 = vmor %vm1538_vm2, %vm1539_vm1 }
 0x1d4   : > { %v1534_v26 = vmul.f32 %v5774_v24, %v1533_v25  ;;  %v5509_v25 = vld [vmem:[#allocation9 + $0x80] sm:$0xf0] }
 0x1d6   : > { %v1535_v34 = vmul.f32 0.5, %v1534_v26 }
 0x1d8   : > { %v1536_v44 = vsub.f32 1.5, %v1535_v34 }
 0x1da   : > { %v1537_v49 = vmul.f32 %v5774_v24, %v1536_v44  ;;  %v5507_v44 = vld [vmem:[#allocation9 + $0x70] sm:$0xf0] }
 0x1db   : > { %v4960_v46 = vor.u32 %v5507_v44, %v4959_v43  ;;  %v7197_v44 = vld [vmem:[%s7751_s12] sm:$0x7]  ;;  %s7754_s12 = sld [smem:[#allocation56_spill]] }
 0x1dc   : > { %v1541_v55 = vsel %vm1540_vm3, %v5774_v24, %v1537_v49  ;;  %v5502_v49 = vld [vmem:[#allocation9 + $0x4c] sm:$0xf] }
 0x1dd   : > { %v1542_v59 = vmul.f32 %v1541_v55, %v7097_v30  ;;  %v1543_v60 = vmul.f32 %v1541_v55, %v7099_v31  ;;  %v1544_v61 = vmul.f32 %v1541_v55, %v7101_v32  ;;  %v1545_v62 = vmul.f32 %v1541_v55, %v7103_v33  ;;  %v5513_v32 = vld [vmem:[#allocation9 + $0xa0] sm:$0xf0] }
 0x1de   : > { %v1554_v33 = vperm.slane %v7161_v35, 4  ;;  %v1546_v13 = vmul.f32 %v1541_v55, %v7109_v36  ;;  %v1547_v14 = vmul.f32 %v1541_v55, %v7113_v39  ;;  %v4984_v16 = vor.u32 %v5513_v32, %v4983_v12  ;;  %v4963_v36 = vld [vmem:[#allocation9 + $0x78] sm:$0xf]  ;;  %v5508_v39 = vld [vmem:[#allocation9 + $0x7c] sm:$0xf] }
 0x1df   : > { %v1562_v63 = vmul.f32 %v1550_v50, %v1542_v59  ;;  %v1563_v0 = vmul.f32 %v1551_v52, %v1543_v60  ;;  %v1564_v1 = vmul.f32 %v1552_v53, %v1544_v61  ;;  %v1565_v2 = vmul.f32 %v1553_v54, %v1545_v62  ;;  %v4947_v52 = vld [vmem:[#allocation9 + $0x50] sm:$0xf]  ;;  %v5504_v53 = vld [vmem:[#allocation9 + $0x58] sm:$0xf0]  ;;  %v4929_v60 = vld [vmem:[#allocation9 + $0x3c] sm:$0xf0] }
 0x1e0   : > { %v1566_v17 = vmul.f32 %v1554_v33, %v1546_v13  ;;  %v1567_v19 = vmul.f32 %v1555_v15, %v1547_v14  ;;  %v4964_v26 = vor.u32 %v5509_v25, %v4963_v36  ;;  %v4968_v34 = vor.u32 %v5508_v39, %v4965_v27  ;;  %v4935_v61 = vld [vmem:[#allocation9 + $0x38] sm:$0xf]  ;;  %v5501_v62 = vld [vmem:[#allocation9 + $0x40] sm:$0xf0]  ;;  %v4905_v12 = vld [vmem:[#allocation9 + $0xc] sm:$0xf0] }
 0x1e1   : > { %v1582_v5 = vadd.f32 %v1570_v51, %v1562_v63  ;;  %v1583_v6 = vadd.f32 %v1571_v56, %v1563_v0  ;;  %v1584_v7 = vadd.f32 %v1572_v57, %v1564_v1  ;;  %v1585_v8 = vadd.f32 %v1573_v58, %v1565_v2  ;;  %v4941_v51 = vld [vmem:[#allocation9 + $0x54] sm:$0xf0]  ;;  %v4927_v56 = vld [vmem:[#allocation9 + $0x30] sm:$0xf]  ;;  %v5500_v57 = vld [vmem:[#allocation9 + $0x38] sm:$0xf0] }
 0x1e2   : > { %v1586_v21 = vadd.f32 %v1574_v18, %v1566_v17  ;;  %v1587_v22 = vadd.f32 %v1575_v20, %v1567_v19  ;;  %v4972_v35 = vor.u32 %v5510_v29, %v4971_v28  ;;  %2236 = vmatpush.bf16.msrb.mxu2 %v4964_v26  ;;  %2249 = vmatpush.bf16.msrb.mxu3 %v4968_v34  ;;  %v5499_v58 = vld [vmem:[#allocation9 + $0x34] sm:$0xf]  ;;  %v4915_v1 = vld [vmem:[#allocation9 + $0x18] sm:$0xf]  ;;  %v5497_v2 = vld [vmem:[#allocation9 + $0x20] sm:$0xf0] }
 0x1e3   : > { %v1588_v10 = vpack.c.bf16 %v1582_v5, %v1582_v5  ;;  %v1589_v30 = vpack.c.bf16 %v1583_v6, %v1583_v6  ;;  %v1590_v11 = vpack.c.bf16 %v1584_v7, %v1584_v7  ;;  %v1591_v31 = vpack.c.bf16 %v1585_v8, %v1585_v8  ;;  %v4917_v5 = vld [vmem:[#allocation9 + $0x24] sm:$0xf0]  ;;  %v4923_v6 = vld [vmem:[#allocation9 + $0x20] sm:$0xf]  ;;  %v5498_v7 = vld [vmem:[#allocation9 + $0x28] sm:$0xf0] }
 0x1e4   : > { %v1592_v23 = vpack.c.bf16 %v1586_v21, %v1586_v21  ;;  %v1593_v24 = vpack.c.bf16 %v1587_v22, %v1587_v22  ;;  %v4940_v50 = vor.u32 %v5503_v48, %v4939_v47  ;;  %v4944_v54 = vor.u32 %v5502_v49, %v4941_v51  ;;  %v4911_v32 = vld [vmem:[#allocation9 + $0x8] sm:$0xf]  ;;  %v5495_v33 = vld [vmem:[#allocation9 + $0x10] sm:$0xf0]  ;;  %v5761_v17 = vld [vmem:[%s1161_s28] ss:$0 sm:$0xff] }
 0x1e5   : > { %1990 = vmatmul.bf16.vlgmr.msra.gmra.mxu0 %v1588_v10  ;;  %2003 = vmatmul.bf16.vlgmr.msra.gmra.mxu1 %v1589_v30  ;;  %v4948_v55 = vor.u32 %v5504_v53, %v4947_v52  ;;  %v4928_v59 = vor.u32 %v5500_v57, %v4927_v56  ;;  %v4932_v63 = vor.u32 %v5499_v58, %v4929_v60  ;;  %v4903_v10 = vld [vmem:[#allocation9] sm:$0xf]  ;;  %v5494_v30 = vld [vmem:[#allocation9 + $0x8] sm:$0xf0]  ;;  %v6546_v47 = vmov 0.0  }
 0x1e6   : > { %2016 = vmatmul.bf16.vlgmr.msra.gmra.mxu2 %v1590_v11  ;;  %2029 = vmatmul.bf16.vlgmr.msra.gmra.mxu3 %v1591_v31  ;;  %v4936_v0 = vor.u32 %v5501_v62, %v4935_v61  ;;  %v4916_v4 = vor.u32 %v5497_v2, %v4915_v1  ;;  %v4920_v8 = vor.u32 %v5496_v3, %v4917_v5  ;;  %v5493_v11 = vld [vmem:[#allocation9 + $0x4] sm:$0xf]  ;;  %v2101_v52 = vperm.slane %v7197_v44, 1 }
 0x1e7   : > { %2260 = vmatpush.bf16.msra.mxu0 %v4996_v9  ;;  %2237 = vmatpush.bf16.msrb.mxu2 %v4952_v41  ;;  %v4924_v9 = vor.u32 %v5498_v7, %v4923_v6  ;;  %v4904_v31 = vor.u32 %v5494_v30, %v4903_v10  ;;  %v4908_v13 = vor.u32 %v5493_v11, %v4905_v12 }
 0x1e8   : > { %2250 = vmatpush.bf16.msrb.mxu3 %v4956_v45  ;;  %v4912_v14 = vor.u32 %v5495_v33, %v4911_v32  ;;  %v2102_v45 = vperm.slane %v7197_v44, 2 }
 0x1eb   : > { %2261 = vmatpush.bf16.msra.mxu0 %v4984_v16  ;;  %2238 = vmatpush.bf16.msrb.mxu2 %v4940_v50 }
 0x1ec   : > { %2251 = vmatpush.bf16.msrb.mxu3 %v4944_v54 }
 0x1ef   : > { %2262 = vmatpush.bf16.msra.mxu0 %v4972_v35  ;;  %2239 = vmatpush.bf16.msrb.mxu2 %v4928_v59  ;;  %v2063_v35 = vld [vmem:[%s1470_s0] sm:$0xff]  ;;  %v2100_v59 = vperm.slane %v7197_v44, 0  ;;  %s5443_s0 = sshll.u32 %s7779_s6, 4 }
 0x1f0   : > { %2252 = vmatpush.bf16.msrb.mxu3 %v4932_v63  ;;  %s1475_s24 = scalar_lea.vmem %s7754_s12, %s5443_s0 }
 0x1f3   : > { %2263 = vmatpush.bf16.msra.mxu0 %v4960_v46  ;;  %2240 = vmatpush.bf16.msrb.mxu2 %v4916_v4 }
 0x1f4   : > { %2253 = vmatpush.bf16.msrb.mxu3 %v4920_v8 }
 0x1f5   : > { %2042 = vmatmul.bf16.vlgmr.msrb.gmra.mxu0 %v1592_v23  ;;  %2055 = vmatmul.bf16.vlgmr.msrb.gmra.mxu1 %v1593_v24  ;;  %v2060_v24 = vlaneseq }
 0x1f7   : > { %2264 = vmatpush.bf16.msra.mxu0 %v4948_v55  ;;  %2241 = vmatpush.bf16.msrb.mxu2 %v4904_v31  ;;  %v2061_v25 = vshrl.u32 %v2060_v24, 7  ;;  %v2279_v43 = vand.u32 127, %v2060_v24 }
 0x1f8   : > { %2254 = vmatpush.bf16.msrb.mxu3 %v4908_v13 }
 0x1f9   : > { %vm2062_vm4 = vcmp.lt.s32.totalorder %v2061_v25, 4  ;;  %vm2316_vm5 = vcmp.ge.s32.totalorder %v2279_v43, 16  ;;  %vm2317_vm6 = vcmp.lt.s32.totalorder %v2279_v43, 32  ;;  %vm2497_vm7 = vcmp.ge.s32.totalorder %v2279_v43, 64 }
 0x1fa   : > { %vm2498_vm8 = vcmp.lt.s32.totalorder %v2279_v43, 80  ;;  %vm2551_vm9 = vcmp.ge.s32.totalorder %v2279_v43, 80  ;;  %vm2552_vm10 = vcmp.lt.s32.totalorder %v2279_v43, 96  ;;  %vm2318_vm11 = vmand %vm2316_vm5, %vm2317_vm6  ;;  %vm2605_vm14 = vcmp.ge.s32.totalorder %v2279_v43, 96 }
 0x1fb   : > { %2265 = vmatpush.bf16.msra.mxu0 %v4936_v0  ;;  %vm2499_vm12 = vmand %vm2497_vm7, %vm2498_vm8  ;;  %vm2606_vm15 = vcmp.lt.s32.totalorder %v2279_v43, 112  ;;  %vm2282_vm0 = vcmp.lt.s32.totalorder %v2279_v43, 16  ;;  %vm2389_vm1 = vcmp.ge.s32.totalorder %v2279_v43, 32  ;;  %vm2390_vm2 = vcmp.lt.s32.totalorder %v2279_v43, 48 }
 0x1fc   : > { %vm2553_vm13 = vmand %vm2551_vm9, %vm2552_vm10  ;;  %v7200_v48 = vsel %vm2318_vm11, 1.0, %v6546_v47  ;;  %vm2443_vm3 = vcmp.ge.s32.totalorder %v2279_v43, 48  ;;  %v7202_v50 = vsel %vm2499_vm12, 1.0, %v6546_v47  ;;  %vm2659_vm6 = vcmp.ge.s32.totalorder %v2279_v43, 112 }
 0x1fd   : > { %v7204_v51 = vsel %vm2553_vm13, 1.0, %v6546_v47  ;;  %vm2607_vm5 = vmand %vm2605_vm14, %vm2606_vm15  ;;  %v7207_v53 = vsel %vm2282_vm0, 1.0, %v6546_v47  ;;  %v7212_v56 = vsel %vm2659_vm6, 1.0, %v6546_v47  ;;  %vm2353_vm9 = vcmask 1043456  }
 0x1fe   : > { %vm2391_vm7 = vmand %vm2389_vm1, %vm2390_vm2  ;;  %v7210_v55 = vsel %vm2607_vm5, 1.0, %v6546_v47  ;;  %vm2303_vm10 = vcmask 64512   ;;  %vm3058_vm15 = vcmask 130048  }
 0x1ff   : > { %2266 = vmatpush.bf16.msra.mxu0 %v4924_v9  ;;  %v7218_v0 = vsel %vm2391_vm7, 1.0, %v6546_v47 }
 0x203   : > { %2267 = vmatpush.bf16.msra.mxu0 %v4912_v14 }
 0x262   : > { %v1991_v15 = vpop.f32.mrf.mxu0  ;;  %v2004_v16 = vpop.f32.mrf.mxu1 }
 0x263   : > { %v1992_v18 = vadd.f32 %v5761_v17, %v1991_v15 }
 0x265   : > { %v2005_v23 = vadd.f32 %v2004_v16, %v1992_v18 }
 0x269   : > { %v2017_v19 = vpop.f32.mrf.mxu2  ;;  %v2030_v20 = vpop.f32.mrf.mxu3 }
 0x26a   : > { %v1993_v21 = vpop.f32.mrf.mxu0  ;;  %v2006_v22 = vpop.f32.mrf.mxu1  ;;  %v2018_v36 = vadd.f32 %v2017_v19, %v2005_v23 }
 0x26c   : > { %v2031_v39 = vadd.f32 %v2030_v20, %v2018_v36 }
 0x271   : > { %v2019_v26 = vpop.f32.mrf.mxu2  ;;  %v2032_v27 = vpop.f32.mrf.mxu3 }
 0x272   : > { %v2043_v28 = vpop.f32.mrf.mxu0  ;;  %v2056_v29 = vpop.f32.mrf.mxu1 }
 0x273   : > { %v2044_v34 = vadd.f32 %v2043_v28, %v2031_v39 }
 0x275   : > { %v2057_v37 = vadd.f32 %v2056_v29, %v2044_v34 }
 0x277   : > { %v7190_v38 = vsel %vm2062_vm4, %v2057_v37, %v2063_v35  ;;  %vm2444_vm4 = vcmp.lt.s32.totalorder %v2279_v43, 64 }
 0x278   : > { %v2065_v40 = vpack.c.bf16 %v7190_v38, %v7190_v38  ;;  %vm2445_vm8 = vmand %vm2443_vm3, %vm2444_vm4 }
 0x279   : > { %v7220_v1 = vsel %vm2445_vm8, 1.0, %v6546_v47 }
 0x27a   : > { %v2045_v41 = vpop.f32.mrf.mxu0  ;;  %v2058_v42 = vpop.f32.mrf.mxu1  ;;  %2242 = vmatmul.bf16.vlgmr.msrb.gmra.mxu2 %v2065_v40  ;;  %2255 = vmatmul.bf16.vlgmr.msrb.gmra.mxu3 %v2065_v40 }
 0x27b   : > { %2268 = vmatmul.bf16.vlgmr.msra.gmra.mxu0 %v2065_v40 }
 0x2f8   : > { %v2269_v46 = vpop.f32.mrf.mxu0 }
 0x2f9   : > { %v2270_v49 = vadd.f32 %v2269_v46, %v2102_v45 }
 0x2fb   : > { %v2323_v54 = vmul.f32 %v7200_v48, %v2270_v49  ;;  %v2504_v57 = vmul.f32 %v7202_v50, %v2270_v49  ;;  %v2558_v58 = vmul.f32 %v7204_v51, %v2270_v49  ;;  %v2288_v62 = vmul.f32 %v7207_v53, %v2270_v49 }
 0x2fc   : > { %v2612_v4 = vmul.f32 %v7210_v55, %v2270_v49  ;;  %v2666_v5 = vmul.f32 %v7212_v56, %v2270_v49  ;;  %v2396_v17 = vmul.f32 %v7218_v0, %v2270_v49  ;;  %v2450_v18 = vmul.f32 %v7220_v1, %v2270_v49 }
 0x2fd   : > { %v2243_v60 = vpop.f32.mrf.mxu2  ;;  %v2256_v61 = vpop.f32.mrf.mxu3  ;;  %v2324_v2 = vpack.c.bf16 %v2323_v54, %v2323_v54  ;;  %v2505_v3 = vpack.c.bf16 %v2504_v57, %v2504_v57  ;;  %v2559_v10 = vpack.c.bf16 %v2558_v58, %v2558_v58  ;;  %v2289_v11 = vpack.c.bf16 %v2288_v62, %v2288_v62 }
 0x2fe   : > { %v2257_v63 = vadd.f32 %v2256_v61, %v2101_v52  ;;  %v2613_v21 = vpack.c.bf16 %v2612_v4, %v2612_v4  ;;  %v2244_v22 = vadd.f32 %v2243_v60, %v2100_v59  ;;  %v2667_v39 = vpack.c.bf16 %v2666_v5, %v2666_v5 }
 0x2ff   : > { %v7233_v19 = vsel %vm2353_vm9, %v2505_v3, 0  ;;  %v7236_v20 = vsel %vm2353_vm9, %v2559_v10, 0  ;;  %v2355_v36 = vsel %vm2353_vm9, %v2324_v2, 0  ;;  %v2374_v25 = vsel %vm2353_vm9, %v2289_v11, 0 }
 0x300   : > { %v2271_v6 = vpop.f32.mrf.mxu0  ;;  %v2286_v7 = vmul.f32 %v7207_v53, %v2257_v63  ;;  %v2321_v8 = vmul.f32 %v7200_v48, %v2257_v63  ;;  %v2394_v9 = vmul.f32 %v7218_v0, %v2257_v63  ;;  %v2448_v30 = vmul.f32 %v7220_v1, %v2257_v63 }
 0x301   : > { %v2502_v31 = vmul.f32 %v7202_v50, %v2257_v63  ;;  %v2556_v12 = vmul.f32 %v7204_v51, %v2257_v63  ;;  %v7241_v26 = vsel %vm2353_vm9, %v2613_v21, 0  ;;  %v7244_v27 = vsel %vm2353_vm9, %v2667_v39, 0 }
 0x302   : > { %v2287_v32 = vpack.c.bf16 %v2286_v7, %v2286_v7  ;;  %v2322_v33 = vpack.c.bf16 %v2321_v8, %v2321_v8  ;;  %v2395_v13 = vpack.c.bf16 %v2394_v9, %v2394_v9  ;;  %v2449_v14 = vpack.c.bf16 %v2448_v30, %v2448_v30 }
 0x303   : > { %v2503_v15 = vpack.c.bf16 %v2502_v31, %v2502_v31  ;;  %v2557_v16 = vpack.c.bf16 %v2556_v12, %v2556_v12  ;;  %v2397_v28 = vpack.c.bf16 %v2396_v17, %v2396_v17  ;;  %v2451_v29 = vpack.c.bf16 %v2450_v18, %v2450_v18 }
 0x304   : > { %2297 = vmatpush.bf16.xpose.msra.mxu1 %v2287_v32  ;;  %2332 = vmatpush.bf16.xpose.msra.mxu3 %v2322_v33  ;;  %v2610_v34 = vmul.f32 %v7210_v55, %v2257_v63  ;;  %v2664_v35 = vmul.f32 %v7212_v56, %v2257_v63  ;;  %v2280_v37 = vpack.c.bf16 %v2244_v22, %v2244_v22 }
 0x305   : > { %2405 = vmatpush.bf16.xpose.msra.mxu2 %v2395_v13  ;;  %2459 = vmatpush.bf16.xpose.msrb.mxu0 %v2449_v14  ;;  %v2245_v23 = vpop.f32.mrf.mxu2  ;;  %v2258_v24 = vpop.f32.mrf.mxu3  ;;  %v2427_v40 = vsel %vm2353_vm9, %v2397_v28, 0  ;;  %v2481_v41 = vsel %vm2353_vm9, %v2451_v29, 0 }
 0x306   : > { %v2611_v42 = vpack.c.bf16 %v2610_v34, %v2610_v34  ;;  %v2665_v43 = vpack.c.bf16 %v2664_v35, %v2664_v35 }
 0x30b   : > { %2298 = vmatmul.bf16.vlgmr.msra.gmra.mxu1 %v2280_v37  ;;  %2333 = vmatmul.bf16.vlgmr.msra.gmra.mxu3 %v2280_v37 }
 0x30c   : > { %2364 = vmatpush.bf16.msrb.mxu3 %v2355_v36  ;;  %2383 = vmatpush.bf16.msrb.mxu1 %v2374_v25 }
 0x30d   : > { %2513 = vmatpush.bf16.xpose.msrb.mxu2 %v2503_v15  ;;  %2567 = vmatpush.bf16.xpose.msra.mxu0 %v2557_v16 }
 0x30e   : > { %2406 = vmatmul.bf16.vlgmr.msra.gmra.mxu2 %v2280_v37  ;;  %2460 = vmatmul.bf16.vlgmr.msrb.gmra.mxu0 %v2280_v37 }
 0x310   : > { %2436 = vmatpush.bf16.msra.mxu3 %v2427_v40  ;;  %2490 = vmatpush.bf16.msra.mxu1 %v2481_v41 }
 0x315   : > { %2621 = vmatpush.bf16.xpose.msra.mxu2 %v2611_v42  ;;  %2675 = vmatpush.bf16.xpose.msrb.mxu0 %v2665_v43 }
 0x31e   : > { %2514 = vmatmul.bf16.vlgmr.msrb.gmra.mxu2 %v2280_v37  ;;  %2568 = vmatmul.bf16.vlgmr.msra.gmra.mxu0 %v2280_v37 }
 0x32e   : > { %2622 = vmatmul.bf16.vlgmr.msra.gmra.mxu2 %v2280_v37  ;;  %2676 = vmatmul.bf16.vlgmr.msrb.gmra.mxu0 %v2280_v37 }
 0x388   : > { %v2299_v44 = vpop.f32.mrf.mxu1 }
 0x389   : > { %v2304_v60 = vsel %vm2303_vm10, %v2299_v44, -inf }
 0x38b   : > { %v2461_v45 = vpop.f32.mrf.mxu0 }
 0x38c   : > { %v2465_v61 = vsel %vm2303_vm10, %v2461_v45, -inf }
 0x38e   : > { %v2334_v46 = vpop.f32.mrf.mxu3 }
 0x38f   : > { %v2338_v49 = vsel %vm2303_vm10, %v2334_v46, -inf }
 0x390   : > { %2339 = vmax.xlane.f32.xlu1 %v2338_v49  ;;  %v2301_v54 = vpop.f32.mrf.mxu1 }
 0x391   : > { %v2407_v47 = vpop.f32.mrf.mxu2 }
 0x392   : > { %v2411_v52 = vsel %vm2303_vm10, %v2407_v47, -inf }
 0x393   : > { %v2463_v57 = vpop.f32.mrf.mxu0  ;;  %2412 = vmax.xlane.f32.xlu2 %v2411_v52 }
 0x396   : > { %v2336_v58 = vpop.f32.mrf.mxu3 }
 0x398   : > { %2305 = vmax.xlane.f32.xlu1 %v2304_v60 }
 0x399   : > { %v2409_v59 = vpop.f32.mrf.mxu2 }
 0x39b   : > { %v2569_v62 = vpop.f32.mrf.mxu0  ;;  %2466 = vmax.xlane.f32.xlu2 %v2465_v61 }
 0x39c   : > { %v2573_v2 = vsel %vm2303_vm10, %v2569_v62, -inf }
 0x3a0   : > { %2574 = vmax.xlane.f32.xlu1 %v2573_v2 }
 0x3a1   : > { %v2515_v63 = vpop.f32.mrf.mxu2 }
 0x3a2   : > { %v2519_v3 = vsel %vm2303_vm10, %v2515_v63, -inf }
 0x3a3   : > { %v2571_v4 = vpop.f32.mrf.mxu0  ;;  %2520 = vmax.xlane.f32.xlu0 %v2519_v3 }
 0x3a9   : > { %v2517_v5 = vpop.f32.mrf.mxu2 }
 0x3ab   : > { %v2677_v6 = vpop.f32.mrf.mxu0 }
 0x3ac   : > { %v2681_v7 = vsel %vm2303_vm10, %v2677_v6, -inf }
 0x3ad   : > { %2682 = vmax.xlane.f32.xlu1 %v2681_v7 }
 0x3b1   : > { %v2623_v8 = vpop.f32.mrf.mxu2 }
 0x3b2   : > { %v2627_v9 = vsel %vm2303_vm10, %v2623_v8, -inf }
 0x3b3   : > { %v2679_v10 = vpop.f32.mrf.mxu0  ;;  %2628 = vmax.xlane.f32.xlu2 %v2627_v9 }
 0x3b9   : > { %v2625_v30 = vpop.f32.mrf.mxu2 }
 0x403   : > { %v2340_v11 = vpop.xlane.xlu1 %2339 }
 0x404   : > { %v2341_v12 = vsub.f32 %v2334_v46, %v2340_v11 }
 0x406   : > { %v2413_v31 = vpop.xlane.xlu2 %2412  ;;  %v2342_v33 = vmul.f32 1.442695, %v2341_v12 }
 0x407   : > { %v2414_v32 = vsub.f32 %v2407_v47, %v2413_v31 }
 0x408   : > { %5775 = vpow2.f32 %v2342_v33 }
 0x409   : > { %v2415_v13 = vmul.f32 1.442695, %v2414_v32 }
 0x40b   : > { %v2306_v14 = vpop.xlane.xlu1 %2305  ;;  %5777 = vpow2.f32 %v2415_v13 }
 0x40c   : > { %v2307_v16 = vsub.f32 %v2299_v44, %v2306_v14 }
 0x40e   : > { %v2467_v15 = vpop.xlane.xlu2 %2466  ;;  %v5776_v18 = vpop.eup %5775  ;;  %v2308_v21 = vmul.f32 1.442695, %v2307_v16 }
 0x40f   : > { %v2468_v17 = vsub.f32 %v2461_v45, %v2467_v15  ;;  %v2344_v23 = vsel %vm2303_vm10, %v5776_v18, 0.0 }
 0x410   : > { %5779 = vpow2.f32 %v2308_v21  ;;  %2345 = vadd.xlane.f32.xlu0 %v2344_v23 }
 0x411   : > { %v2469_v22 = vmul.f32 1.442695, %v2468_v17  ;;  %v5778_v36 = vpop.eup %5777 }
 0x412   : > { %v2417_v40 = vsel %vm2303_vm10, %v5778_v36, 0.0 }
 0x413   : > { %5781 = vpow2.f32 %v2469_v22  ;;  %v2575_v24 = vpop.xlane.xlu1 %2574 }
 0x414   : > { %v2576_v39 = vsub.f32 %v2569_v62, %v2575_v24 }
 0x416   : > { %v2521_v25 = vpop.xlane.xlu0 %2520  ;;  %v5780_v29 = vpop.eup %5779  ;;  %v2577_v34 = vmul.f32 1.442695, %v2576_v39  ;;  %v5524_v39 = vld [vmem:[#allocation10 + $0x38] sm:$0xff] }
 0x417   : > { %v2522_v28 = vsub.f32 %v2515_v63, %v2521_v25  ;;  %v2310_v41 = vsel %vm2303_vm10, %v5780_v29, 0.0  ;;  %2778 = vmatpush.bf16.msrb.mxu2 %v5524_v39 }
 0x418   : > { %5783 = vpow2.f32 %v2577_v34  ;;  %2418 = vadd.xlane.f32.xlu0 %v2417_v40  ;;  %2311 = vadd.xlane.f32.xlu2 %v2310_v41  ;;  %v5522_v34 = vld [vmem:[#allocation10 + $0x28] sm:$0xff]  ;;  %v5520_v41 = vld [vmem:[#allocation10 + $0x18] sm:$0xff] }
 0x419   : > { %v5782_v35 = vpop.eup %5781  ;;  %v2523_v37 = vmul.f32 1.442695, %v2522_v28  ;;  %v5523_v28 = vld [vmem:[#allocation10 + $0x30] sm:$0xff] }
 0x41a   : > { %v2471_v42 = vsel %vm2303_vm10, %v5782_v35, 0.0 }
 0x41b   : > { %5785 = vpow2.f32 %v2523_v37  ;;  %2472 = vadd.xlane.f32.xlu1 %v2471_v42  ;;  %2779 = vmatpush.bf16.msrb.mxu2 %v5523_v28  ;;  %v5521_v37 = vld [vmem:[#allocation10 + $0x20] sm:$0xff] }
 0x41c   : > { %v5079_v28 = vld [vmem:[%s7289_s15 + $0x40] sm:$0xf] }
 0x41e   : > { %v5784_v43 = vpop.eup %5783 }
 0x41f   : > { %v2579_v47 = vsel %vm2303_vm10, %v5784_v43, 0.0  ;;  %2780 = vmatpush.bf16.msrb.mxu2 %v5522_v34 }
 0x420   : > { %v2683_v44 = vpop.xlane.xlu1 %2682  ;;  %2580 = vadd.xlane.f32.xlu0 %v2579_v47  ;;  %v5517_v47 = vld [vmem:[#allocation10] sm:$0xff] }
 0x421   : > { %v5786_v45 = vpop.eup %5785  ;;  %v2684_v46 = vsub.f32 %v2677_v6, %v2683_v44 }
 0x422   : > { %v2525_v49 = vsel %vm2303_vm10, %v5786_v45, 0.0 }
 0x423   : > { %v2685_v52 = vmul.f32 1.442695, %v2684_v46  ;;  %2526 = vadd.xlane.f32.xlu2 %v2525_v49  ;;  %2781 = vmatpush.bf16.msrb.mxu2 %v5521_v37  ;;  %v5081_v37 = vld [vmem:[%s7289_s15 + $0x48] sm:$0xf0] }
 0x425   : > { %5787 = vpow2.f32 %v2685_v52 }
 0x426   : > { %v2629_v54 = vpop.xlane.xlu2 %2628 }
 0x427   : > { %v2630_v57 = vsub.f32 %v2623_v8, %v2629_v54  ;;  %2782 = vmatpush.bf16.msrb.mxu2 %v5520_v41 }
 0x429   : > { %v2631_v58 = vmul.f32 1.442695, %v2630_v57 }
 0x42b   : > { %v5788_v59 = vpop.eup %5787  ;;  %5789 = vpow2.f32 %v2631_v58 }
 0x42c   : > { %v2687_v60 = vsel %vm2303_vm10, %v5788_v59, 0.0 }
 0x42d   : > { %2688 = vadd.xlane.f32.xlu2 %v2687_v60 }
 0x431   : > { %v5790_v61 = vpop.eup %5789 }
 0x432   : > { %v2633_v62 = vsel %vm2303_vm10, %v5790_v61, 0.0 }
 0x433   : > { %2634 = vadd.xlane.f32.xlu1 %v2633_v62 }
 0x483   : > { %v2346_v63 = vpop.xlane.xlu0 %2345 }
 0x484   : > { %5791 = vrcp.f32 %v2346_v63 }
 0x48a   : > { %v5792_v2 = vpop.eup %5791 }
 0x48b   : > { %v2348_v3 = vmul.f32 %v5792_v2, %v5776_v18  ;;  %v2312_v4 = vpop.xlane.xlu2 %2311  ;;  %v2419_v6 = vpop.xlane.xlu0 %2418 }
 0x48c   : > { %5793 = vrcp.f32 %v2312_v4 }
 0x48d   : > { %v2349_v5 = vpack.c.bf16 %v2348_v3, %v2348_v3  ;;  %5795 = vrcp.f32 %v2419_v6 }
 0x48e   : > { %v2473_v30 = vpop.xlane.xlu1 %2472 }
 0x48f   : > { %4999 = vmatmul.msk.bf16.vlgmr.msrb.gmra.mxu3 %vm2303_vm10, %v2349_v5  ;;  %5797 = vrcp.f32 %v2473_v30 }
 0x490   : > { %2544 = vmatpush.bf16.msrb.mxu3 %v7233_v19 }
 0x492   : > { %v5794_v7 = vpop.eup %5793 }
 0x493   : > { %v2314_v8 = vmul.f32 %v5794_v7, %v5780_v29  ;;  %v5796_v9 = vpop.eup %5795  ;;  %v2581_v14 = vpop.xlane.xlu0 %2580 }
 0x494   : > { %v2421_v11 = vmul.f32 %v5796_v9, %v5778_v36 }
 0x495   : > { %v2315_v10 = vpack.c.bf16 %v2314_v8, %v2314_v8  ;;  %v5798_v32 = vpop.eup %5797 }
 0x496   : > { %v2422_v31 = vpack.c.bf16 %v2421_v11, %v2421_v11  ;;  %v2527_v12 = vpop.xlane.xlu2 %2526  ;;  %v2475_v19 = vmul.f32 %v5798_v32, %v5782_v35  ;;  %v5103_v32 = vld [vmem:[%s7289_s15 + $0x70] sm:$0xf] }
 0x497   : > { %5000 = vmatmul.msk.bf16.vlgmr.msrb.gmra.mxu1 %vm2303_vm10, %v2315_v10  ;;  %5799 = vrcp.f32 %v2527_v12  ;;  %v5762_v10 = vld [vmem:[%s7752_s14] ss:$0 sm:$0xff] }
 0x498   : > { %2598 = vmatpush.bf16.msrb.mxu1 %v7236_v20  ;;  %v2476_v13 = vpack.c.bf16 %v2475_v19, %v2475_v19  ;;  %5801 = vrcp.f32 %v2581_v14  ;;  %v2277_v30 = vadd.f32 %v5762_v10, %v7190_v38  ;;  %v6547_v38 = vmov 128.0   ;;  %v5540_v19 = vld [vmem:[%s7289_s15 + $0x74] sm:$0xf0]  ;;  %v5538_v14 = vld [vmem:[%s7289_s15 + $0x64] sm:$0xf0] }
 0x49d   : > { %v5800_v33 = vpop.eup %5799 }
 0x49e   : > { %v2529_v15 = vmul.f32 %v5800_v33, %v5786_v45  ;;  %v5802_v17 = vpop.eup %5801  ;;  %v5518_v45 = vld [vmem:[#allocation10 + $0x8] sm:$0xff] }
 0x49f   : > { %5002 = vmatmul.msk.bf16.vlgmr.msra.gmra.mxu3 %vm2303_vm10, %v2422_v31  ;;  %v2583_v18 = vmul.f32 %v5802_v17, %v5784_v43  ;;  %v5519_v43 = vld [vmem:[#allocation10 + $0x10] sm:$0xff]  ;;  %v5095_v33 = vld [vmem:[%s7289_s15 + $0x60] sm:$0xf]  ;;  %v5537_v17 = vld [vmem:[%s7289_s15 + $0x64] sm:$0xf] }
 0x4a0   : > { %2652 = vmatpush.bf16.msra.mxu3 %v7241_v26  ;;  %v2530_v16 = vpack.c.bf16 %v2529_v15, %v2529_v15  ;;  %v2689_v26 = vpop.xlane.xlu2 %2688  ;;  %2783 = vmatpush.bf16.msrb.mxu2 %v5519_v43  ;;  %v5539_v15 = vld [vmem:[%s7289_s15 + $0x74] sm:$0xf]  ;;  %v5071_v43 = vld [vmem:[%s7289_s15 + $0x30] sm:$0xf] }
 0x4a1   : > { %v2584_v22 = vpack.c.bf16 %v2583_v18, %v2583_v18  ;;  %v5096_v18 = vor.u32 %v5538_v14, %v5095_v33  ;;  %v5525_v14 = vld [vmem:[%s7289_s15 + $0x4] sm:$0xf] }
 0x4a4   : > { %2784 = vmatpush.bf16.msrb.mxu2 %v5518_v45 }
 0x4a6   : > { %v2635_v20 = vpop.xlane.xlu1 %2634 }
 0x4a7   : > { %5004 = vmatmul.msk.bf16.vlgmr.msra.gmra.mxu1 %vm2303_vm10, %v2476_v13  ;;  %5803 = vrcp.f32 %v2635_v20  ;;  %v5104_v13 = vor.u32 %v5540_v19, %v5103_v32  ;;  %v2829_v32 = vld [vmem:[%s1475_s24 + $0x8] sm:$0xff] }
 0x4a8   : > { %2706 = vmatpush.bf16.msra.mxu1 %v7244_v27  ;;  %5805 = vrcp.f32 %v2689_v26  ;;  %2785 = vmatpush.bf16.msrb.mxu2 %v5517_v47  ;;  %v5087_v26 = vld [vmem:[%s7289_s15 + $0x50] sm:$0xf]  ;;  %v5073_v47 = vld [vmem:[%s7289_s15 + $0x38] sm:$0xf0] }
 0x4a9   : > { %5807 = vrcp.f32 %v6547_v38  ;;  %v2828_v38 = vld [vmem:[%s1475_s24] sm:$0xff] }
 0x4ad   : > { %v5804_v21 = vpop.eup %5803 }
 0x4ae   : > { %v2637_v23 = vmul.f32 %v5804_v21, %v5790_v61  ;;  %v5806_v36 = vpop.eup %5805  ;;  %v5097_v21 = vld [vmem:[%s7289_s15 + $0x68] sm:$0xf0] }
 0x4af   : > { %5006 = vmatmul.msk.bf16.vlgmr.msrb.gmra.mxu3 %vm2303_vm10, %v2530_v16  ;;  %v2691_v25 = vmul.f32 %v5806_v36, %v5788_v59  ;;  %v5105_v16 = vld [vmem:[%s7289_s15 + $0x78] sm:$0xf0]  ;;  %v5535_v36 = vld [vmem:[%s7289_s15 + $0x54] sm:$0xf] }
 0x4b0   : > { %v2638_v24 = vpack.c.bf16 %v2637_v23, %v2637_v23  ;;  %v5108_v20 = vor.u32 %v5539_v15, %v5105_v16  ;;  %2927 = vmatpush.bf16.msrb.mxu3 %v5104_v13  ;;  %v5536_v23 = vld [vmem:[%s7289_s15 + $0x54] sm:$0xf0]  ;;  %v2830_v13 = vpack.c.bf16 %v2829_v32, %v2828_v38  ;;  %v5049_v15 = vld [vmem:[%s7289_s15 + $0x8] sm:$0xf0] }
 0x4b1   : > { %v2692_v27 = vpack.c.bf16 %v2691_v25, %v2691_v25  ;;  %v5089_v25 = vld [vmem:[%s7289_s15 + $0x58] sm:$0xf0]  ;;  %v5088_v39 = vor.u32 %v5536_v23, %v5087_v26  ;;  %v5052_v16 = vor.u32 %v5525_v14, %v5049_v15 }
 0x4b2   : > { %2941 = vmatpush.bf16.msra.mxu0 %v5108_v20  ;;  %v5092_v34 = vor.u32 %v5535_v36, %v5089_v25  ;;  %v5547_v20 = vld [vmem:[%s6987_s23 + $0x30] sm:$0xff]  ;;  %v5541_v23 = vld [vmem:[%s6987_s23] sm:$0xff] }
 0x4b4   : > { %2928 = vmatpush.bf16.msrb.mxu3 %v5096_v18  ;;  %v5544_v18 = vld [vmem:[%s6987_s23 + $0x18] sm:$0xff] }
 0x4b7   : > { %5008 = vmatmul.msk.bf16.vlgmr.msrb.gmra.mxu1 %vm2303_vm10, %v2584_v22  ;;  %v5808_v22 = vpop.eup %5807 }
 0x4b8   : > { %2929 = vmatpush.bf16.msrb.mxu3 %v5088_v39  ;;  %vm2798_vm11 = vweird.f32 %v5808_v22 }
 0x4bf   : > { %5010 = vmatmul.msk.bf16.vlgmr.msra.gmra.mxu3 %vm2303_vm10, %v2638_v24  ;;  %v5100_v24 = vor.u32 %v5537_v17, %v5097_v21  ;;  %v5546_v17 = vld [vmem:[%s6987_s23 + $0x28] sm:$0xff]  ;;  %v5543_v21 = vld [vmem:[%s6987_s23 + $0x10] sm:$0xff] }
 0x4c1   : > { %2942 = vmatpush.bf16.msra.mxu0 %v5100_v24 }
 0x4c5   : > { %2943 = vmatpush.bf16.msra.mxu0 %v5092_v34 }
 0x4c7   : > { %5012 = vmatmul.msk.bf16.vlgmr.msra.gmra.mxu1 %vm2303_vm10, %v2692_v27  ;;  %v2794_v27 = vmul.f32 128.0, %v5808_v22 }
 0x4c9   : > { %v2795_v41 = vsub.f32 1.0, %v2794_v27 }
 0x512   : > { %v2366_v29 = vpop.f32.mrf.mxu3 }
 0x514   : > { %v2385_v35 = vpop.f32.mrf.mxu1 }
 0x515   : > { %v2386_v57 = vadd.f32 %v2385_v35, %v2366_v29  ;;  %v5534_v29 = vld [vmem:[%s7289_s15 + $0x44] sm:$0xf0]  ;;  %v5533_v35 = vld [vmem:[%s7289_s15 + $0x44] sm:$0xf] }
 0x516   : > { %v5084_v45 = vor.u32 %v5533_v35, %v5081_v37  ;;  %v5763_v35 = vld [vmem:[%s1180_s7] ss:$0 sm:$0xff]  ;;  %s7755_s7 = scalar_lea.vmem [#allocation17], %s6929_s3 }
 0x518   : > { %2944 = vmatpush.bf16.msra.mxu0 %v5084_v45 }
 0x51a   : > { %v2368_v40 = vpop.f32.mrf.mxu3 }
 0x51b   : > { %v5548_v40 = vld [vmem:[%s6987_s23 + $0x38] sm:$0xff] }
 0x51c   : > { %v2387_v42 = vpop.f32.mrf.mxu1  ;;  %3020 = vmatpush.bf16.msrb.mxu1 %v5548_v40 }
 0x51d   : > { %v5080_v42 = vor.u32 %v5534_v29, %v5079_v28 }
 0x51f   : > { %2930 = vmatpush.bf16.msrb.mxu3 %v5080_v42 }
 0x520   : > { %3021 = vmatpush.bf16.msrb.mxu1 %v5547_v20 }
 0x522   : > { %v2438_v44 = vpop.f32.mrf.mxu3 }
 0x523   : > { %v2442_v59 = vadd.f32 %v2438_v44, %v2386_v57  ;;  %v5532_v44 = vld [vmem:[%s7289_s15 + $0x34] sm:$0xf0]  ;;  %v5530_v57 = vld [vmem:[%s7289_s15 + $0x24] sm:$0xf0] }
 0x524   : > { %v2492_v46 = vpop.f32.mrf.mxu1  ;;  %3022 = vmatpush.bf16.msrb.mxu1 %v5546_v17 }
 0x525   : > { %v2496_v61 = vadd.f32 %v2492_v46, %v2442_v59  ;;  %v5531_v46 = vld [vmem:[%s7289_s15 + $0x34] sm:$0xf]  ;;  %v5529_v59 = vld [vmem:[%s7289_s15 + $0x24] sm:$0xf] }
 0x52a   : > { %v2440_v49 = vpop.f32.mrf.mxu3 }
 0x52b   : > { %v2796_v49 = vmul.f32 %v5808_v22, %v2795_v41  ;;  %v5764_v41 = vld [vmem:[%s1189_s10] ss:$0 sm:$0xff]  ;;  %s7756_s10 = scalar_lea.vmem [#allocation18], %s6929_s3 }
 0x52c   : > { %v2494_v52 = vpop.f32.mrf.mxu1 }
 0x52d   : > { %v5072_v52 = vor.u32 %v5532_v44, %v5071_v43 }
 0x52f   : > { %2931 = vmatpush.bf16.msrb.mxu3 %v5072_v52 }
 0x532   : > { %v2546_v54 = vpop.f32.mrf.mxu3 }
 0x533   : > { %v2550_v62 = vadd.f32 %v2546_v54, %v2496_v61  ;;  %v5063_v54 = vld [vmem:[%s7289_s15 + $0x20] sm:$0xf]  ;;  %v2797_v61 = vadd.f32 %v5808_v22, %v2796_v49 }
 0x534   : > { %v2600_v58 = vpop.f32.mrf.mxu1 }
 0x535   : > { %v2604_v2 = vadd.f32 %v2600_v58, %v2550_v62  ;;  %v5076_v58 = vor.u32 %v5531_v46, %v5073_v47  ;;  %v5064_v62 = vor.u32 %v5530_v57, %v5063_v54 }
 0x537   : > { %2945 = vmatpush.bf16.msra.mxu0 %v5076_v58  ;;  %2932 = vmatpush.bf16.msrb.mxu3 %v5064_v62 }
 0x53a   : > { %v2548_v60 = vpop.f32.mrf.mxu3 }
 0x53b   : > { %v5065_v60 = vld [vmem:[%s7289_s15 + $0x28] sm:$0xf0] }
 0x53c   : > { %v2602_v63 = vpop.f32.mrf.mxu1 }
 0x53d   : > { %v5055_v63 = vld [vmem:[%s7289_s15 + $0x10] sm:$0xf] }
 0x542   : > { %v2654_v3 = vpop.f32.mrf.mxu3 }
 0x543   : > { %v2658_v4 = vadd.f32 %v2654_v3, %v2604_v2  ;;  %v5528_v2 = vld [vmem:[%s7289_s15 + $0x14] sm:$0xf0]  ;;  %v5068_v3 = vor.u32 %v5529_v59, %v5065_v60 }
 0x544   : > { %v2708_v5 = vpop.f32.mrf.mxu1 }
 0x545   : > { %v2712_v6 = vadd.f32 %v2708_v5, %v2658_v4  ;;  %v5527_v4 = vld [vmem:[%s7289_s15 + $0x14] sm:$0xf]  ;;  %v5057_v5 = vld [vmem:[%s7289_s15 + $0x18] sm:$0xf0]  ;;  %2946 = vmatpush.bf16.msra.mxu0 %v5068_v3 }
 0x546   : > { %v5060_v10 = vor.u32 %v5527_v4, %v5057_v5 }
 0x547   : > { %v2713_v7 = vpack.c.bf16 %v2712_v6, %v2712_v6  ;;  %v7321_v6 = vsel %vm2798_vm11, %v5808_v22, %v2797_v61  ;;  %v5542_v22 = vld [vmem:[%s6987_s23 + $0x8] sm:$0xff] }
 0x549   : > { %2786 = vmatmul.bf16.vlgmr.msrb.gmra.mxu2 %v2713_v7  ;;  %v5056_v7 = vor.u32 %v5528_v2, %v5055_v63  ;;  %2947 = vmatpush.bf16.msra.mxu0 %v5060_v10 }
 0x54a   : > { %v2656_v8 = vpop.f32.mrf.mxu3 }
 0x54b   : > { %v5047_v8 = vld [vmem:[%s7289_s15] sm:$0xf]  ;;  %2933 = vmatpush.bf16.msrb.mxu3 %v5056_v7 }
 0x54c   : > { %v2710_v9 = vpop.f32.mrf.mxu1 }
 0x54d   : > { %v5526_v9 = vld [vmem:[%s7289_s15 + $0x4] sm:$0xf0]  ;;  %2948 = vmatpush.bf16.msra.mxu0 %v5052_v16 }
 0x550   : > { %2949 = vmatmul.bf16.vlgmr.msra.gmra.mxu0 %v2830_v13 }
 0x5cc   : > { %v2787_v11 = vpop.f32.mrf.mxu2 }
 0x5cd   : > { %v7282_v31 = vadd.f32 %v2787_v11, %v2277_v30  ;;  %v7364_v62 = vpop.f32.mrf.mxu0 }
 0x5ce   : > { %v3074_v3 = vmul.f32 %v7200_v48, %v7364_v62 }
 0x5cf   : > { %2791 = vadd.xlane.f32.xlu0 %v7282_v31 }
 0x5d4   : > { %v2789_v12 = vpop.f32.mrf.mxu2 }
 0x5d5   : > { %v5048_v12 = vor.u32 %v5526_v9, %v5047_v8  ;;  %v7372_v4 = vpop.f32.mrf.mxu0 }
 0x5d6   : > { %v3075_v5 = vmul.f32 %v7200_v48, %v7372_v4 }
 0x5d7   : > { %2934 = vmatpush.bf16.msrb.mxu3 %v5048_v12 }
 0x5d8   : > { %v3076_v8 = vpack.c.bf16 %v3075_v5, %v3074_v3 }
 0x5da   : > { %2935 = vmatmul.bf16.vlgmr.msrb.gmra.mxu3 %v2830_v13  ;;  %3112 = vmatpush.bf16.msrb.mxu0 %v3076_v8 }
 0x642   : > { %v2792_v30 = vpop.xlane.xlu0 %2791 }
 0x643   : > { %v2800_v11 = vmul.f32 %v7321_v6, %v2792_v30 }
 0x645   : > { %v2801_v19 = vsub.f32 %v7282_v31, %v2800_v11  ;;  %v5545_v31 = vld [vmem:[%s6987_s23 + $0x20] sm:$0xff]  ;;  %s7757_s23 = scalar_lea.vmem [#allocation22], %s6929_s3 }
 0x646   : > { %3023 = vmatpush.bf16.msrb.mxu1 %v5545_v31 }
 0x647   : > { %v2802_v33 = vmul.f32 %v2801_v19, %v2801_v19 }
 0x649   : > { %2803 = vadd.xlane.f32.xlu1 %v2802_v33 }
 0x64a   : > { %3024 = vmatpush.bf16.msrb.mxu1 %v5544_v18 }
 0x64e   : > { %3025 = vmatpush.bf16.msrb.mxu1 %v5543_v21 }
 0x652   : > { %3026 = vmatpush.bf16.msrb.mxu1 %v5542_v22 }
 0x656   : > { %3027 = vmatpush.bf16.msrb.mxu1 %v5541_v23 }
 0x65d   : > { %v7348_v45 = vpop.f32.mrf.mxu3 }
 0x65e   : > { %v3039_v47 = vmul.f32 %v7207_v53, %v7348_v45  ;;  %v3071_v54 = vmul.f32 %v7200_v48, %v7348_v45  ;;  %v3134_v58 = vmul.f32 %v7218_v0, %v7348_v45  ;;  %v3182_v63 = vmul.f32 %v7220_v1, %v7348_v45 }
 0x65f   : > { %v3230_v9 = vmul.f32 %v7202_v50, %v7348_v45  ;;  %v3326_v38 = vmul.f32 %v7210_v55, %v7348_v45 }
 0x665   : > { %v7350_v46 = vpop.f32.mrf.mxu3 }
 0x666   : > { %v3040_v49 = vmul.f32 %v7207_v53, %v7350_v46  ;;  %v3072_v57 = vmul.f32 %v7200_v48, %v7350_v46  ;;  %v3135_v59 = vmul.f32 %v7218_v0, %v7350_v46  ;;  %v3183_v2 = vmul.f32 %v7220_v1, %v7350_v46 }
 0x667   : > { %v3231_v10 = vmul.f32 %v7202_v50, %v7350_v46  ;;  %v3327_v32 = vmul.f32 %v7210_v55, %v7350_v46 }
 0x668   : > { %v3041_v52 = vpack.c.bf16 %v3040_v49, %v3039_v47  ;;  %v3073_v60 = vpack.c.bf16 %v3072_v57, %v3071_v54  ;;  %v3136_v61 = vpack.c.bf16 %v3135_v59, %v3134_v58  ;;  %v3184_v7 = vpack.c.bf16 %v3183_v2, %v3182_v63 }
 0x669   : > { %v3232_v12 = vpack.c.bf16 %v3231_v10, %v3230_v9  ;;  %v3278_v54 = vmul.f32 %v7204_v51, %v7348_v45 }
 0x66a   : > { %3052 = vmatpush.bf16.xpose.msra.mxu2 %v3041_v52  ;;  %3084 = vmatpush.bf16.xpose.msra.mxu3 %v3073_v60  ;;  %v3374_v60 = vmul.f32 %v7212_v56, %v7348_v45 }
 0x66b   : > { %3195 = vmatpush.bf16.xpose.msra.mxu0 %v3184_v7 }
 0x672   : > { %3147 = vmatpush.bf16.xpose.msrb.mxu2 %v3136_v61  ;;  %v3375_v61 = vmul.f32 %v7212_v56, %v7350_v46 }
 0x674   : > { %v3376_v63 = vpack.c.bf16 %v3375_v61, %v3374_v60 }
 0x6bc   : > { %v2804_v26 = vpop.xlane.xlu1 %2803 }
 0x6bd   : > { %v2805_v24 = vmul.f32 %v2804_v26, %v7321_v6 }
 0x6bf   : > { %v2806_v36 = vadd.f32 1e-05, %v2805_v24 }
 0x6c1   : > { %5809 = vrsqrt.f32 %v2806_v36  ;;  %vm2813_vm13 = vweird.f32 %v2806_v36 }
 0x6c7   : > { %v5810_v25 = vpop.eup %5809 }
 0x6c8   : > { %v2808_v27 = vmul.f32 %v5810_v25, %v2806_v36  ;;  %vm2814_vm12 = vweird.f32 %v5810_v25 }
 0x6c9   : > { %vm2815_vm14 = vmor %vm2813_vm13, %vm2814_vm12 }
 0x6ca   : > { %v2809_v39 = vmul.f32 %v5810_v25, %v2808_v27 }
 0x6cc   : > { %v2810_v28 = vmul.f32 0.5, %v2809_v39  ;;  %v3042_v39 = vmul.f32 %v7207_v53, %v7364_v62 }
 0x6ce   : > { %v2811_v29 = vsub.f32 1.5, %v2810_v28  ;;  %v3043_v28 = vmul.f32 %v7207_v53, %v7372_v4 }
 0x6d0   : > { %v2812_v34 = vmul.f32 %v5810_v25, %v2811_v29  ;;  %v3137_v29 = vmul.f32 %v7218_v0, %v7364_v62 }
 0x6d2   : > { %v2816_v37 = vsel %vm2815_vm14, %v5810_v25, %v2812_v34  ;;  %v3138_v34 = vmul.f32 %v7218_v0, %v7372_v4 }
 0x6d3   : > { %v2817_v40 = vmul.f32 %v2816_v37, %v2801_v19  ;;  %v3328_v19 = vpack.c.bf16 %v3327_v32, %v3326_v38  ;;  %v3186_v37 = vmul.f32 %v7220_v1, %v7372_v4 }
 0x6d4   : > { %v3139_v53 = vpack.c.bf16 %v3138_v34, %v3137_v29 }
 0x6d5   : > { %v2822_v42 = vmul.f32 %v5763_v35, %v2817_v40  ;;  %v3185_v35 = vmul.f32 %v7220_v1, %v7364_v62  ;;  %v3044_v40 = vpack.c.bf16 %v3043_v28, %v3042_v39 }
 0x6d6   : > { %3175 = vmatpush.bf16.msrb.mxu3 %v3139_v53 }
 0x6d7   : > { %v7344_v43 = vadd.f32 %v5764_v41, %v2822_v42  ;;  %v3233_v41 = vmul.f32 %v7202_v50, %v7364_v62  ;;  %v3234_v42 = vmul.f32 %v7202_v50, %v7372_v4  ;;  %3128 = vmatpush.bf16.msra.mxu1 %v3044_v40  ;;  %v3279_v50 = vmul.f32 %v7204_v51, %v7350_v46 }
 0x6d9   : > { %v2955_v44 = vpack.c.bf16 %v7344_v43, %v7344_v43  ;;  %v3235_v47 = vpack.c.bf16 %v3234_v42, %v3233_v41  ;;  %v3280_v59 = vpack.c.bf16 %v3279_v50, %v3278_v54 }
 0x6db   : > { %3028 = vmatmul.bf16.vlgmr.msrb.gmra.mxu1 %v2955_v44  ;;  %v3187_v44 = vpack.c.bf16 %v3186_v37, %v3185_v35 }
 0x6dd   : > { %3223 = vmatpush.bf16.msrb.mxu1 %v3187_v44  ;;  %v3330_v44 = vmul.f32 %v7210_v55, %v7372_v4 }
 0x758   : > { %v3029_v30 = vpop.f32.mrf.mxu1 }
 0x759   : > { %v7380_v11 = vpack.c.bf16 %v3029_v30, %v3029_v30 }
 0x75b   : > { %3053 = vmatmul.bf16.vlgmr.msra.gmra.mxu2 %v7380_v11  ;;  %3085 = vmatmul.bf16.vlgmr.msra.gmra.mxu3 %v7380_v11 }
 0x75c   : > { %3243 = vmatpush.bf16.xpose.msra.mxu2 %v3232_v12  ;;  %3271 = vmatpush.bf16.msra.mxu3 %v3235_v47 }
 0x760   : > { %v3031_v48 = vpop.f32.mrf.mxu1 }
 0x76b   : > { %3148 = vmatmul.bf16.vlgmr.msrb.gmra.mxu2 %v7380_v11 }
 0x76c   : > { %3339 = vmatpush.bf16.xpose.msrb.mxu2 %v3328_v19 }
 0x77b   : > { %3244 = vmatmul.bf16.vlgmr.msra.gmra.mxu2 %v7380_v11 }
 0x78b   : > { %3340 = vmatmul.bf16.vlgmr.msrb.gmra.mxu2 %v7380_v11 }
 0x7de   : > { %v7391_v33 = vpop.f32.mrf.mxu2  ;;  %v3086_v13 = vpop.f32.mrf.mxu3 }
 0x7df   : > { %v3090_v14 = vsel %vm3058_vm15, %v3086_v13, -inf  ;;  %v3059_v15 = vsel %vm3058_vm15, %v7391_v33, -inf }
 0x7e0   : > { %3091 = vmax.xlane.f32.xlu2 %v3090_v14  ;;  %3060 = vmax.xlane.f32.xlu1 %v3059_v15 }
 0x7e6   : > { %v3056_v16 = vpop.f32.mrf.mxu2  ;;  %v3088_v20 = vpop.f32.mrf.mxu3 }
 0x7ee   : > { %v3149_v17 = vpop.f32.mrf.mxu2 }
 0x7ef   : > { %v3153_v31 = vsel %vm3058_vm15, %v3149_v17, -inf }
 0x7f0   : > { %3154 = vmax.xlane.f32.xlu2 %v3153_v31 }
 0x7f6   : > { %v3151_v18 = vpop.f32.mrf.mxu2 }
 0x7fe   : > { %v7397_v21 = vpop.f32.mrf.mxu2 }
 0x7ff   : > { %v3249_v22 = vsel %vm3058_vm15, %v7397_v21, -inf }
 0x800   : > { %3250 = vmax.xlane.f32.xlu1 %v3249_v22 }
 0x806   : > { %v3247_v26 = vpop.f32.mrf.mxu2 }
 0x80e   : > { %v7401_v23 = vpop.f32.mrf.mxu2 }
 0x80f   : > { %v3345_v12 = vsel %vm3058_vm15, %v7401_v23, -inf }
 0x816   : > { %v3343_v24 = vpop.f32.mrf.mxu2 }
 0x853   : > { %v3092_v36 = vpop.xlane.xlu2 %3091  ;;  %v3061_v10 = vpop.xlane.xlu1 %3060 }
 0x854   : > { %v3093_v25 = vsub.f32 %v3086_v13, %v3092_v36  ;;  %v3062_v46 = vsub.f32 %v7391_v33, %v3061_v10 }
 0x856   : > { %v3094_v27 = vmul.f32 1.442695, %v3093_v25 }
 0x858   : > { %5811 = vpow2.f32 %v3094_v27 }
 0x85e   : > { %v5812_v0 = vpop.eup %5811 }
 0x85f   : > { %v3096_v49 = vsel %vm3058_vm15, %v5812_v0, 0.0 }
 0x860   : > { %3097 = vadd.xlane.f32.xlu0 %v3096_v49 }
 0x863   : > { %v3155_v5 = vpop.xlane.xlu2 %3154 }
 0x864   : > { %v3156_v7 = vsub.f32 %v3149_v17, %v3155_v5 }
 0x866   : > { %v3157_v45 = vmul.f32 1.442695, %v3156_v7 }
 0x873   : > { %v3251_v48 = vpop.xlane.xlu1 %3250 }
 0x874   : > { %v3252_v32 = vsub.f32 %v7397_v21, %v3251_v48 }
 0x876   : > { %v3253_v33 = vmul.f32 1.442695, %v3252_v32 }
 0x8d3   : > { %v3098_v52 = vpop.xlane.xlu0 %3097 }
 0x8d4   : > { %5813 = vrcp.f32 %v3098_v52 }
 0x8d5   : > { %5815 = vpow2.f32 %v3157_v45 }
 0x8da   : > { %v5814_v1 = vpop.eup %5813 }
 0x8db   : > { %v3100_v57 = vmul.f32 %v5814_v1, %v5812_v0  ;;  %v5816_v38 = vpop.eup %5815 }
 0x8dc   : > { %v3159_v14 = vsel %vm3058_vm15, %v5816_v38, 0.0 }
 0x8dd   : > { %v3101_v58 = vpack.c.bf16 %v3100_v57, %v3100_v57  ;;  %v3281_v57 = vmul.f32 %v7204_v51, %v7364_v62 }
 0x8df   : > { %5141 = vmatmul.msk.bf16.vlgmr.msrb.gmra.mxu0 %vm3058_vm15, %v3101_v58  ;;  %v3282_v58 = vmul.f32 %v7204_v51, %v7372_v4 }
 0x8e0   : > { %3291 = vmatpush.bf16.xpose.msrb.mxu0 %v3280_v59 }
 0x8e1   : > { %v3283_v5 = vpack.c.bf16 %v3282_v58, %v3281_v57  ;;  %v5765_v58 = vld [vmem:[%s1218_s13] ss:$0 sm:$0xff] }
 0x8ef   : > { %3196 = vmatmul.bf16.vlgmr.msra.gmra.mxu0 %v7380_v11 }
 0x8f0   : > { %3387 = vmatpush.bf16.xpose.msra.mxu0 %v3376_v63 }
 0x8ff   : > { %3292 = vmatmul.bf16.vlgmr.msrb.gmra.mxu0 %v7380_v11 }
 0x90f   : > { %3388 = vmatmul.bf16.vlgmr.msra.gmra.mxu0 %v7380_v11  ;;  %v3063_v11 = vmul.f32 1.442695, %v3062_v46 }
 0x911   : > { %5817 = vpow2.f32 %v3063_v11 }
 0x912   : > { %5819 = vpow2.f32 %v3253_v33 }
 0x917   : > { %v5818_v15 = vpop.eup %5817 }
 0x918   : > { %v3065_v20 = vsel %vm3058_vm15, %v5818_v15, 0.0  ;;  %v5820_v17 = vpop.eup %5819 }
 0x919   : > { %v3255_v21 = vsel %vm3058_vm15, %v5820_v17, 0.0 }
 0x95c   : > { %v7432_v2 = vpop.f32.mrf.mxu0 }
 0x964   : > { %v3116_v3 = vpop.f32.mrf.mxu0 }
 0x96c   : > { %v3197_v8 = vpop.f32.mrf.mxu0 }
 0x96d   : > { %v3201_v9 = vsel %vm3058_vm15, %v3197_v8, -inf }
 0x96e   : > { %3202 = vmax.xlane.f32.xlu0 %v3201_v9 }
 0x974   : > { %v3199_v30 = vpop.f32.mrf.mxu0 }
 0x975   : > { %v3377_v30 = vmul.f32 %v7212_v56, %v7364_v62 }
 0x976   : > { %3346 = vmax.xlane.f32.xlu0 %v3345_v12  ;;  %v3378_v12 = vmul.f32 %v7212_v56, %v7372_v4 }
 0x978   : > { %v3379_v32 = vpack.c.bf16 %v3378_v12, %v3377_v30 }
 0x97c   : > { %v3293_v19 = vpop.f32.mrf.mxu0 }
 0x97d   : > { %v3297_v13 = vsel %vm3058_vm15, %v3293_v19, -inf }
 0x97e   : > { %3298 = vmax.xlane.f32.xlu2 %v3297_v13  ;;  %3160 = vadd.xlane.f32.xlu0 %v3159_v14 }
 0x984   : > { %v3295_v16 = vpop.f32.mrf.mxu0 }
 0x986   : > { %3066 = vadd.xlane.f32.xlu2 %v3065_v20 }
 0x98c   : > { %v3389_v31 = vpop.f32.mrf.mxu0 }
 0x98d   : > { %v3393_v18 = vsel %vm3058_vm15, %v3389_v31, -inf }
 0x98e   : > { %3394 = vmax.xlane.f32.xlu1 %v3393_v18  ;;  %3256 = vadd.xlane.f32.xlu2 %v3255_v21 }
 0x994   : > { %v3391_v22 = vpop.f32.mrf.mxu0 }
 0x9e1   : > { %v3203_v26 = vpop.xlane.xlu0 %3202 }
 0x9e2   : > { %v3204_v24 = vsub.f32 %v3197_v8, %v3203_v26 }
 0x9e4   : > { %v3205_v36 = vmul.f32 1.442695, %v3204_v24 }
 0x9e6   : > { %5821 = vpow2.f32 %v3205_v36 }
 0x9e9   : > { %v3347_v25 = vpop.xlane.xlu0 %3346 }
 0x9ea   : > { %v3348_v27 = vsub.f32 %v7401_v23, %v3347_v25  ;;  %v3329_v23 = vmul.f32 %v7210_v55, %v7364_v62 }
 0x9ec   : > { %v5822_v39 = vpop.eup %5821  ;;  %v3349_v28 = vmul.f32 1.442695, %v3348_v27  ;;  %v3331_v1 = vpack.c.bf16 %v3330_v44, %v3329_v23  ;;  %v5556_v27 = vld [vmem:[%s6995_s30 + $0x38] sm:$0xff] }
 0x9ed   : > { %v3207_v29 = vsel %vm3058_vm15, %v5822_v39, 0.0  ;;  %3487 = vmatpush.bf16.msra.mxu2 %v5556_v27 }
 0x9ee   : > { %5823 = vpow2.f32 %v3349_v28  ;;  %3208 = vadd.xlane.f32.xlu1 %v3207_v29  ;;  %v5553_v28 = vld [vmem:[%s6995_s30 + $0x20] sm:$0xff]  ;;  %v5552_v29 = vld [vmem:[%s6995_s30 + $0x18] sm:$0xff] }
 0x9f1   : > { %v3299_v34 = vpop.xlane.xlu2 %3298  ;;  %v3161_v35 = vpop.xlane.xlu0 %3160 }
 0x9f2   : > { %v3300_v37 = vsub.f32 %v3293_v19, %v3299_v34  ;;  %5825 = vrcp.f32 %v3161_v35  ;;  %v5551_v34 = vld [vmem:[%s6995_s30 + $0x10] sm:$0xff]  ;;  %v5550_v35 = vld [vmem:[%s6995_s30 + $0x8] sm:$0xff] }
 0x9f4   : > { %v5824_v40 = vpop.eup %5823  ;;  %v3301_v41 = vmul.f32 1.442695, %v3300_v37 }
 0x9f5   : > { %v3351_v42 = vsel %vm3058_vm15, %v5824_v40, 0.0 }
 0x9f6   : > { %5827 = vpow2.f32 %v3301_v41  ;;  %3352 = vadd.xlane.f32.xlu1 %v3351_v42 }
 0x9f8   : > { %v5826_v53 = vpop.eup %5825 }
 0x9f9   : > { %v3163_v47 = vmul.f32 %v5826_v53, %v5816_v38  ;;  %v3067_v0 = vpop.xlane.xlu2 %3066 }
 0x9fa   : > { %5829 = vrcp.f32 %v3067_v0 }
 0x9fb   : > { %v3164_v49 = vpack.c.bf16 %v3163_v47, %v3163_v47 }
 0x9fc   : > { %v5828_v52 = vpop.eup %5827 }
 0x9fd   : > { %5143 = vmatmul.msk.bf16.vlgmr.msrb.gmra.mxu3 %vm3058_vm15, %v3164_v49  ;;  %v3303_v54 = vsel %vm3058_vm15, %v5828_v52, 0.0 }
 0x9fe   : > { %3367 = vmatpush.bf16.msrb.mxu3 %v3331_v1  ;;  %3304 = vadd.xlane.f32.xlu0 %v3303_v54 }
 0xa00   : > { %v5830_v50 = vpop.eup %5829 }
 0xa01   : > { %v3069_v55 = vmul.f32 %v5830_v50, %v5818_v15  ;;  %v3257_v59 = vpop.xlane.xlu2 %3256  ;;  %v3395_v60 = vpop.xlane.xlu1 %3394 }
 0xa02   : > { %5831 = vrcp.f32 %v3257_v59  ;;  %v3396_v61 = vsub.f32 %v3389_v31, %v3395_v60 }
 0xa03   : > { %v3070_v63 = vpack.c.bf16 %v3069_v55, %v3069_v55  ;;  %v3037_v55 = vadd.f32 %v5765_v58, %v7344_v43  ;;  %v5305_v43 = vld [vmem:[%s7025_s2 + $0xf8] sm:$0xf0]  ;;  %v5572_v58 = vld [vmem:[%s7025_s2 + $0x74] sm:$0xf0] }
 0xa04   : > { %v3397_v3 = vmul.f32 1.442695, %v3396_v61 }
 0xa05   : > { %5142 = vmatmul.msk.bf16.vlgmr.msra.gmra.mxu1 %vm3058_vm15, %v3070_v63  ;;  %v5295_v63 = vld [vmem:[%s7025_s2 + $0xe0] sm:$0xf] }
 0xa06   : > { %5833 = vpow2.f32 %v3397_v3  ;;  %3319 = vmatpush.bf16.msra.mxu1 %v3283_v5  ;;  %v5587_v3 = vld [vmem:[%s7025_s2 + $0xec] sm:$0xf0]  ;;  %v5585_v5 = vld [vmem:[%s7025_s2 + $0xe4] sm:$0xf] }
 0xa08   : > { %v5832_v7 = vpop.eup %5831 }
 0xa09   : > { %v3259_v8 = vmul.f32 %v5832_v7, %v5820_v17  ;;  %v5296_v7 = vor.u32 %v5587_v3, %v5295_v63  ;;  %v5241_v63 = vld [vmem:[%s7025_s2 + $0x78] sm:$0xf0] }
 0xa0b   : > { %v3260_v9 = vpack.c.bf16 %v3259_v8, %v3259_v8  ;;  %v5297_v8 = vld [vmem:[%s7025_s2 + $0xf0] sm:$0xf0] }
 0xa0c   : > { %v5834_v45 = vpop.eup %5833 }
 0xa0d   : > { %5145 = vmatmul.msk.bf16.vlgmr.msra.gmra.mxu3 %vm3058_vm15, %v3260_v9  ;;  %v3399_v51 = vsel %vm3058_vm15, %v5834_v45, 0.0  ;;  %v5303_v9 = vld [vmem:[%s7025_s2 + $0xe8] sm:$0xf] }
 0xa0e   : > { %3400 = vadd.xlane.f32.xlu2 %v3399_v51  ;;  %v5300_v51 = vor.u32 %v5585_v5, %v5297_v8  ;;  %3733 = vmatpush.bf16.msra.mxu3 %v5296_v7  ;;  %v5215_v5 = vld [vmem:[%s7025_s2 + $0x40] sm:$0xf]  ;;  %v5567_v7 = vld [vmem:[%s7025_s2 + $0x4c] sm:$0xf0]  ;;  %v5565_v8 = vld [vmem:[%s7025_s2 + $0x44] sm:$0xf] }
 0xa10   : > { %3746 = vmatpush.bf16.msrb.mxu0 %v5300_v51  ;;  %v5223_v51 = vld [vmem:[%s7025_s2 + $0x48] sm:$0xf] }
 0xa61   : > { %v3209_v10 = vpop.xlane.xlu1 %3208 }
 0xa62   : > { %5835 = vrcp.f32 %v3209_v10 }
 0xa68   : > { %v5836_v46 = vpop.eup %5835 }
 0xa69   : > { %v3211_v11 = vmul.f32 %v5836_v46, %v5822_v39  ;;  %v3353_v48 = vpop.xlane.xlu1 %3352  ;;  %v5555_v39 = vld [vmem:[%s6995_s30 + $0x30] sm:$0xff] }
 0xa6a   : > { %5837 = vrcp.f32 %v3353_v48  ;;  %3488 = vmatpush.bf16.msra.mxu2 %v5555_v39  ;;  %v5586_v46 = vld [vmem:[%s7025_s2 + $0xec] sm:$0xf] }
 0xa6b   : > { %v3212_v38 = vpack.c.bf16 %v3211_v11, %v3211_v11  ;;  %v5308_v30 = vor.u32 %v5586_v46, %v5305_v43  ;;  %v5578_v39 = vld [vmem:[%s7025_s2 + $0xac] sm:$0xf] }
 0xa6d   : > { %5144 = vmatmul.msk.bf16.vlgmr.msrb.gmra.mxu1 %vm3058_vm15, %v3212_v38 }
 0xa6e   : > { %3415 = vmatpush.bf16.msrb.mxu1 %v3379_v32  ;;  %v5279_v32 = vld [vmem:[%s7025_s2 + $0xc0] sm:$0xf] }
 0xa70   : > { %v5838_v19 = vpop.eup %5837 }
 0xa71   : > { %v3355_v13 = vmul.f32 %v5838_v19, %v5824_v40  ;;  %v3305_v14 = vpop.xlane.xlu0 %3304  ;;  %v5549_v40 = vld [vmem:[%s6995_s30] sm:$0xff]  ;;  %v5583_v19 = vld [vmem:[%s7025_s2 + $0xcc] sm:$0xf0] }
 0xa72   : > { %5839 = vrcp.f32 %v3305_v14  ;;  %v5280_v14 = vor.u32 %v5583_v19, %v5279_v32  ;;  %v5563_v32 = vld [vmem:[%s7025_s2 + $0x2c] sm:$0xf0]  ;;  %v5561_v19 = vld [vmem:[%s7025_s2 + $0x24] sm:$0xf] }
 0xa73   : > { %v3356_v33 = vpack.c.bf16 %v3355_v13, %v3355_v13  ;;  %v5581_v13 = vld [vmem:[%s7025_s2 + $0xc4] sm:$0xf] }
 0xa74   : > { %3734 = vmatpush.bf16.msra.mxu3 %v5280_v14 }
 0xa75   : > { %5147 = vmatmul.msk.bf16.vlgmr.msrb.gmra.mxu3 %vm3058_vm15, %v3356_v33  ;;  %v5281_v33 = vld [vmem:[%s7025_s2 + $0xd0] sm:$0xf0] }
 0xa78   : > { %v5840_v15 = vpop.eup %5839 }
 0xa79   : > { %v3307_v62 = vmul.f32 %v5840_v15, %v5828_v52  ;;  %v5287_v15 = vld [vmem:[%s7025_s2 + $0xc8] sm:$0xf] }
 0xa7b   : > { %v3308_v16 = vpack.c.bf16 %v3307_v62, %v3307_v62  ;;  %v5584_v62 = vld [vmem:[%s7025_s2 + $0xd4] sm:$0xf0] }
 0xa7d   : > { %5146 = vmatmul.msk.bf16.vlgmr.msra.gmra.mxu1 %vm3058_vm15, %v3308_v16  ;;  %v5284_v16 = vor.u32 %v5581_v13, %v5281_v33  ;;  %v5201_v13 = vld [vmem:[%s7025_s2 + $0x30] sm:$0xf0] }
 0xa7e   : > { %v5204_v33 = vor.u32 %v5561_v19, %v5201_v13 }
 0xa7f   : > { %3747 = vmatpush.bf16.msrb.mxu0 %v5284_v16  ;;  %v5562_v16 = vld [vmem:[%s7025_s2 + $0x2c] sm:$0xf] }
 0xa80   : > { %v3177_v56 = vpop.f32.mrf.mxu3 }
 0xa81   : > { %v3401_v4 = vpop.xlane.xlu2 %3400 }
 0xa82   : > { %5841 = vrcp.f32 %v3401_v4  ;;  %v3130_v20 = vpop.f32.mrf.mxu1  ;;  %v5582_v4 = vld [vmem:[%s7025_s2 + $0xcc] sm:$0xf] }
 0xa83   : > { %v3131_v17 = vadd.f32 %v3130_v20, %v7432_v2  ;;  %v5554_v2 = vld [vmem:[%s6995_s30 + $0x28] sm:$0xff]  ;;  %v5289_v20 = vld [vmem:[%s7025_s2 + $0xd8] sm:$0xf0]  ;;  %s4707_s30 = sshll.u32 %s7777_s8, 1 }
 0xa84   : > { %3489 = vmatpush.bf16.msra.mxu2 %v5554_v2  ;;  %v5273_v2 = vld [vmem:[%s7025_s2 + $0xb8] sm:$0xf0]  ;;  %s1486_s13 = sadd.s32 %s4707_s30, %s7779_s6 }
 0xa85   : > { %v3181_v31 = vadd.f32 %v3177_v56, %v3131_v17  ;;  %v5288_v56 = vor.u32 %v5584_v62, %v5287_v15  ;;  %v5292_v17 = vor.u32 %v5582_v4, %v5289_v20  ;;  %v5207_v15 = vld [vmem:[%s7025_s2 + $0x28] sm:$0xf]  ;;  %v5564_v62 = vld [vmem:[%s7025_s2 + $0x34] sm:$0xf0]  ;;  %v5209_v4 = vld [vmem:[%s7025_s2 + $0x38] sm:$0xf0] }
 0xa86   : > { %v5183_v20 = vld [vmem:[%s7025_s2] sm:$0xf] }
 0xa88   : > { %v5842_v18 = vpop.eup %5841  ;;  %v3179_v21 = vpop.f32.mrf.mxu3  ;;  %3490 = vmatpush.bf16.msra.mxu2 %v5553_v28  ;;  %v5276_v28 = vor.u32 %v5578_v39, %v5273_v2 }
 0xa89   : > { %v3403_v22 = vmul.f32 %v5842_v18, %v5834_v45  ;;  %v5588_v45 = vld [vmem:[%s7025_s2 + $0xf4] sm:$0xf0]  ;;  %v5579_v18 = vld [vmem:[%s7025_s2 + $0xac] sm:$0xf0]  ;;  %v5577_v21 = vld [vmem:[%s7025_s2 + $0xa4] sm:$0xf] }
 0xa8a   : > { %v3132_v26 = vpop.f32.mrf.mxu1  ;;  %v5304_v10 = vor.u32 %v5588_v45, %v5303_v9  ;;  %v5216_v9 = vor.u32 %v5567_v7, %v5215_v5  ;;  %v5217_v45 = vld [vmem:[%s7025_s2 + $0x50] sm:$0xf0]  ;;  %v5601_v5 = vld [vmem:[%s7042_s5 + $0x60] sm:$0xff] }
 0xa8b   : > { %v3404_v24 = vpack.c.bf16 %v3403_v22, %v3403_v22  ;;  %v5265_v26 = vld [vmem:[%s7025_s2 + $0xb0] sm:$0xf0]  ;;  %v5220_v46 = vor.u32 %v5565_v8, %v5217_v45  ;;  %v5609_v7 = vld [vmem:[%s7042_s5 + $0xa0] sm:$0xff]  ;;  %v3563_v8 = vld [vmem:[%s7034_s29] sm:$0xf]  ;;  %s4708_s29 = sshll.u32 %s1486_s13, 3 }
 0xa8c   : > { %3491 = vmatpush.bf16.msra.mxu2 %v5552_v29  ;;  %3759 = vmatpush.bf16.msra.mxu1 %v5304_v10  ;;  %v5247_v29 = vld [vmem:[%s7025_s2 + $0x80] sm:$0xf]  ;;  %v5568_v10 = vld [vmem:[%s7025_s2 + $0x54] sm:$0xf0]  ;;  %v5618_v45 = vld [vmem:[%s7042_s5 + $0xe8] sm:$0xff]  ;;  %s1488_s11 = scalar_lea.vmem %s7760_s4, %s4708_s29 }
 0xa8d   : > { %5148 = vmatmul.msk.bf16.vlgmr.msrb.gmra.mxu1 %vm3058_vm15, %v3404_v24  ;;  %v5271_v24 = vld [vmem:[%s7025_s2 + $0xa8] sm:$0xf]  ;;  %v5224_v43 = vor.u32 %v5568_v10, %v5223_v51  ;;  %v5600_v51 = vld [vmem:[%s7042_s5 + $0x58] sm:$0xff] }
 0xa8e   : > { %v5608_v10 = vld [vmem:[%s7042_s5 + $0x98] sm:$0xff] }
 0xa90   : > { %v3273_v36 = vpop.f32.mrf.mxu3  ;;  %3492 = vmatpush.bf16.msra.mxu2 %v5551_v34  ;;  %3760 = vmatpush.bf16.msra.mxu1 %v5288_v56  ;;  %v5575_v34 = vld [vmem:[%s7025_s2 + $0x8c] sm:$0xf0]  ;;  %v5208_v56 = vor.u32 %v5564_v62, %v5207_v15  ;;  %v5616_v15 = vld [vmem:[%s7042_s5 + $0xd8] sm:$0xff] }
 0xa94   : > { %3493 = vmatpush.bf16.msra.mxu2 %v5550_v35  ;;  %v5573_v35 = vld [vmem:[%s7025_s2 + $0x84] sm:$0xf] }
 0xa98   : > { %v3275_v25 = vpop.f32.mrf.mxu3  ;;  %3494 = vmatpush.bf16.msra.mxu2 %v5549_v40  ;;  %v5249_v40 = vld [vmem:[%s7025_s2 + $0x90] sm:$0xf0] }
 0xa99   : > { %v5268_v25 = vor.u32 %v5577_v21, %v5265_v26  ;;  %v5185_v21 = vld [vmem:[%s7025_s2 + $0x10] sm:$0xf0] }
 0xa9b   : > { %3748 = vmatpush.bf16.msrb.mxu0 %v5268_v25  ;;  %v5558_v25 = vld [vmem:[%s7025_s2 + $0xc] sm:$0xf] }
 0xa9c   : > { %3772 = vmatpush.bf16.msrb.mxu2 %v5308_v30  ;;  %v5566_v30 = vld [vmem:[%s7025_s2 + $0x4c] sm:$0xf] }
 0xaa0   : > { %3773 = vmatpush.bf16.msrb.mxu2 %v5292_v17  ;;  %v5559_v17 = vld [vmem:[%s7025_s2 + $0xc] sm:$0xf0] }
 0xaa4   : > { %3774 = vmatpush.bf16.msrb.mxu2 %v5276_v28 }
 0xaea   : > { %v3225_v37 = vpop.f32.mrf.mxu1 }
 0xaeb   : > { %v3229_v23 = vadd.f32 %v3225_v37, %v3181_v31  ;;  %v5263_v31 = vld [vmem:[%s7025_s2 + $0xa0] sm:$0xf]  ;;  %v5248_v37 = vor.u32 %v5575_v34, %v5247_v29 }
 0xaec   : > { %v5264_v22 = vor.u32 %v5579_v18, %v5263_v31  ;;  %v5212_v31 = vor.u32 %v5562_v16, %v5209_v4  ;;  %v5557_v18 = vld [vmem:[%s7025_s2 + $0x4] sm:$0xf]  ;;  %v3565_v16 = vperm.slane %v3563_v8, 0  ;;  %v3568_v4 = vperm.slane %v3563_v8, 3 }
 0xaed   : > { %v3277_v0 = vadd.f32 %v3273_v36, %v3229_v23  ;;  %v5580_v36 = vld [vmem:[%s7025_s2 + $0xb4] sm:$0xf0]  ;;  %v5188_v2 = vor.u32 %v5557_v18, %v5185_v21 }
 0xaee   : > { %v5272_v27 = vor.u32 %v5580_v36, %v5271_v24  ;;  %3735 = vmatpush.bf16.msra.mxu3 %v5264_v22  ;;  %v5191_v22 = vld [vmem:[%s7025_s2 + $0x8] sm:$0xf]  ;;  %v5184_v24 = vor.u32 %v5559_v17, %v5183_v20  ;;  %v5560_v36 = vld [vmem:[%s7025_s2 + $0x14] sm:$0xf0]  ;;  %v5598_v20 = vld [vmem:[%s7042_s5 + $0x48] sm:$0xff] }
 0xaef   : > { %v5192_v28 = vor.u32 %v5560_v36, %v5191_v22  ;;  %v5606_v17 = vld [vmem:[%s7042_s5 + $0x88] sm:$0xff]  ;;  %v5591_v22 = vld [vmem:[%s7042_s5 + $0x10] sm:$0xff] }
 0xaf0   : > { %3761 = vmatpush.bf16.msra.mxu1 %v5272_v27  ;;  %v5193_v27 = vld [vmem:[%s7025_s2 + $0x18] sm:$0xf0] }
 0xaf1   : > { %v5196_v29 = vor.u32 %v5558_v25, %v5193_v27 }
 0xaf2   : > { %v3227_v41 = vpop.f32.mrf.mxu1  ;;  %3736 = vmatpush.bf16.msra.mxu3 %v5248_v37 }
 0xaf3   : > { %v5255_v41 = vld [vmem:[%s7025_s2 + $0x88] sm:$0xf] }
 0xaf8   : > { %v3369_v42 = vpop.f32.mrf.mxu3 }
 0xafa   : > { %v3321_v53 = vpop.f32.mrf.mxu1 }
 0xafb   : > { %v3325_v49 = vadd.f32 %v3321_v53, %v3277_v0  ;;  %v5252_v53 = vor.u32 %v5573_v35, %v5249_v40 }
 0xafd   : > { %v3373_v52 = vadd.f32 %v3369_v42, %v3325_v49  ;;  %v5576_v42 = vld [vmem:[%s7025_s2 + $0x94] sm:$0xf0]  ;;  %3749 = vmatpush.bf16.msrb.mxu0 %v5252_v53  ;;  %v5231_v49 = vld [vmem:[%s7025_s2 + $0x60] sm:$0xf] }
 0xafe   : > { %v5256_v23 = vor.u32 %v5576_v42, %v5255_v41 }
 0xb00   : > { %v3371_v44 = vpop.f32.mrf.mxu3  ;;  %3762 = vmatpush.bf16.msra.mxu1 %v5256_v23  ;;  %v5766_v23 = vld [vmem:[%s7755_s7] ss:$0 sm:$0xff] }
 0xb01   : > { %v5574_v44 = vld [vmem:[%s7025_s2 + $0x8c] sm:$0xf] }
 0xb02   : > { %v3323_v47 = vpop.f32.mrf.mxu1 }
 0xb03   : > { %v5257_v47 = vld [vmem:[%s7025_s2 + $0x98] sm:$0xf0] }
 0xb04   : > { %v5260_v0 = vor.u32 %v5574_v44, %v5257_v47 }
 0xb06   : > { %3775 = vmatpush.bf16.msrb.mxu2 %v5260_v0  ;;  %v5767_v0 = vld [vmem:[%s7756_s10] ss:$0 sm:$0xff] }
 0xb0a   : > { %v3417_v1 = vpop.f32.mrf.mxu1 }
 0xb0b   : > { %v3421_v54 = vadd.f32 %v3417_v1, %v3373_v52  ;;  %v5571_v52 = vld [vmem:[%s7025_s2 + $0x6c] sm:$0xf0]  ;;  %v5569_v1 = vld [vmem:[%s7025_s2 + $0x64] sm:$0xf] }
 0xb0d   : > { %v3422_v50 = vpack.c.bf16 %v3421_v54, %v3421_v54  ;;  %v5232_v54 = vor.u32 %v5571_v52, %v5231_v49 }
 0xb0f   : > { %3495 = vmatmul.bf16.vlgmr.msra.gmra.mxu2 %v3422_v50  ;;  %v5233_v50 = vld [vmem:[%s7025_s2 + $0x70] sm:$0xf0]  ;;  %3737 = vmatpush.bf16.msra.mxu3 %v5232_v54  ;;  %v5604_v54 = vld [vmem:[%s7042_s5 + $0x78] sm:$0xff] }
 0xb12   : > { %v3419_v57 = vpop.f32.mrf.mxu1 }
 0xb13   : > { %v5239_v57 = vld [vmem:[%s7025_s2 + $0x68] sm:$0xf]  ;;  %3738 = vmatpush.bf16.msra.mxu3 %v5216_v9  ;;  %v5594_v9 = vld [vmem:[%s7042_s5 + $0x28] sm:$0xff] }
 0xb92   : > { %v3496_v59 = vpop.f32.mrf.mxu2 }
 0xb93   : > { %v7480_v60 = vadd.f32 %v3496_v59, %v3037_v55  ;;  %v5236_v55 = vor.u32 %v5569_v1, %v5233_v50  ;;  %v5240_v59 = vor.u32 %v5572_v58, %v5239_v57  ;;  %v5612_v50 = vld [vmem:[%s7042_s5 + $0xb8] sm:$0xff]  ;;  %v5611_v57 = vld [vmem:[%s7042_s5 + $0xb0] sm:$0xff] }
 0xb94   : > { %v5596_v58 = vld [vmem:[%s7042_s5 + $0x38] sm:$0xff] }
 0xb95   : > { %3500 = vadd.xlane.f32.xlu0 %v7480_v60  ;;  %3750 = vmatpush.bf16.msrb.mxu0 %v5236_v55  ;;  %v5620_v55 = vld [vmem:[%s7042_s5 + $0xf8] sm:$0xff] }
 0xb96   : > { %3763 = vmatpush.bf16.msra.mxu1 %v5240_v59  ;;  %v5602_v59 = vld [vmem:[%s7042_s5 + $0x68] sm:$0xff] }
 0xb99   : > { %3751 = vmatpush.bf16.msrb.mxu0 %v5220_v46  ;;  %v3566_v46 = vperm.slane %v3563_v8, 1 }
 0xb9a   : > { %v3498_v61 = vpop.f32.mrf.mxu2  ;;  %3764 = vmatpush.bf16.msra.mxu1 %v5224_v43  ;;  %v3567_v43 = vperm.slane %v3563_v8, 2 }
 0xb9b   : > { %v5570_v61 = vld [vmem:[%s7025_s2 + $0x6c] sm:$0xf] }
 0xb9c   : > { %v5244_v3 = vor.u32 %v5570_v61, %v5241_v63  ;;  %v5610_v61 = vld [vmem:[%s7042_s5 + $0xa8] sm:$0xff]  ;;  %v5595_v63 = vld [vmem:[%s7042_s5 + $0x30] sm:$0xff] }
 0xb9d   : > { %3752 = vmatpush.bf16.msrb.mxu0 %v5204_v33  ;;  %v5592_v33 = vld [vmem:[%s7042_s5 + $0x18] sm:$0xff] }
 0xb9e   : > { %3776 = vmatpush.bf16.msrb.mxu2 %v5244_v3  ;;  %3765 = vmatpush.bf16.msra.mxu1 %v5208_v56  ;;  %v5619_v3 = vld [vmem:[%s7042_s5 + $0xf0] sm:$0xff] }
 0xba1   : > { %3753 = vmatpush.bf16.msrb.mxu0 %v5188_v2  ;;  %v5605_v2 = vld [vmem:[%s7042_s5 + $0x80] sm:$0xff] }
 0xba2   : > { %3766 = vmatpush.bf16.msra.mxu1 %v5192_v28 }
 0xba5   : > { %4138 = vmatpush.bf16.msra.mxu0 %v5604_v54 }
 0xba6   : > { %4151 = vmatpush.bf16.msrb.mxu1 %v5612_v50 }
 0xbaa   : > { %4152 = vmatpush.bf16.msrb.mxu1 %v5611_v57 }
 0xbae   : > { %4153 = vmatpush.bf16.msrb.mxu1 %v5610_v61 }
 0xbb2   : > { %4154 = vmatpush.bf16.msrb.mxu1 %v5609_v7 }
 0xbb6   : > { %4155 = vmatpush.bf16.msrb.mxu1 %v5608_v10 }
 0xc08   : > { %v3501_v12 = vpop.xlane.xlu0 %3500 }
 0xc09   : > { %v3502_v11 = vmul.f32 %v3501_v12, %v7321_v6  ;;  %v5225_v12 = vld [vmem:[%s7025_s2 + $0x58] sm:$0xf0] }
 0xc0b   : > { %v7493_v48 = vsub.f32 %v7480_v60, %v3502_v11  ;;  %v5199_v11 = vld [vmem:[%s7025_s2 + $0x20] sm:$0xf]  ;;  %s7758_s2 = scalar_lea.vmem [#allocation23], %s6929_s3 }
 0xc0c   : > { %v5200_v14 = vor.u32 %v5563_v32, %v5199_v11  ;;  %v5607_v32 = vld [vmem:[%s7042_s5 + $0x90] sm:$0xff] }
 0xc0d   : > { %v3504_v38 = vmul.f32 %v7493_v48, %v7493_v48  ;;  %4156 = vmatpush.bf16.msrb.mxu1 %v5607_v32 }
 0xc0e   : > { %3739 = vmatpush.bf16.msra.mxu3 %v5200_v14 }
 0xc0f   : > { %3505 = vadd.xlane.f32.xlu1 %v3504_v38  ;;  %v5228_v38 = vor.u32 %v5566_v30, %v5225_v12  ;;  %v5593_v30 = vld [vmem:[%s7042_s5 + $0x20] sm:$0xff] }
 0xc10   : > { %v5617_v12 = vld [vmem:[%s7042_s5 + $0xe0] sm:$0xff] }
 0xc11   : > { %3777 = vmatpush.bf16.msrb.mxu2 %v5228_v38  ;;  %v5599_v38 = vld [vmem:[%s7042_s5 + $0x50] sm:$0xff]  ;;  %4157 = vmatpush.bf16.msrb.mxu1 %v5606_v17 }
 0xc12   : > { %3740 = vmatpush.bf16.msra.mxu3 %v5184_v24 }
 0xc15   : > { %3778 = vmatpush.bf16.msrb.mxu2 %v5212_v31  ;;  %4158 = vmatpush.bf16.msrb.mxu1 %v5605_v2 }
 0xc16   : > { %4125 = vmatpush.bf16.msrb.mxu3 %v5596_v58 }
 0xc19   : > { %3779 = vmatpush.bf16.msrb.mxu2 %v5196_v29 }
 0xc1a   : > { %4126 = vmatpush.bf16.msrb.mxu3 %v5595_v63 }
 0xc1d   : > { %4164 = vmatpush.bf16.msra.mxu2 %v5620_v55 }
 0xc1e   : > { %4127 = vmatpush.bf16.msrb.mxu3 %v5594_v9 }
 0xc21   : > { %4165 = vmatpush.bf16.msra.mxu2 %v5619_v3 }
 0xc22   : > { %4128 = vmatpush.bf16.msrb.mxu3 %v5593_v30 }
 0xc25   : > { %4166 = vmatpush.bf16.msra.mxu2 %v5618_v45 }
 0xc26   : > { %4129 = vmatpush.bf16.msrb.mxu3 %v5592_v33 }
 0xc29   : > { %4167 = vmatpush.bf16.msra.mxu2 %v5617_v12 }
 0xc2a   : > { %4130 = vmatpush.bf16.msrb.mxu3 %v5591_v22 }
 0xc2d   : > { %4168 = vmatpush.bf16.msra.mxu2 %v5616_v15 }
 0xc82   : > { %v3506_v26 = vpop.xlane.xlu1 %3505 }
 0xc83   : > { %v3507_v39 = vmul.f32 %v3506_v26, %v7321_v6  ;;  %v5615_v26 = vld [vmem:[%s7042_s5 + $0xd0] sm:$0xff] }
 0xc84   : > { %4169 = vmatpush.bf16.msra.mxu2 %v5615_v26 }
 0xc85   : > { %v3508_v34 = vadd.f32 1e-05, %v3507_v39  ;;  %v5597_v39 = vld [vmem:[%s7042_s5 + $0x40] sm:$0xff] }
 0xc87   : > { %5843 = vrsqrt.f32 %v3508_v34  ;;  %vm3515_vm1 = vweird.f32 %v3508_v34 }
 0xc8d   : > { %v5844_v35 = vpop.eup %5843 }
 0xc8e   : > { %v3510_v37 = vmul.f32 %v5844_v35, %v3508_v34  ;;  %vm3516_vm0 = vweird.f32 %v5844_v35 }
 0xc8f   : > { %vm3517_vm2 = vmor %vm3515_vm1, %vm3516_vm0 }
 0xc90   : > { %v3511_v40 = vmul.f32 %v5844_v35, %v3510_v37  ;;  %v5614_v37 = vld [vmem:[%s7042_s5 + $0xc8] sm:$0xff] }
 0xc91   : > { %4170 = vmatpush.bf16.msra.mxu2 %v5614_v37 }
 0xc92   : > { %v3512_v41 = vmul.f32 0.5, %v3511_v40 }
 0xc94   : > { %v3513_v42 = vsub.f32 1.5, %v3512_v41 }
 0xc96   : > { %v3514_v53 = vmul.f32 %v5844_v35, %v3513_v42  ;;  %v5589_v42 = vld [vmem:[%s7042_s5] sm:$0xff] }
 0xc98   : > { %v3518_v44 = vsel %vm3517_vm2, %v5844_v35, %v3514_v53  ;;  %v5590_v35 = vld [vmem:[%s7042_s5 + $0x8] sm:$0xff]  ;;  %v5613_v53 = vld [vmem:[%s7042_s5 + $0xc0] sm:$0xff] }
 0xc99   : > { %v3519_v47 = vmul.f32 %v3518_v44, %v7493_v48  ;;  %v5603_v48 = vld [vmem:[%s7042_s5 + $0x70] sm:$0xff]  ;;  %4131 = vmatpush.bf16.msrb.mxu3 %v5590_v35  ;;  %4171 = vmatpush.bf16.msra.mxu2 %v5613_v53  ;;  %s7759_s5 = scalar_lea.vmem [#allocation24], %s6929_s3 }
 0xc9a   : > { %4139 = vmatpush.bf16.msra.mxu0 %v5603_v48 }
 0xc9b   : > { %v3524_v49 = vmul.f32 %v5766_v23, %v3519_v47 }
 0xc9d   : > { %v3529_v52 = vadd.f32 %v5767_v0, %v3524_v49  ;;  %4132 = vmatpush.bf16.msrb.mxu3 %v5589_v42 }
 0xc9e   : > { %4140 = vmatpush.bf16.msra.mxu0 %v5602_v59 }
 0xc9f   : > { %v3530_v1 = vpack.c.bf16 %v3529_v52, %v3529_v52 }
 0xca1   : > { %3741 = vmatmul.bf16.vlgmr.msra.gmra.mxu3 %v3530_v1  ;;  %3754 = vmatmul.bf16.vlgmr.msrb.gmra.mxu0 %v3530_v1 }
 0xca2   : > { %3767 = vmatmul.bf16.vlgmr.msra.gmra.mxu1 %v3530_v1  ;;  %3780 = vmatmul.bf16.vlgmr.msrb.gmra.mxu2 %v3530_v1 }
 0xca3   : > { %4141 = vmatpush.bf16.msra.mxu0 %v5601_v5 }
 0xca7   : > { %4142 = vmatpush.bf16.msra.mxu0 %v5600_v51 }
 0xcab   : > { %4143 = vmatpush.bf16.msra.mxu0 %v5599_v38 }
 0xcaf   : > { %4144 = vmatpush.bf16.msra.mxu0 %v5598_v20 }
 0xcb3   : > { %4145 = vmatpush.bf16.msra.mxu0 %v5597_v39 }
 0xd1e   : > { %v3755_v11 = vpop.f32.mrf.mxu0 }
 0xd1f   : > { %v7580_v19 = vadd.f32 %v3755_v11, %v3566_v46  ;;  %v3768_v13 = vpop.f32.mrf.mxu1 }
 0xd20   : > { %v7582_v14 = vadd.f32 %v3768_v13, %v3567_v43 }
 0xd21   : > { %v3786_v62 = vmul.f32 -1.702, %v7580_v19 }
 0xd22   : > { %v3787_v56 = vmul.f32 -1.702, %v7582_v14 }
 0xd23   : > { %v3791_v31 = vmul.f32 1.442695, %v3786_v62 }
 0xd24   : > { %v3793_v18 = vmul.f32 1.442695, %v3787_v56  ;;  %v3742_v21 = vpop.f32.mrf.mxu3 }
 0xd25   : > { %5845 = vpow2.f32 %v3791_v31  ;;  %v7592_v24 = vadd.f32 %v3742_v21, %v3565_v16  ;;  %v3781_v36 = vpop.f32.mrf.mxu2 }
 0xd26   : > { %5847 = vpow2.f32 %v3793_v18  ;;  %v7594_v25 = vadd.f32 %v3781_v36, %v3568_v4  ;;  %v3757_v27 = vpop.f32.mrf.mxu0 }
 0xd27   : > { %v3785_v28 = vmul.f32 -1.702, %v7592_v24  ;;  %v3770_v29 = vpop.f32.mrf.mxu1 }
 0xd28   : > { %v3788_v34 = vmul.f32 -1.702, %v7594_v25 }
 0xd29   : > { %v3789_v40 = vmul.f32 1.442695, %v3785_v28 }
 0xd2a   : > { %v3795_v41 = vmul.f32 1.442695, %v3788_v34 }
 0xd2b   : > { %v5846_v23 = vpop.eup %5845  ;;  %5849 = vpow2.f32 %v3789_v40 }
 0xd2c   : > { %v5848_v44 = vpop.eup %5847  ;;  %v3798_v47 = vadd.f32 1.0, %v5846_v23  ;;  %5851 = vpow2.f32 %v3795_v41  ;;  %v3744_v0 = vpop.f32.mrf.mxu3 }
 0xd2d   : > { %v3799_v49 = vadd.f32 1.0, %v5848_v44  ;;  %v3783_v52 = vpop.f32.mrf.mxu2 }
 0xd2e   : > { %5853 = vrcp.f32 %v3798_v47  ;;  %v3825_v63 = vand.u32 2147483647, %v3798_v47  ;;  %v3827_v3 = vand.u32 2147483648, %v3798_v47  ;;  %vm3821_vm4 = vweird.f32 %v3798_v47 }
 0xd2f   : > { %5855 = vrcp.f32 %v3799_v49  ;;  %v3840_v7 = vand.u32 2147483647, %v3799_v49  ;;  %v3842_v8 = vand.u32 2147483648, %v3799_v49  ;;  %vm3836_vm5 = vweird.f32 %v3799_v49 }
 0xd30   : > { %vm3826_vm7 = vcmp.eq.f32.partialorder %v3825_v63, 8.507059e+37  ;;  %v3828_v43 = vor.u32 1.1754944e-38, %v3827_v3 }
 0xd31   : > { %v5850_v1 = vpop.eup %5849  ;;  %vm3841_vm9 = vcmp.eq.f32.partialorder %v3840_v7, 8.507059e+37  ;;  %v3843_v11 = vor.u32 1.1754944e-38, %v3842_v8 }
 0xd32   : > { %v5852_v54 = vpop.eup %5851  ;;  %v3797_v50 = vadd.f32 1.0, %v5850_v1 }
 0xd33   : > { %v7604_v48 = vadd.f32 1.0, %v5852_v54  ;;  %v5768_v54 = vld [vmem:[%s7757_s23] ss:$0 sm:$0xff] }
 0xd34   : > { %v5854_v57 = vpop.eup %5853  ;;  %5857 = vrcp.f32 %v3797_v50  ;;  %v3810_v33 = vand.u32 2147483647, %v3797_v50  ;;  %v3812_v15 = vand.u32 2147483648, %v3797_v50  ;;  %vm3806_vm13 = vweird.f32 %v3797_v50 }
 0xd35   : > { %v5856_v58 = vpop.eup %5855  ;;  %v3817_v55 = vmul.f32 %v5854_v57, %v3798_v47  ;;  %5859 = vrcp.f32 %v7604_v48  ;;  %vm3822_vm3 = vweird.f32 %v5854_v57  ;;  %v3857_v4 = vand.u32 2147483648, %v7604_v48 }
 0xd36   : > { %v3832_v59 = vmul.f32 %v5856_v58, %v3799_v49  ;;  %vm3837_vm6 = vweird.f32 %v5856_v58  ;;  %vm3823_vm8 = vmor %vm3821_vm4, %vm3822_vm3  ;;  %v3855_v22 = vand.u32 2147483647, %v7604_v48  ;;  %v3813_v39 = vor.u32 1.1754944e-38, %v3812_v15 }
 0xd37   : > { %v3818_v61 = vsub.f32 1.0, %v3817_v55  ;;  %vm3838_vm10 = vmor %vm3836_vm5, %vm3837_vm6  ;;  %vm3851_vm15 = vweird.f32 %v7604_v48  ;;  %vm3811_vm0 = vcmp.eq.f32.partialorder %v3810_v33, 8.507059e+37 }
 0xd38   : > { %v3833_v5 = vsub.f32 1.0, %v3832_v59  ;;  %vm3856_vm2 = vcmp.eq.f32.partialorder %v3855_v22, 8.507059e+37 }
 0xd39   : > { %v3819_v9 = vmul.f32 %v5854_v57, %v3818_v61 }
 0xd3a   : > { %v5858_v45 = vpop.eup %5857  ;;  %v3834_v51 = vmul.f32 %v5856_v58, %v3833_v5 }
 0xd3b   : > { %v5860_v10 = vpop.eup %5859  ;;  %v3820_v46 = vadd.f32 %v5854_v57, %v3819_v9  ;;  %v3802_v30 = vmul.f32 %v5858_v45, %v3797_v50  ;;  %vm3807_vm11 = vweird.f32 %v5858_v45 }
 0xd3c   : > { %v3835_v12 = vadd.f32 %v5856_v58, %v3834_v51  ;;  %v3847_v38 = vmul.f32 %v5860_v10, %v7604_v48  ;;  %vm3852_vm12 = vweird.f32 %v5860_v10  ;;  %vm3808_vm14 = vmor %vm3806_vm13, %vm3807_vm11  ;;  %v5769_v51 = vld [vmem:[%s7758_s2] ss:$0 sm:$0xff] }
 0xd3d   : > { %v3824_v32 = vsel %vm3823_vm8, %v5854_v57, %v3820_v46  ;;  %v3803_v13 = vsub.f32 1.0, %v3802_v30  ;;  %vm3853_vm1 = vmor %vm3851_vm15, %vm3852_vm12 }
 0xd3e   : > { %v3829_v62 = vsel %vm3826_vm7, %v3828_v43, %v3824_v32  ;;  %v3839_v16 = vsel %vm3838_vm10, %v5856_v58, %v3835_v12  ;;  %v3848_v56 = vsub.f32 1.0, %v3847_v38 }
 0xd3f   : > { %v3862_v20 = vmul.f32 %v3829_v62, %v7580_v19  ;;  %v3844_v17 = vsel %vm3841_vm9, %v3843_v11, %v3839_v16  ;;  %v3804_v31 = vmul.f32 %v5858_v45, %v3803_v13  ;;  %v3858_v19 = vor.u32 1.1754944e-38, %v3857_v4 }
 0xd40   : > { %v3863_v18 = vmul.f32 %v3844_v17, %v7582_v14  ;;  %v3849_v21 = vmul.f32 %v5860_v10, %v3848_v56 }
 0xd41   : > { %v3866_v26 = vpack.c.bf16 %v3862_v20, %v3862_v20  ;;  %v3805_v36 = vadd.f32 %v5858_v45, %v3804_v31 }
 0xd42   : > { %v3867_v27 = vpack.c.bf16 %v3863_v18, %v3863_v18  ;;  %v3850_v2 = vadd.f32 %v5860_v10, %v3849_v21 }
 0xd43   : > { %v3809_v28 = vsel %vm3808_vm14, %v5858_v45, %v3805_v36  ;;  %4146 = vmatmul.bf16.vlgmr.msra.gmra.mxu0 %v3866_v26 }
 0xd44   : > { %v3814_v29 = vsel %vm3811_vm0, %v3813_v39, %v3809_v28  ;;  %v3854_v14 = vsel %vm3853_vm1, %v5860_v10, %v3850_v2  ;;  %4159 = vmatmul.bf16.vlgmr.msrb.gmra.mxu1 %v3867_v27 }
 0xd45   : > { %v3861_v34 = vmul.f32 %v3814_v29, %v7592_v24  ;;  %v3859_v35 = vsel %vm3856_vm2, %v3858_v19, %v3854_v14 }
 0xd46   : > { %v3864_v37 = vmul.f32 %v3859_v35, %v7594_v25 }
 0xd47   : > { %v3865_v40 = vpack.c.bf16 %v3861_v34, %v3861_v34 }
 0xd48   : > { %v3868_v41 = vpack.c.bf16 %v3864_v37, %v3864_v37 }
 0xd49   : > { %4133 = vmatmul.bf16.vlgmr.msrb.gmra.mxu3 %v3865_v40 }
 0xd4a   : > { %4172 = vmatmul.bf16.vlgmr.msra.gmra.mxu2 %v3868_v41 }
 0xdc0   : > { %v4147_v42 = vpop.f32.mrf.mxu0 }
 0xdc1   : > { %v4160_v53 = vpop.f32.mrf.mxu1 }
 0xdc8   : > { %v4149_v23 = vpop.f32.mrf.mxu0 }
 0xdc9   : > { %v4162_v44 = vpop.f32.mrf.mxu1 }
 0xdcc   : > { %v4134_v47 = vpop.f32.mrf.mxu3 }
 0xdcd   : > { %v4148_v0 = vadd.f32 %v4147_v42, %v4134_v47  ;;  %v4173_v49 = vpop.f32.mrf.mxu2 }
 0xdcf   : > { %v4161_v52 = vadd.f32 %v4160_v53, %v4148_v0 }
 0xdd1   : > { %v4174_v1 = vadd.f32 %v4173_v49, %v4161_v52 }
 0xdd3   : > { %v4177_v24 = vadd.f32 %v4174_v1, %v7480_v60 }
 0xdd4   : > { %v4136_v50 = vpop.f32.mrf.mxu3 }
 0xdd5   : > { %v4175_v48 = vpop.f32.mrf.mxu2  ;;  %v4182_v25 = vadd.f32 %v5768_v54, %v4177_v24 }
 0xdd7   : > { %4183 = vadd.xlane.f32.xlu2 %v4182_v25 }
 0xe4a   : > { %v4184_v57 = vpop.xlane.xlu2 %4183 }
 0xe4b   : > { %v4185_v58 = vmul.f32 %v4184_v57, %v7321_v6 }
 0xe4d   : > { %v4186_v55 = vsub.f32 %v4182_v25, %v4185_v58 }
 0xe4f   : > { %v4187_v59 = vmul.f32 %v4186_v55, %v4186_v55 }
 0xe51   : > { %4188 = vadd.xlane.f32.xlu0 %v4187_v59 }
 0xec4   : > { %v4189_v61 = vpop.xlane.xlu0 %4188 }
 0xec5   : > { %v4190_v63 = vmul.f32 %v4189_v61, %v7321_v6  ;;  %v5770_v6 = vld [vmem:[%s7759_s5] ss:$0 sm:$0xff] }
 0xec7   : > { %v4191_v3 = vadd.f32 1e-05, %v4190_v63 }
 0xec9   : > { %5861 = vrsqrt.f32 %v4191_v3  ;;  %vm4198_vm4 = vweird.f32 %v4191_v3 }
 0xecf   : > { %v5862_v60 = vpop.eup %5861 }
 0xed0   : > { %v4193_v5 = vmul.f32 %v5862_v60, %v4191_v3  ;;  %vm4199_vm3 = vweird.f32 %v5862_v60 }
 0xed1   : > { %vm4200_vm5 = vmor %vm4198_vm4, %vm4199_vm3 }
 0xed2   : > { %v4194_v7 = vmul.f32 %v5862_v60, %v4193_v5 }
 0xed4   : > { %v4195_v8 = vmul.f32 0.5, %v4194_v7 }
 0xed6   : > { %v4196_v9 = vsub.f32 1.5, %v4195_v8 }
 0xed8   : > { %v4197_v45 = vmul.f32 %v5862_v60, %v4196_v9 }
 0xeda   : > { %v4201_v10 = vsel %vm4200_vm5, %v5862_v60, %v4197_v45 }
 0xedb   : > { %v4202_v46 = vmul.f32 %v4201_v10, %v4186_v55 }
 0xedd   : > { %v4207_v43 = vmul.f32 %v5769_v51, %v4202_v46 }
 0xedf   : > { %v4212_v30 = vadd.f32 %v5770_v6, %v4207_v43 }
 0xee1   : > { %4213 = vst [vmem:[%s1488_s11] sm:$0xff] %v4212_v30 }
 0xee2 PF: > { %s7761_s8 = sld [smem:[#allocation48_spill]]  ;;  %s7768_s7 = smov %s6529_s26 }
 0xee3   : > { %s7762_s29 = sld [smem:[#allocation43_spill]] }
 0xee4   : > { %s7763_s2 = sld [smem:[#allocation44_spill]] }
 0xee5   : > { %s7764_s6 = sld [smem:[#allocation53_spill]] }
 0xee6   : > { %s7765_s30 = sld [smem:[#allocation47_spill]] }
 0xee7   : > { %s7766_s3 = sld [smem:[#allocation49_spill]] }
 0xee8   : > { %s45_s1 = sadd.s32 1, %s7761_s8   ;;  %s7767_s9 = sld [smem:[#allocation51_spill]] }
 0xee9   : > { %p42_p3 = scmp.ge.s32.totalorder %s45_s1, 6  }
 0xeeb   :  { %44 = sbr.rel (!%p42_p3) target bundleno = 30 (0x1e), region = 360 }
 0xeee   : > { %s7769_s26 = smov %s7767_s9 }
 0xef0   :  { %4241 = vsyncpa [#allocation3], 1 }
 0xef1   :  { %4243 = vsyncpa [#allocation3 + $0x1], 1 }
 0xef2   :  { %4244 = vsyncpa [#allocation5], 1 }
 0xef3   :  { %4246 = vsyncpa [#allocation5 + $0x1], 1 }
 0xef4   :  { %4247 = vsyncpa [#allocation8], 1 }
 0xef5   :  { %4249 = vsyncpa [#allocation8 + $0x1], 1 }
 0xef6   :  { %4250 = vsyncpa [#allocation11], 1 }

</bundles_post_ra>
